<compile_context>
chip_gen: v6e
topology: v6e:2x2x1
jax: 0.10.0
libtpu: 0.0.40
codegen_flags: <defaults>
</compile_context>

<pallas_src>
import math
from functools import partial

import jax
import jax.numpy as jnp
import numpy as np
from jax.experimental import pallas as pl
from jax.experimental.pallas import tpu as pltpu


_MOSAIC = pltpu.CompilerParams(
    dimension_semantics=("parallel",),          # batch axis -> megacore/TC sharding
    vmem_limit_bytes=48 * 1024 * 1024,          # safe on v5e/v6e (128 MiB) and v7x (64 MiB)
)


# ----------------------------- Pallas kernels ------------------------------

def _s2d_conv_kernel(x_ref, w_ref, b_ref, o_ref, acc_ref, *, qs, cin4, relu):
    """2x2 stride-1 VALID conv on a space-to-depth(2) tensor
    (== the original 4x4 / stride-2 / pad-1 conv), bias + optional ReLU fused.

      x_ref : (1, Rs, 4*Cin) bf16  s2d activation, rows = flattened (Ps, Qs) grid
      w_ref : (16*Cin, Cout) bf16  tap-major weight matrix
      b_ref : (1, Cout)      f32
      o_ref : (1, Rs, Cout)  bf16  rows with i == Ps-1 or j == Qs-1 are junk
      acc_ref: VMEM (Rs, Cout) f32 scratch accumulator
    """
    a = x_ref[0]                                    # (Rs, 4*Cin) bf16
    rs = a.shape[0]
    acc_ref[...] = jnp.zeros_like(acc_ref)
    for t, d in enumerate((0, 1, qs, qs + 1)):      # taps (dp, dq) in {0,1}^2
        z = jnp.dot(a, w_ref[t * cin4:(t + 1) * cin4, :],
                    preferred_element_type=jnp.float32)
        if d == 0:
            acc_ref[...] += z
        else:
            # acc[p] += z[p + d]; the rows that miss the add are junk rows only.
            acc_ref[0:rs - d, :] += z[d:rs, :]
    y = acc_ref[...] + b_ref[...]
    if relu:
        y = jnp.maximum(y, 0.0)
    o_ref[0] = y.astype(o_ref.dtype)


def _conv3_res_stack_kernel(x_ref, mask_ref, w3_ref, b3_ref, rw1_ref, rw2_ref,
                            o_ref, a_ref, accc_ref, acch_ref, *,
                            q, n_res_layers):
    """Fused conv3 (3x3 / s1 / p1) + ResidualStack for one image.

    Padded-flat layout: rows index the (Hq+2) x (Wq+2) zero-padded grid,
    R = (Hq+2)*(Wq+2).  Border rows are "don't care"; mask_ref zeroes them
    whenever they feed a 3x3 conv, and the wrapper discards them at the end.

      x_ref  : (1, R, C)  bf16  conv2 output, zero-padded ring, flattened
      mask_ref: (R, 1)    f32   1.0 on interior rows, 0.0 on the padding ring
      w3_ref : (9*C, C)   bf16  conv3 weights, tap-major
      b3_ref : (1, C)     f32
      rw1_ref: (9*C, Ch)  bf16  residual 3x3 weights (shared across layers)
      rw2_ref: (Ch, C)    bf16  residual 1x1 weights
      o_ref  : (1, R, C)  f32
      a_ref  : VMEM (R, C)  bf16  staged (zero-bordered) conv input
      accc_ref: VMEM (R, C) f32   3x3 accumulator (C wide)
      acch_ref: VMEM (R, Ch) f32  3x3 accumulator (Ch wide)
    """
    r_tot, c = a_ref.shape

    def conv3x3(w_ref, acc_ref):
        acc_ref[...] = jnp.zeros_like(acc_ref)
        a = a_ref[...]                              # (R, C) bf16, zero borders
        for t in range(9):
            di, dj = divmod(t, 3)
            d = (di - 1) * q + (dj - 1)             # static row shift
            z = jnp.dot(a, w_ref[t * c:(t + 1) * c, :],
                        preferred_element_type=jnp.float32)
            if d == 0:
                acc_ref[...] += z
            elif d > 0:
                acc_ref[0:r_tot - d, :] += z[d:r_tot, :]
            else:
                acc_ref[(-d):r_tot, :] += z[0:r_tot + d, :]

    # ---- conv3: input already has true zero borders (padded in the wrapper) ----
    a_ref[...] = x_ref[0]
    conv3x3(w3_ref, accc_ref)
    x = accc_ref[...] + b3_ref[...]                 # f32 carry, stays in VMEM

    # ---- ResidualStack: one shared-weight layer applied n_res_layers times ----
    for _ in range(n_res_layers):
        # relu(x) with zeroed padding ring feeds the 3x3 conv (bf16 MXU operand)
        a_ref[...] = (jnp.maximum(x, 0.0) * mask_ref[...]).astype(a_ref.dtype)
        conv3x3(rw1_ref, acch_ref)
        h = jnp.maximum(acch_ref[...], 0.0).astype(jnp.bfloat16)
        x = x + jnp.dot(h, rw2_ref[...], preferred_element_type=jnp.float32)

    o_ref[0] = jnp.maximum(x, 0.0).astype(o_ref.dtype)   # final stack ReLU


# ------------------------------ Pallas wrappers -----------------------------

def _s2d_conv(x_nhwc, w_mat, bias, *, relu):
    """4x4 / stride-2 / pad-1 conv via space-to-depth(2) + in-kernel 2x2 taps."""
    n, h, w, cin = x_nhwc.shape
    assert h % 2 == 0 and w % 2 == 0, "even spatial dims required"
    xp = jnp.pad(x_nhwc, ((0, 0), (1, 1), (1, 1), (0, 0))).astype(jnp.bfloat16)
    ps, qs = (h + 2) // 2, (w + 2) // 2
    s2d = xp.reshape(n, ps, 2, qs, 2, cin).transpose(0, 1, 3, 2, 4, 5)
    s2d = s2d.reshape(n, ps * qs, 4 * cin)          # rows = flattened s2d grid
    rs = ps * qs
    cout = w_mat.shape[1]
    cost = pl.CostEstimate(
        flops=2 * n * rs * (16 * cin) * cout,
        transcendentals=0,
        bytes_accessed=n * rs * (4 * cin * 2 + cout * 2) + w_mat.size * 2 + cout * 4,
    )
    out = pl.pallas_call(
        partial(_s2d_conv_kernel, qs=qs, cin4=4 * cin, relu=relu),
        out_shape=jax.ShapeDtypeStruct((n, rs, cout), jnp.bfloat16),
        grid=(n,),
        in_specs=[
            pl.BlockSpec((1, rs, 4 * cin), lambda i: (i, 0, 0)),   # activation
            pl.BlockSpec((16 * cin, cout), lambda i: (0, 0)),      # weights
            pl.BlockSpec((1, cout), lambda i: (0, 0)),             # bias
        ],
        out_specs=pl.BlockSpec((1, rs, cout), lambda i: (i, 0, 0)),
        scratch_shapes=[pltpu.VMEM((rs, cout), jnp.float32)],
        compiler_params=_MOSAIC,
        cost_estimate=cost,
    )(s2d, w_mat, bias.reshape(1, cout))
    # drop the junk last row/col of the VALID-conv grid -> (N, H/2, W/2, Cout)
    return out.reshape(n, ps, qs, cout)[:, :ps - 1, :qs - 1, :]


def _conv3_res_stack(y_nhwc_bf16, w3m, b3, rw1m, rw2m, *, n_res_layers):
    """Fused 3x3 conv + whole ResidualStack, one pallas_call, grid over batch."""
    n, hq, wq, c = y_nhwc_bf16.shape
    p, q = hq + 2, wq + 2
    r_tot = p * q
    ch = rw1m.shape[1]

    xpad = jnp.pad(y_nhwc_bf16, ((0, 0), (1, 1), (1, 1), (0, 0)))
    xflat = xpad.reshape(n, r_tot, c)

    # static interior-row mask (1 on real pixels, 0 on the padding ring)
    rows = np.arange(r_tot)
    mask_np = (((rows // q) >= 1) & ((rows // q) <= hq)
               & ((rows % q) >= 1) & ((rows % q) <= wq)).astype(np.float32)
    mask = jnp.asarray(mask_np).reshape(r_tot, 1)

    flops = n * (2 * r_tot * (9 * c) * c
                 + n_res_layers * (2 * r_tot * (9 * c) * ch + 2 * r_tot * ch * c))
    cost = pl.CostEstimate(
        flops=flops,
        transcendentals=0,
        bytes_accessed=n * r_tot * c * (2 + 4)
        + (w3m.size + rw1m.size + rw2m.size) * 2 + c * 4,
    )
    out = pl.pallas_call(
        partial(_conv3_res_stack_kernel, q=q, n_res_layers=n_res_layers),
        out_shape=jax.ShapeDtypeStruct((n, r_tot, c), jnp.float32),
        grid=(n,),
        in_specs=[
            pl.BlockSpec((1, r_tot, c), lambda i: (i, 0, 0)),   # padded activation
            pl.BlockSpec((r_tot, 1), lambda i: (0, 0)),         # interior mask
            pl.BlockSpec((9 * c, c), lambda i: (0, 0)),          # conv3 weights
            pl.BlockSpec((1, c), lambda i: (0, 0)),              # conv3 bias
            pl.BlockSpec((9 * c, ch), lambda i: (0, 0)),         # res 3x3 weights
            pl.BlockSpec((ch, c), lambda i: (0, 0)),             # res 1x1 weights
        ],
        out_specs=pl.BlockSpec((1, r_tot, c), lambda i: (i, 0, 0)),
        scratch_shapes=[pltpu.VMEM((r_tot, c), jnp.bfloat16),    # staged conv input
                        pltpu.VMEM((r_tot, c), jnp.float32),     # 3x3 acc (C wide)
                        pltpu.VMEM((r_tot, ch), jnp.float32)],   # 3x3 acc (Ch wide)
        compiler_params=_MOSAIC,
        cost_estimate=cost,
    )(xflat, mask, w3m, b3.reshape(1, c), rw1m, rw2m)
    return out.reshape(n, p, q, c)[:, 1:hq + 1, 1:wq + 1, :]


# --------------------------- weight preprocessing ---------------------------

def _w4x4_to_s2d_mat(w):
    """PyTorch (Cout, Cin, 4, 4) -> tap-major ((dp,dq,a,b,Cin), Cout) matrix for
    the space-to-depth(2) + 2x2 stride-1 formulation."""
    cout, cin, _, _ = w.shape
    m = jnp.transpose(w, (2, 3, 1, 0))            # (kh, kw, cin, cout)
    m = m.reshape(2, 2, 2, 2, cin, cout)          # (dp, a, dq, b, cin, cout)
    m = jnp.transpose(m, (0, 2, 1, 3, 4, 5))      # (dp, dq, a, b, cin, cout)
    return m.reshape(16 * cin, cout)


def _w3x3_to_mat(w):
    """(Cout, Cin, 3, 3) -> ((kh,kw,Cin), Cout) tap-major matrix."""
    cout, cin, kh, kw = w.shape
    return jnp.transpose(w, (2, 3, 1, 0)).reshape(kh * kw * cin, cout)


def _w1x1_to_mat(w):
    cout, cin, _, _ = w.shape
    return w.reshape(cout, cin).T


def _conv_init(key, cout, cin, kh, kw, bias=True):
    k1, k2 = jax.random.split(key)
    fan_in = cin * kh * kw
    bound = 1.0 / math.sqrt(fan_in)
    w = jax.random.uniform(k1, (cout, cin, kh, kw), jnp.float32, -bound, bound)
    b = (jax.random.uniform(k2, (cout,), jnp.float32, -bound, bound)
         if bias else None)
    return w, b


def init_encoder_params(key, in_dim, h_dim, res_h_dim):
    ks = jax.random.split(key, 5)
    w1, b1 = _conv_init(ks[0], h_dim // 2, in_dim, 4, 4)
    w2, b2 = _conv_init(ks[1], h_dim, h_dim // 2, 4, 4)
    w3, b3 = _conv_init(ks[2], h_dim, h_dim, 3, 3)
    # shared residual layer (bias=False in the reference ResidualLayer)
    rw1, _ = _conv_init(ks[3], res_h_dim, h_dim, 3, 3, bias=False)
    rw2, _ = _conv_init(ks[4], h_dim, res_h_dim, 1, 1, bias=False)

    bf = jnp.bfloat16
    return dict(
        # f32 OIHW weights kept for the pure-JAX reference check
        w1=w1, b1=b1, w2=w2, b2=b2, w3=w3, b3=b3, rw1=rw1, rw2=rw2,
        # bf16 matmul-form weights for the Pallas kernels
        w1m=_w4x4_to_s2d_mat(w1).astype(bf),
        w2m=_w4x4_to_s2d_mat(w2).astype(bf),
        w3m=_w3x3_to_mat(w3).astype(bf),
        rw1m=_w3x3_to_mat(rw1).astype(bf),
        rw2m=_w1x1_to_mat(rw2).astype(bf),
    )


# ------------------------------- forward pass -------------------------------

@partial(jax.jit, static_argnames=("n_res_layers",))
def encoder_forward_pallas(params, x_nchw, n_res_layers):
    x = jnp.transpose(x_nchw, (0, 2, 3, 1))                       # NHWC f32
    # conv1: 4x4 s2 p1 + ReLU  (s2d + in-kernel 2x2 tap accumulation)
    x = _s2d_conv(x, params["w1m"], params["b1"], relu=True)      # bf16
    # conv2: 4x4 s2 p1 + ReLU
    x = _s2d_conv(x, params["w2m"], params["b2"], relu=True)      # bf16
    # conv3 (3x3 s1 p1) + whole ResidualStack fused, activation resident in VMEM
    x = _conv3_res_stack(x, params["w3m"], params["b3"],
                         params["rw1m"], params["rw2m"],
                         n_res_layers=n_res_layers)               # f32
    return jnp.transpose(x, (0, 3, 1, 2))                         # NCHW f32


# ------------------------- pure-JAX reference (NCHW) ------------------------

def encoder_forward_ref(params, x, n_res_layers):
    def conv(x, w, b, stride, pad):
        y = jax.lax.conv_general_dilated(
            x, w, (stride, stride), [(pad, pad), (pad, pad)],
            dimension_numbers=("NCHW", "OIHW", "NCHW"),
            precision=jax.lax.Precision.HIGHEST)
        if b is not None:
            y = y + b[None, :, None, None]
        return y

    x = jax.nn.relu(conv(x, params["w1"], params["b1"], 2, 1))
    x = jax.nn.relu(conv(x, params["w2"], params["b2"], 2, 1))
    x = conv(x, params["w3"], params["b3"], 1, 1)
    for _ in range(n_res_layers):
        h = jax.nn.relu(x)
        h = jax.nn.relu(conv(h, params["rw1"], None, 1, 1))
        h = conv(h, params["rw2"], None, 1, 0)
        x = x + h
    return jax.nn.relu(x)


# ---------------------------------- main ------------------------------------

if __name__ == "__main__":
    batch, in_dim, spatial = 2, 4, 16
    h_dim, res_h_dim, n_res_layers = 32, 16, 2

    key = jax.random.PRNGKey(0)
    k_param, k_x = jax.random.split(key)
    params = init_encoder_params(k_param, in_dim, h_dim, res_h_dim)
    x = jax.random.normal(k_x, (batch, in_dim, spatial, spatial), jnp.float32)

    out = jax.block_until_ready(
        encoder_forward_pallas(params, x, n_res_layers=n_res_layers))
    ref = jax.block_until_ready(encoder_forward_ref(params, x, n_res_layers))

    assert out.shape == (batch, h_dim, spatial // 4, spatial // 4), out.shape
    err = float(np.max(np.abs(np.asarray(out) - np.asarray(ref))))
    assert np.allclose(np.asarray(out), np.asarray(ref),
                       rtol=5e-2, atol=5e-2), f"max abs diff = {err:g}"

    print("KERNEL_OK")
</pallas_src>

<mosaic_0001>
module attributes {stable_mosaic.version = 11 : i64} {
  func.func @_s2d_conv_kernel(%arg0: i32, %arg1: memref<1x81x16xbf16, #tpu.memory_space<vmem>>, %arg2: memref<64x16xbf16, #tpu.memory_space<vmem>>, %arg3: memref<1x16xf32, #tpu.memory_space<vmem>>, %arg4: memref<1x81x16xbf16, #tpu.memory_space<vmem>>, %arg5: memref<81x16xf32, #tpu.memory_space<vmem>>) attributes {dimension_semantics = [#tpu.dimension_semantics<parallel>], iteration_bounds = array<i64: 2>, scalar_prefetch = 0 : i64, scratch_operands = 1 : i64, tpu.core_type = #tpu.core_type<tc>, window_params = [{transform_indices = @transform_0, window_bounds = array<i64: 1, 81, 16>}, {pipeline_mode = #tpu.pipeline_mode<synchronous>, transform_indices = @transform_1, window_bounds = array<i64: 64, 16>}, {pipeline_mode = #tpu.pipeline_mode<synchronous>, transform_indices = @transform_2, window_bounds = array<i64: 1, 16>}, {transform_indices = @transform_3, window_bounds = array<i64: 1, 81, 16>}]} {
    %c0 = arith.constant 0 : index
    %c0_0 = arith.constant 0 : index
    %c0_1 = arith.constant 0 : index
    %0 = vector.load %arg1[%c0, %c0_0, %c0_1] : memref<1x81x16xbf16, #tpu.memory_space<vmem>>, vector<1x81x16xbf16>
    %1 = vector.shape_cast %0 : vector<1x81x16xbf16> to vector<81x16xbf16>
    %cst = arith.constant 0.000000e+00 : f32
    %2 = vector.broadcast %cst : f32 to vector<81x16xf32>
    %c0_2 = arith.constant 0 : index
    %c0_3 = arith.constant 0 : index
    %3 = vector.load %arg5[%c0_2, %c0_3] : memref<81x16xf32, #tpu.memory_space<vmem>>, vector<81x16xf32>
    tpu.vector_store %arg5[%c0_2, %c0_3], %2 {strides = array<i32>} : memref<81x16xf32, #tpu.memory_space<vmem>>, vector<81x16xf32>,
    %c0_4 = arith.constant 0 : index
    %c0_5 = arith.constant 0 : index
    %4 = vector.load %arg2[%c0_4, %c0_5] : memref<64x16xbf16, #tpu.memory_space<vmem>>, vector<16x16xbf16>
    %cst_6 = arith.constant dense<0.000000e+00> : vector<81x16xf32>
    %5 = tpu.matmul %1, %4, %cst_6 {dimension_numbers = #tpu.dot_dimension_numbers<[1], [0], [0], [1], [0, 0, 1, 1], [], []>} : vector<81x16xbf16>, vector<16x16xbf16>, vector<81x16xf32> -> vector<81x16xf32>
    %c0_7 = arith.constant 0 : index
    %c0_8 = arith.constant 0 : index
    %6 = vector.load %arg5[%c0_7, %c0_8] : memref<81x16xf32, #tpu.memory_space<vmem>>, vector<81x16xf32>
    %7 = arith.addf %6, %5 : vector<81x16xf32>
    %c0_9 = arith.constant 0 : index
    %c0_10 = arith.constant 0 : index
    %8 = vector.load %arg5[%c0_9, %c0_10] : memref<81x16xf32, #tpu.memory_space<vmem>>, vector<81x16xf32>
    tpu.vector_store %arg5[%c0_9, %c0_10], %7 {strides = array<i32>} : memref<81x16xf32, #tpu.memory_space<vmem>>, vector<81x16xf32>,
    %c16 = arith.constant 16 : index
    %c0_11 = arith.constant 0 : index
    %9 = vector.load %arg2[%c16, %c0_11] : memref<64x16xbf16, #tpu.memory_space<vmem>>, vector<16x16xbf16>
    %cst_12 = arith.constant dense<0.000000e+00> : vector<81x16xf32>
    %10 = tpu.matmul %1, %9, %cst_12 {dimension_numbers = #tpu.dot_dimension_numbers<[1], [0], [0], [1], [0, 0, 1, 1], [], []>} : vector<81x16xbf16>, vector<16x16xbf16>, vector<81x16xf32> -> vector<81x16xf32>
    %c0_13 = arith.constant 0 : index
    %c0_14 = arith.constant 0 : index
    %11 = vector.load %arg5[%c0_13, %c0_14] : memref<81x16xf32, #tpu.memory_space<vmem>>, vector<80x16xf32>
    %12 = vector.extract_strided_slice %10 {offsets = [1, 0], sizes = [80, 16], strides = [1, 1]} : vector<81x16xf32> to vector<80x16xf32>
    %13 = arith.addf %11, %12 : vector<80x16xf32>
    %c0_15 = arith.constant 0 : index
    %c0_16 = arith.constant 0 : index
    %14 = vector.load %arg5[%c0_15, %c0_16] : memref<81x16xf32, #tpu.memory_space<vmem>>, vector<80x16xf32>
    tpu.vector_store %arg5[%c0_15, %c0_16], %13 {strides = array<i32>} : memref<81x16xf32, #tpu.memory_space<vmem>>, vector<80x16xf32>,
    %c32 = arith.constant 32 : index
    %c0_17 = arith.constant 0 : index
    %15 = vector.load %arg2[%c32, %c0_17] : memref<64x16xbf16, #tpu.memory_space<vmem>>, vector<16x16xbf16>
    %cst_18 = arith.constant dense<0.000000e+00> : vector<81x16xf32>
    %16 = tpu.matmul %1, %15, %cst_18 {dimension_numbers = #tpu.dot_dimension_numbers<[1], [0], [0], [1], [0, 0, 1, 1], [], []>} : vector<81x16xbf16>, vector<16x16xbf16>, vector<81x16xf32> -> vector<81x16xf32>
    %c0_19 = arith.constant 0 : index
    %c0_20 = arith.constant 0 : index
    %17 = vector.load %arg5[%c0_19, %c0_20] : memref<81x16xf32, #tpu.memory_space<vmem>>, vector<72x16xf32>
    %18 = vector.extract_strided_slice %16 {offsets = [9, 0], sizes = [72, 16], strides = [1, 1]} : vector<81x16xf32> to vector<72x16xf32>
    %19 = arith.addf %17, %18 : vector<72x16xf32>
    %c0_21 = arith.constant 0 : index
    %c0_22 = arith.constant 0 : index
    %20 = vector.load %arg5[%c0_21, %c0_22] : memref<81x16xf32, #tpu.memory_space<vmem>>, vector<72x16xf32>
    tpu.vector_store %arg5[%c0_21, %c0_22], %19 {strides = array<i32>} : memref<81x16xf32, #tpu.memory_space<vmem>>, vector<72x16xf32>,
    %c48 = arith.constant 48 : index
    %c0_23 = arith.constant 0 : index
    %21 = vector.load %arg2[%c48, %c0_23] : memref<64x16xbf16, #tpu.memory_space<vmem>>, vector<16x16xbf16>
    %cst_24 = arith.constant dense<0.000000e+00> : vector<81x16xf32>
    %22 = tpu.matmul %1, %21, %cst_24 {dimension_numbers = #tpu.dot_dimension_numbers<[1], [0], [0], [1], [0, 0, 1, 1], [], []>} : vector<81x16xbf16>, vector<16x16xbf16>, vector<81x16xf32> -> vector<81x16xf32>
    %c0_25 = arith.constant 0 : index
    %c0_26 = arith.constant 0 : index
    %23 = vector.load %arg5[%c0_25, %c0_26] : memref<81x16xf32, #tpu.memory_space<vmem>>, vector<71x16xf32>
    %24 = vector.extract_strided_slice %22 {offsets = [10, 0], sizes = [71, 16], strides = [1, 1]} : vector<81x16xf32> to vector<71x16xf32>
    %25 = arith.addf %23, %24 : vector<71x16xf32>
    %c0_27 = arith.constant 0 : index
    %c0_28 = arith.constant 0 : index
    %26 = vector.load %arg5[%c0_27, %c0_28] : memref<81x16xf32, #tpu.memory_space<vmem>>, vector<71x16xf32>
    tpu.vector_store %arg5[%c0_27, %c0_28], %25 {strides = array<i32>} : memref<81x16xf32, #tpu.memory_space<vmem>>, vector<71x16xf32>,
    %c0_29 = arith.constant 0 : index
    %c0_30 = arith.constant 0 : index
    %27 = vector.load %arg5[%c0_29, %c0_30] : memref<81x16xf32, #tpu.memory_space<vmem>>, vector<81x16xf32>
    %c0_31 = arith.constant 0 : index
    %c0_32 = arith.constant 0 : index
    %28 = vector.load %arg3[%c0_31, %c0_32] : memref<1x16xf32, #tpu.memory_space<vmem>>, vector<1x16xf32>
    %29 = vector.broadcast %28 : vector<1x16xf32> to vector<81x16xf32>
    %30 = arith.addf %27, %29 : vector<81x16xf32>
    %cst_33 = arith.constant 0.000000e+00 : f32
    %31 = vector.broadcast %cst_33 : f32 to vector<81x16xf32>
    %32 = arith.maximumf %30, %31 : vector<81x16xf32>
    %33 = arith.truncf %32 : vector<81x16xf32> to vector<81x16xbf16>
    %c0_34 = arith.constant 0 : index
    %c0_35 = arith.constant 0 : index
    %c0_36 = arith.constant 0 : index
    %34 = vector.load %arg4[%c0_34, %c0_35, %c0_36] : memref<1x81x16xbf16, #tpu.memory_space<vmem>>, vector<1x81x16xbf16>
    %35 = vector.shape_cast %34 : vector<1x81x16xbf16> to vector<81x16xbf16>
    %36 = vector.shape_cast %33 : vector<81x16xbf16> to vector<1x81x16xbf16>
    tpu.vector_store %arg4[%c0_34, %c0_35, %c0_36], %36 {strides = array<i32>} : memref<1x81x16xbf16, #tpu.memory_space<vmem>>, vector<1x81x16xbf16>,
    return
  }
  func.func @transform_0(%arg0: i32) -> (i32, i32, i32) {
    %c0_i32 = arith.constant 0 : i32
    %c0_i32_0 = arith.constant 0 : i32
    %c0_i32_1 = arith.constant 0 : i32
    return %arg0, %c0_i32, %c0_i32_0 : i32, i32, i32
  }
  func.func @transform_1(%arg0: i32) -> (i32, i32) {
    %c0_i32 = arith.constant 0 : i32
    %c0_i32_0 = arith.constant 0 : i32
    %c0_i32_1 = arith.constant 0 : i32
    return %c0_i32, %c0_i32_0 : i32, i32
  }
  func.func @transform_2(%arg0: i32) -> (i32, i32) {
    %c0_i32 = arith.constant 0 : i32
    %c0_i32_0 = arith.constant 0 : i32
    %c0_i32_1 = arith.constant 0 : i32
    return %c0_i32, %c0_i32_0 : i32, i32
  }
  func.func @transform_3(%arg0: i32) -> (i32, i32, i32) {
    %c0_i32 = arith.constant 0 : i32
    %c0_i32_0 = arith.constant 0 : i32
    %c0_i32_1 = arith.constant 0 : i32
    return %arg0, %c0_i32, %c0_i32_0 : i32, i32, i32
  }
}

module attributes {stable_mosaic.version = 11 : i64} {
  func.func @_s2d_conv_kernel(%arg0: i32, %arg1: memref<1x25x64xbf16, #tpu.memory_space<vmem>>, %arg2: memref<256x32xbf16, #tpu.memory_space<vmem>>, %arg3: memref<1x32xf32, #tpu.memory_space<vmem>>, %arg4: memref<1x25x32xbf16, #tpu.memory_space<vmem>>, %arg5: memref<25x32xf32, #tpu.memory_space<vmem>>) attributes {dimension_semantics = [#tpu.dimension_semantics<parallel>], iteration_bounds = array<i64: 2>, scalar_prefetch = 0 : i64, scratch_operands = 1 : i64, tpu.core_type = #tpu.core_type<tc>, window_params = [{transform_indices = @transform_0, window_bounds = array<i64: 1, 25, 64>}, {pipeline_mode = #tpu.pipeline_mode<synchronous>, transform_indices = @transform_1, window_bounds = array<i64: 256, 32>}, {pipeline_mode = #tpu.pipeline_mode<synchronous>, transform_indices = @transform_2, window_bounds = array<i64: 1, 32>}, {transform_indices = @transform_3, window_bounds = array<i64: 1, 25, 32>}]} {
    %c0 = arith.constant 0 : index
    %c0_0 = arith.constant 0 : index
    %c0_1 = arith.constant 0 : index
    %0 = vector.load %arg1[%c0, %c0_0, %c0_1] : memref<1x25x64xbf16, #tpu.memory_space<vmem>>, vector<1x25x64xbf16>
    %1 = vector.shape_cast %0 : vector<1x25x64xbf16> to vector<25x64xbf16>
    %cst = arith.constant 0.000000e+00 : f32
    %2 = vector.broadcast %cst : f32 to vector<25x32xf32>
    %c0_2 = arith.constant 0 : index
    %c0_3 = arith.constant 0 : index
    %3 = vector.load %arg5[%c0_2, %c0_3] : memref<25x32xf32, #tpu.memory_space<vmem>>, vector<25x32xf32>
    tpu.vector_store %arg5[%c0_2, %c0_3], %2 {strides = array<i32>} : memref<25x32xf32, #tpu.memory_space<vmem>>, vector<25x32xf32>,
    %c0_4 = arith.constant 0 : index
    %c0_5 = arith.constant 0 : index
    %4 = vector.load %arg2[%c0_4, %c0_5] : memref<256x32xbf16, #tpu.memory_space<vmem>>, vector<64x32xbf16>
    %cst_6 = arith.constant dense<0.000000e+00> : vector<25x32xf32>
    %5 = tpu.matmul %1, %4, %cst_6 {dimension_numbers = #tpu.dot_dimension_numbers<[1], [0], [0], [1], [0, 0, 1, 1], [], []>} : vector<25x64xbf16>, vector<64x32xbf16>, vector<25x32xf32> -> vector<25x32xf32>
    %c0_7 = arith.constant 0 : index
    %c0_8 = arith.constant 0 : index
    %6 = vector.load %arg5[%c0_7, %c0_8] : memref<25x32xf32, #tpu.memory_space<vmem>>, vector<25x32xf32>
    %7 = arith.addf %6, %5 : vector<25x32xf32>
    %c0_9 = arith.constant 0 : index
    %c0_10 = arith.constant 0 : index
    %8 = vector.load %arg5[%c0_9, %c0_10] : memref<25x32xf32, #tpu.memory_space<vmem>>, vector<25x32xf32>
    tpu.vector_store %arg5[%c0_9, %c0_10], %7 {strides = array<i32>} : memref<25x32xf32, #tpu.memory_space<vmem>>, vector<25x32xf32>,
    %c64 = arith.constant 64 : index
    %c0_11 = arith.constant 0 : index
    %9 = vector.load %arg2[%c64, %c0_11] : memref<256x32xbf16, #tpu.memory_space<vmem>>, vector<64x32xbf16>
    %cst_12 = arith.constant dense<0.000000e+00> : vector<25x32xf32>
    %10 = tpu.matmul %1, %9, %cst_12 {dimension_numbers = #tpu.dot_dimension_numbers<[1], [0], [0], [1], [0, 0, 1, 1], [], []>} : vector<25x64xbf16>, vector<64x32xbf16>, vector<25x32xf32> -> vector<25x32xf32>
    %c0_13 = arith.constant 0 : index
    %c0_14 = arith.constant 0 : index
    %11 = vector.load %arg5[%c0_13, %c0_14] : memref<25x32xf32, #tpu.memory_space<vmem>>, vector<24x32xf32>
    %12 = vector.extract_strided_slice %10 {offsets = [1, 0], sizes = [24, 32], strides = [1, 1]} : vector<25x32xf32> to vector<24x32xf32>
    %13 = arith.addf %11, %12 : vector<24x32xf32>
    %c0_15 = arith.constant 0 : index
    %c0_16 = arith.constant 0 : index
    %14 = vector.load %arg5[%c0_15, %c0_16] : memref<25x32xf32, #tpu.memory_space<vmem>>, vector<24x32xf32>
    tpu.vector_store %arg5[%c0_15, %c0_16], %13 {strides = array<i32>} : memref<25x32xf32, #tpu.memory_space<vmem>>, vector<24x32xf32>,
    %c128 = arith.constant 128 : index
    %c0_17 = arith.constant 0 : index
    %15 = vector.load %arg2[%c128, %c0_17] : memref<256x32xbf16, #tpu.memory_space<vmem>>, vector<64x32xbf16>
    %cst_18 = arith.constant dense<0.000000e+00> : vector<25x32xf32>
    %16 = tpu.matmul %1, %15, %cst_18 {dimension_numbers = #tpu.dot_dimension_numbers<[1], [0], [0], [1], [0, 0, 1, 1], [], []>} : vector<25x64xbf16>, vector<64x32xbf16>, vector<25x32xf32> -> vector<25x32xf32>
    %c0_19 = arith.constant 0 : index
    %c0_20 = arith.constant 0 : index
    %17 = vector.load %arg5[%c0_19, %c0_20] : memref<25x32xf32, #tpu.memory_space<vmem>>, vector<20x32xf32>
    %18 = vector.extract_strided_slice %16 {offsets = [5, 0], sizes = [20, 32], strides = [1, 1]} : vector<25x32xf32> to vector<20x32xf32>
    %19 = arith.addf %17, %18 : vector<20x32xf32>
    %c0_21 = arith.constant 0 : index
    %c0_22 = arith.constant 0 : index
    %20 = vector.load %arg5[%c0_21, %c0_22] : memref<25x32xf32, #tpu.memory_space<vmem>>, vector<20x32xf32>
    tpu.vector_store %arg5[%c0_21, %c0_22], %19 {strides = array<i32>} : memref<25x32xf32, #tpu.memory_space<vmem>>, vector<20x32xf32>,
    %c192 = arith.constant 192 : index
    %c0_23 = arith.constant 0 : index
    %21 = vector.load %arg2[%c192, %c0_23] : memref<256x32xbf16, #tpu.memory_space<vmem>>, vector<64x32xbf16>
    %cst_24 = arith.constant dense<0.000000e+00> : vector<25x32xf32>
    %22 = tpu.matmul %1, %21, %cst_24 {dimension_numbers = #tpu.dot_dimension_numbers<[1], [0], [0], [1], [0, 0, 1, 1], [], []>} : vector<25x64xbf16>, vector<64x32xbf16>, vector<25x32xf32> -> vector<25x32xf32>
    %c0_25 = arith.constant 0 : index
    %c0_26 = arith.constant 0 : index
    %23 = vector.load %arg5[%c0_25, %c0_26] : memref<25x32xf32, #tpu.memory_space<vmem>>, vector<19x32xf32>
    %24 = vector.extract_strided_slice %22 {offsets = [6, 0], sizes = [19, 32], strides = [1, 1]} : vector<25x32xf32> to vector<19x32xf32>
    %25 = arith.addf %23, %24 : vector<19x32xf32>
    %c0_27 = arith.constant 0 : index
    %c0_28 = arith.constant 0 : index
    %26 = vector.load %arg5[%c0_27, %c0_28] : memref<25x32xf32, #tpu.memory_space<vmem>>, vector<19x32xf32>
    tpu.vector_store %arg5[%c0_27, %c0_28], %25 {strides = array<i32>} : memref<25x32xf32, #tpu.memory_space<vmem>>, vector<19x32xf32>,
    %c0_29 = arith.constant 0 : index
    %c0_30 = arith.constant 0 : index
    %27 = vector.load %arg5[%c0_29, %c0_30] : memref<25x32xf32, #tpu.memory_space<vmem>>, vector<25x32xf32>
    %c0_31 = arith.constant 0 : index
    %c0_32 = arith.constant 0 : index
    %28 = vector.load %arg3[%c0_31, %c0_32] : memref<1x32xf32, #tpu.memory_space<vmem>>, vector<1x32xf32>
    %29 = vector.broadcast %28 : vector<1x32xf32> to vector<25x32xf32>
    %30 = arith.addf %27, %29 : vector<25x32xf32>
    %cst_33 = arith.constant 0.000000e+00 : f32
    %31 = vector.broadcast %cst_33 : f32 to vector<25x32xf32>
    %32 = arith.maximumf %30, %31 : vector<25x32xf32>
    %33 = arith.truncf %32 : vector<25x32xf32> to vector<25x32xbf16>
    %c0_34 = arith.constant 0 : index
    %c0_35 = arith.constant 0 : index
    %c0_36 = arith.constant 0 : index
    %34 = vector.load %arg4[%c0_34, %c0_35, %c0_36] : memref<1x25x32xbf16, #tpu.memory_space<vmem>>, vector<1x25x32xbf16>
    %35 = vector.shape_cast %34 : vector<1x25x32xbf16> to vector<25x32xbf16>
    %36 = vector.shape_cast %33 : vector<25x32xbf16> to vector<1x25x32xbf16>
    tpu.vector_store %arg4[%c0_34, %c0_35, %c0_36], %36 {strides = array<i32>} : memref<1x25x32xbf16, #tpu.memory_space<vmem>>, vector<1x25x32xbf16>,
    return
  }
  func.func @transform_0(%arg0: i32) -> (i32, i32, i32) {
    %c0_i32 = arith.constant 0 : i32
    %c0_i32_0 = arith.constant 0 : i32
    %c0_i32_1 = arith.constant 0 : i32
    return %arg0, %c0_i32, %c0_i32_0 : i32, i32, i32
  }
  func.func @transform_1(%arg0: i32) -> (i32, i32) {
    %c0_i32 = arith.constant 0 : i32
    %c0_i32_0 = arith.constant 0 : i32
    %c0_i32_1 = arith.constant 0 : i32
    return %c0_i32, %c0_i32_0 : i32, i32
  }
  func.func @transform_2(%arg0: i32) -> (i32, i32) {
    %c0_i32 = arith.constant 0 : i32
    %c0_i32_0 = arith.constant 0 : i32
    %c0_i32_1 = arith.constant 0 : i32
    return %c0_i32, %c0_i32_0 : i32, i32
  }
  func.func @transform_3(%arg0: i32) -> (i32, i32, i32) {
    %c0_i32 = arith.constant 0 : i32
    %c0_i32_0 = arith.constant 0 : i32
    %c0_i32_1 = arith.constant 0 : i32
    return %arg0, %c0_i32, %c0_i32_0 : i32, i32, i32
  }
}

module attributes {stable_mosaic.version = 11 : i64} {
  func.func @_conv3_res_stack_kernel(%arg0: i32, %arg1: memref<1x36x32xbf16, #tpu.memory_space<vmem>>, %arg2: memref<36x1xf32, #tpu.memory_space<vmem>>, %arg3: memref<288x32xbf16, #tpu.memory_space<vmem>>, %arg4: memref<1x32xf32, #tpu.memory_space<vmem>>, %arg5: memref<288x16xbf16, #tpu.memory_space<vmem>>, %arg6: memref<16x32xbf16, #tpu.memory_space<vmem>>, %arg7: memref<1x36x32xf32, #tpu.memory_space<vmem>>, %arg8: memref<36x32xbf16, #tpu.memory_space<vmem>>, %arg9: memref<36x32xf32, #tpu.memory_space<vmem>>, %arg10: memref<36x16xf32, #tpu.memory_space<vmem>>) attributes {dimension_semantics = [#tpu.dimension_semantics<parallel>], iteration_bounds = array<i64: 2>, scalar_prefetch = 0 : i64, scratch_operands = 3 : i64, tpu.core_type = #tpu.core_type<tc>, window_params = [{transform_indices = @transform_0, window_bounds = array<i64: 1, 36, 32>}, {pipeline_mode = #tpu.pipeline_mode<synchronous>, transform_indices = @transform_1, window_bounds = array<i64: 36, 1>}, {pipeline_mode = #tpu.pipeline_mode<synchronous>, transform_indices = @transform_2, window_bounds = array<i64: 288, 32>}, {pipeline_mode = #tpu.pipeline_mode<synchronous>, transform_indices = @transform_3, window_bounds = array<i64: 1, 32>}, {pipeline_mode = #tpu.pipeline_mode<synchronous>, transform_indices = @transform_4, window_bounds = array<i64: 288, 16>}, {pipeline_mode = #tpu.pipeline_mode<synchronous>, transform_indices = @transform_5, window_bounds = array<i64: 16, 32>}, {transform_indices = @transform_6, window_bounds = array<i64: 1, 36, 32>}]} {
    %c0 = arith.constant 0 : index
    %c0_0 = arith.constant 0 : index
    %c0_1 = arith.constant 0 : index
    %0 = vector.load %arg1[%c0, %c0_0, %c0_1] : memref<1x36x32xbf16, #tpu.memory_space<vmem>>, vector<1x36x32xbf16>
    %1 = vector.shape_cast %0 : vector<1x36x32xbf16> to vector<36x32xbf16>
    %c0_2 = arith.constant 0 : index
    %c0_3 = arith.constant 0 : index
    %2 = vector.load %arg8[%c0_2, %c0_3] : memref<36x32xbf16, #tpu.memory_space<vmem>>, vector<36x32xbf16>
    tpu.vector_store %arg8[%c0_2, %c0_3], %1 {strides = array<i32>} : memref<36x32xbf16, #tpu.memory_space<vmem>>, vector<36x32xbf16>,
    %cst = arith.constant 0.000000e+00 : f32
    %3 = vector.broadcast %cst : f32 to vector<36x32xf32>
    %c0_4 = arith.constant 0 : index
    %c0_5 = arith.constant 0 : index
    %4 = vector.load %arg9[%c0_4, %c0_5] : memref<36x32xf32, #tpu.memory_space<vmem>>, vector<36x32xf32>
    tpu.vector_store %arg9[%c0_4, %c0_5], %3 {strides = array<i32>} : memref<36x32xf32, #tpu.memory_space<vmem>>, vector<36x32xf32>,
    %c0_6 = arith.constant 0 : index
    %c0_7 = arith.constant 0 : index
    %5 = vector.load %arg8[%c0_6, %c0_7] : memref<36x32xbf16, #tpu.memory_space<vmem>>, vector<36x32xbf16>
    %c0_8 = arith.constant 0 : index
    %c0_9 = arith.constant 0 : index
    %6 = vector.load %arg3[%c0_8, %c0_9] : memref<288x32xbf16, #tpu.memory_space<vmem>>, vector<32x32xbf16>
    %cst_10 = arith.constant dense<0.000000e+00> : vector<36x32xf32>
    %7 = tpu.matmul %5, %6, %cst_10 {dimension_numbers = #tpu.dot_dimension_numbers<[1], [0], [0], [1], [0, 0, 1, 1], [], []>} : vector<36x32xbf16>, vector<32x32xbf16>, vector<36x32xf32> -> vector<36x32xf32>
    %c7 = arith.constant 7 : index
    %c0_11 = arith.constant 0 : index
    %8 = vector.load %arg9[%c7, %c0_11] : memref<36x32xf32, #tpu.memory_space<vmem>>, vector<29x32xf32>
    %9 = vector.extract_strided_slice %7 {offsets = [0, 0], sizes = [29, 32], strides = [1, 1]} : vector<36x32xf32> to vector<29x32xf32>
    %10 = arith.addf %8, %9 : vector<29x32xf32>
    %c7_12 = arith.constant 7 : index
    %c0_13 = arith.constant 0 : index
    %11 = vector.load %arg9[%c7_12, %c0_13] : memref<36x32xf32, #tpu.memory_space<vmem>>, vector<29x32xf32>
    tpu.vector_store %arg9[%c7_12, %c0_13], %10 {strides = array<i32>} : memref<36x32xf32, #tpu.memory_space<vmem>>, vector<29x32xf32>,
    %c32 = arith.constant 32 : index
    %c0_14 = arith.constant 0 : index
    %12 = vector.load %arg3[%c32, %c0_14] : memref<288x32xbf16, #tpu.memory_space<vmem>>, vector<32x32xbf16>
    %cst_15 = arith.constant dense<0.000000e+00> : vector<36x32xf32>
    %13 = tpu.matmul %5, %12, %cst_15 {dimension_numbers = #tpu.dot_dimension_numbers<[1], [0], [0], [1], [0, 0, 1, 1], [], []>} : vector<36x32xbf16>, vector<32x32xbf16>, vector<36x32xf32> -> vector<36x32xf32>
    %c6 = arith.constant 6 : index
    %c0_16 = arith.constant 0 : index
    %14 = vector.load %arg9[%c6, %c0_16] : memref<36x32xf32, #tpu.memory_space<vmem>>, vector<30x32xf32>
    %15 = vector.extract_strided_slice %13 {offsets = [0, 0], sizes = [30, 32], strides = [1, 1]} : vector<36x32xf32> to vector<30x32xf32>
    %16 = arith.addf %14, %15 : vector<30x32xf32>
    %c6_17 = arith.constant 6 : index
    %c0_18 = arith.constant 0 : index
    %17 = vector.load %arg9[%c6_17, %c0_18] : memref<36x32xf32, #tpu.memory_space<vmem>>, vector<30x32xf32>
    tpu.vector_store %arg9[%c6_17, %c0_18], %16 {strides = array<i32>} : memref<36x32xf32, #tpu.memory_space<vmem>>, vector<30x32xf32>,
    %c64 = arith.constant 64 : index
    %c0_19 = arith.constant 0 : index
    %18 = vector.load %arg3[%c64, %c0_19] : memref<288x32xbf16, #tpu.memory_space<vmem>>, vector<32x32xbf16>
    %cst_20 = arith.constant dense<0.000000e+00> : vector<36x32xf32>
    %19 = tpu.matmul %5, %18, %cst_20 {dimension_numbers = #tpu.dot_dimension_numbers<[1], [0], [0], [1], [0, 0, 1, 1], [], []>} : vector<36x32xbf16>, vector<32x32xbf16>, vector<36x32xf32> -> vector<36x32xf32>
    %c5 = arith.constant 5 : index
    %c0_21 = arith.constant 0 : index
    %20 = vector.load %arg9[%c5, %c0_21] : memref<36x32xf32, #tpu.memory_space<vmem>>, vector<31x32xf32>
    %21 = vector.extract_strided_slice %19 {offsets = [0, 0], sizes = [31, 32], strides = [1, 1]} : vector<36x32xf32> to vector<31x32xf32>
    %22 = arith.addf %20, %21 : vector<31x32xf32>
    %c5_22 = arith.constant 5 : index
    %c0_23 = arith.constant 0 : index
    %23 = vector.load %arg9[%c5_22, %c0_23] : memref<36x32xf32, #tpu.memory_space<vmem>>, vector<31x32xf32>
    tpu.vector_store %arg9[%c5_22, %c0_23], %22 {strides = array<i32>} : memref<36x32xf32, #tpu.memory_space<vmem>>, vector<31x32xf32>,
    %c96 = arith.constant 96 : index
    %c0_24 = arith.constant 0 : index
    %24 = vector.load %arg3[%c96, %c0_24] : memref<288x32xbf16, #tpu.memory_space<vmem>>, vector<32x32xbf16>
    %cst_25 = arith.constant dense<0.000000e+00> : vector<36x32xf32>
    %25 = tpu.matmul %5, %24, %cst_25 {dimension_numbers = #tpu.dot_dimension_numbers<[1], [0], [0], [1], [0, 0, 1, 1], [], []>} : vector<36x32xbf16>, vector<32x32xbf16>, vector<36x32xf32> -> vector<36x32xf32>
    %c1 = arith.constant 1 : index
    %c0_26 = arith.constant 0 : index
    %26 = vector.load %arg9[%c1, %c0_26] : memref<36x32xf32, #tpu.memory_space<vmem>>, vector<35x32xf32>
    %27 = vector.extract_strided_slice %25 {offsets = [0, 0], sizes = [35, 32], strides = [1, 1]} : vector<36x32xf32> to vector<35x32xf32>
    %28 = arith.addf %26, %27 : vector<35x32xf32>
    %c1_27 = arith.constant 1 : index
    %c0_28 = arith.constant 0 : index
    %29 = vector.load %arg9[%c1_27, %c0_28] : memref<36x32xf32, #tpu.memory_space<vmem>>, vector<35x32xf32>
    tpu.vector_store %arg9[%c1_27, %c0_28], %28 {strides = array<i32>} : memref<36x32xf32, #tpu.memory_space<vmem>>, vector<35x32xf32>,
    %c128 = arith.constant 128 : index
    %c0_29 = arith.constant 0 : index
    %30 = vector.load %arg3[%c128, %c0_29] : memref<288x32xbf16, #tpu.memory_space<vmem>>, vector<32x32xbf16>
    %cst_30 = arith.constant dense<0.000000e+00> : vector<36x32xf32>
    %31 = tpu.matmul %5, %30, %cst_30 {dimension_numbers = #tpu.dot_dimension_numbers<[1], [0], [0], [1], [0, 0, 1, 1], [], []>} : vector<36x32xbf16>, vector<32x32xbf16>, vector<36x32xf32> -> vector<36x32xf32>
    %c0_31 = arith.constant 0 : index
    %c0_32 = arith.constant 0 : index
    %32 = vector.load %arg9[%c0_31, %c0_32] : memref<36x32xf32, #tpu.memory_space<vmem>>, vector<36x32xf32>
    %33 = arith.addf %32, %31 : vector<36x32xf32>
    %c0_33 = arith.constant 0 : index
    %c0_34 = arith.constant 0 : index
    %34 = vector.load %arg9[%c0_33, %c0_34] : memref<36x32xf32, #tpu.memory_space<vmem>>, vector<36x32xf32>
    tpu.vector_store %arg9[%c0_33, %c0_34], %33 {strides = array<i32>} : memref<36x32xf32, #tpu.memory_space<vmem>>, vector<36x32xf32>,
    %c160 = arith.constant 160 : index
    %c0_35 = arith.constant 0 : index
    %35 = vector.load %arg3[%c160, %c0_35] : memref<288x32xbf16, #tpu.memory_space<vmem>>, vector<32x32xbf16>
    %cst_36 = arith.constant dense<0.000000e+00> : vector<36x32xf32>
    %36 = tpu.matmul %5, %35, %cst_36 {dimension_numbers = #tpu.dot_dimension_numbers<[1], [0], [0], [1], [0, 0, 1, 1], [], []>} : vector<36x32xbf16>, vector<32x32xbf16>, vector<36x32xf32> -> vector<36x32xf32>
    %c0_37 = arith.constant 0 : index
    %c0_38 = arith.constant 0 : index
    %37 = vector.load %arg9[%c0_37, %c0_38] : memref<36x32xf32, #tpu.memory_space<vmem>>, vector<35x32xf32>
    %38 = vector.extract_strided_slice %36 {offsets = [1, 0], sizes = [35, 32], strides = [1, 1]} : vector<36x32xf32> to vector<35x32xf32>
    %39 = arith.addf %37, %38 : vector<35x32xf32>
    %c0_39 = arith.constant 0 : index
    %c0_40 = arith.constant 0 : index
    %40 = vector.load %arg9[%c0_39, %c0_40] : memref<36x32xf32, #tpu.memory_space<vmem>>, vector<35x32xf32>
    tpu.vector_store %arg9[%c0_39, %c0_40], %39 {strides = array<i32>} : memref<36x32xf32, #tpu.memory_space<vmem>>, vector<35x32xf32>,
    %c192 = arith.constant 192 : index
    %c0_41 = arith.constant 0 : index
    %41 = vector.load %arg3[%c192, %c0_41] : memref<288x32xbf16, #tpu.memory_space<vmem>>, vector<32x32xbf16>
    %cst_42 = arith.constant dense<0.000000e+00> : vector<36x32xf32>
    %42 = tpu.matmul %5, %41, %cst_42 {dimension_numbers = #tpu.dot_dimension_numbers<[1], [0], [0], [1], [0, 0, 1, 1], [], []>} : vector<36x32xbf16>, vector<32x32xbf16>, vector<36x32xf32> -> vector<36x32xf32>
    %c0_43 = arith.constant 0 : index
    %c0_44 = arith.constant 0 : index
    %43 = vector.load %arg9[%c0_43, %c0_44] : memref<36x32xf32, #tpu.memory_space<vmem>>, vector<31x32xf32>
    %44 = vector.extract_strided_slice %42 {offsets = [5, 0], sizes = [31, 32], strides = [1, 1]} : vector<36x32xf32> to vector<31x32xf32>
    %45 = arith.addf %43, %44 : vector<31x32xf32>
    %c0_45 = arith.constant 0 : index
    %c0_46 = arith.constant 0 : index
    %46 = vector.load %arg9[%c0_45, %c0_46] : memref<36x32xf32, #tpu.memory_space<vmem>>, vector<31x32xf32>
    tpu.vector_store %arg9[%c0_45, %c0_46], %45 {strides = array<i32>} : memref<36x32xf32, #tpu.memory_space<vmem>>, vector<31x32xf32>,
    %c224 = arith.constant 224 : index
    %c0_47 = arith.constant 0 : index
    %47 = vector.load %arg3[%c224, %c0_47] : memref<288x32xbf16, #tpu.memory_space<vmem>>, vector<32x32xbf16>
    %cst_48 = arith.constant dense<0.000000e+00> : vector<36x32xf32>
    %48 = tpu.matmul %5, %47, %cst_48 {dimension_numbers = #tpu.dot_dimension_numbers<[1], [0], [0], [1], [0, 0, 1, 1], [], []>} : vector<36x32xbf16>, vector<32x32xbf16>, vector<36x32xf32> -> vector<36x32xf32>
    %c0_49 = arith.constant 0 : index
    %c0_50 = arith.constant 0 : index
    %49 = vector.load %arg9[%c0_49, %c0_50] : memref<36x32xf32, #tpu.memory_space<vmem>>, vector<30x32xf32>
    %50 = vector.extract_strided_slice %48 {offsets = [6, 0], sizes = [30, 32], strides = [1, 1]} : vector<36x32xf32> to vector<30x32xf32>
    %51 = arith.addf %49, %50 : vector<30x32xf32>
    %c0_51 = arith.constant 0 : index
    %c0_52 = arith.constant 0 : index
    %52 = vector.load %arg9[%c0_51, %c0_52] : memref<36x32xf32, #tpu.memory_space<vmem>>, vector<30x32xf32>
    tpu.vector_store %arg9[%c0_51, %c0_52], %51 {strides = array<i32>} : memref<36x32xf32, #tpu.memory_space<vmem>>, vector<30x32xf32>,
    %c256 = arith.constant 256 : index
    %c0_53 = arith.constant 0 : index
    %53 = vector.load %arg3[%c256, %c0_53] : memref<288x32xbf16, #tpu.memory_space<vmem>>, vector<32x32xbf16>
    %cst_54 = arith.constant dense<0.000000e+00> : vector<36x32xf32>
    %54 = tpu.matmul %5, %53, %cst_54 {dimension_numbers = #tpu.dot_dimension_numbers<[1], [0], [0], [1], [0, 0, 1, 1], [], []>} : vector<36x32xbf16>, vector<32x32xbf16>, vector<36x32xf32> -> vector<36x32xf32>
    %c0_55 = arith.constant 0 : index
    %c0_56 = arith.constant 0 : index
    %55 = vector.load %arg9[%c0_55, %c0_56] : memref<36x32xf32, #tpu.memory_space<vmem>>, vector<29x32xf32>
    %56 = vector.extract_strided_slice %54 {offsets = [7, 0], sizes = [29, 32], strides = [1, 1]} : vector<36x32xf32> to vector<29x32xf32>
    %57 = arith.addf %55, %56 : vector<29x32xf32>
    %c0_57 = arith.constant 0 : index
    %c0_58 = arith.constant 0 : index
    %58 = vector.load %arg9[%c0_57, %c0_58] : memref<36x32xf32, #tpu.memory_space<vmem>>, vector<29x32xf32>
    tpu.vector_store %arg9[%c0_57, %c0_58], %57 {strides = array<i32>} : memref<36x32xf32, #tpu.memory_space<vmem>>, vector<29x32xf32>,
    %c0_59 = arith.constant 0 : index
    %c0_60 = arith.constant 0 : index
    %59 = vector.load %arg9[%c0_59, %c0_60] : memref<36x32xf32, #tpu.memory_space<vmem>>, vector<36x32xf32>
    %c0_61 = arith.constant 0 : index
    %c0_62 = arith.constant 0 : index
    %60 = vector.load %arg4[%c0_61, %c0_62] : memref<1x32xf32, #tpu.memory_space<vmem>>, vector<1x32xf32>
    %61 = vector.broadcast %60 : vector<1x32xf32> to vector<36x32xf32>
    %62 = arith.addf %59, %61 : vector<36x32xf32>
    %cst_63 = arith.constant 0.000000e+00 : f32
    %63 = vector.broadcast %cst_63 : f32 to vector<36x32xf32>
    %64 = arith.maximumf %62, %63 : vector<36x32xf32>
    %c0_64 = arith.constant 0 : index
    %c0_65 = arith.constant 0 : index
    %65 = vector.load %arg2[%c0_64, %c0_65] : memref<36x1xf32, #tpu.memory_space<vmem>>, vector<36x1xf32>
    %66 = vector.broadcast %65 : vector<36x1xf32> to vector<36x32xf32>
    %67 = arith.mulf %64, %66 : vector<36x32xf32>
    %68 = arith.truncf %67 : vector<36x32xf32> to vector<36x32xbf16>
    %c0_66 = arith.constant 0 : index
    %c0_67 = arith.constant 0 : index
    %69 = vector.load %arg8[%c0_66, %c0_67] : memref<36x32xbf16, #tpu.memory_space<vmem>>, vector<36x32xbf16>
    tpu.vector_store %arg8[%c0_66, %c0_67], %68 {strides = array<i32>} : memref<36x32xbf16, #tpu.memory_space<vmem>>, vector<36x32xbf16>,
    %cst_68 = arith.constant 0.000000e+00 : f32
    %70 = vector.broadcast %cst_68 : f32 to vector<36x16xf32>
    %c0_69 = arith.constant 0 : index
    %c0_70 = arith.constant 0 : index
    %71 = vector.load %arg10[%c0_69, %c0_70] : memref<36x16xf32, #tpu.memory_space<vmem>>, vector<36x16xf32>
    tpu.vector_store %arg10[%c0_69, %c0_70], %70 {strides = array<i32>} : memref<36x16xf32, #tpu.memory_space<vmem>>, vector<36x16xf32>,
    %c0_71 = arith.constant 0 : index
    %c0_72 = arith.constant 0 : index
    %72 = vector.load %arg8[%c0_71, %c0_72] : memref<36x32xbf16, #tpu.memory_space<vmem>>, vector<36x32xbf16>
    %c0_73 = arith.constant 0 : index
    %c0_74 = arith.constant 0 : index
    %73 = vector.load %arg5[%c0_73, %c0_74] : memref<288x16xbf16, #tpu.memory_space<vmem>>, vector<32x16xbf16>
    %cst_75 = arith.constant dense<0.000000e+00> : vector<36x16xf32>
    %74 = tpu.matmul %72, %73, %cst_75 {dimension_numbers = #tpu.dot_dimension_numbers<[1], [0], [0], [1], [0, 0, 1, 1], [], []>} : vector<36x32xbf16>, vector<32x16xbf16>, vector<36x16xf32> -> vector<36x16xf32>
    %c7_76 = arith.constant 7 : index
    %c0_77 = arith.constant 0 : index
    %75 = vector.load %arg10[%c7_76, %c0_77] : memref<36x16xf32, #tpu.memory_space<vmem>>, vector<29x16xf32>
    %76 = vector.extract_strided_slice %74 {offsets = [0, 0], sizes = [29, 16], strides = [1, 1]} : vector<36x16xf32> to vector<29x16xf32>
    %77 = arith.addf %75, %76 : vector<29x16xf32>
    %c7_78 = arith.constant 7 : index
    %c0_79 = arith.constant 0 : index
    %78 = vector.load %arg10[%c7_78, %c0_79] : memref<36x16xf32, #tpu.memory_space<vmem>>, vector<29x16xf32>
    tpu.vector_store %arg10[%c7_78, %c0_79], %77 {strides = array<i32>} : memref<36x16xf32, #tpu.memory_space<vmem>>, vector<29x16xf32>,
    %c32_80 = arith.constant 32 : index
    %c0_81 = arith.constant 0 : index
    %79 = vector.load %arg5[%c32_80, %c0_81] : memref<288x16xbf16, #tpu.memory_space<vmem>>, vector<32x16xbf16>
    %cst_82 = arith.constant dense<0.000000e+00> : vector<36x16xf32>
    %80 = tpu.matmul %72, %79, %cst_82 {dimension_numbers = #tpu.dot_dimension_numbers<[1], [0], [0], [1], [0, 0, 1, 1], [], []>} : vector<36x32xbf16>, vector<32x16xbf16>, vector<36x16xf32> -> vector<36x16xf32>
    %c6_83 = arith.constant 6 : index
    %c0_84 = arith.constant 0 : index
    %81 = vector.load %arg10[%c6_83, %c0_84] : memref<36x16xf32, #tpu.memory_space<vmem>>, vector<30x16xf32>
    %82 = vector.extract_strided_slice %80 {offsets = [0, 0], sizes = [30, 16], strides = [1, 1]} : vector<36x16xf32> to vector<30x16xf32>
    %83 = arith.addf %81, %82 : vector<30x16xf32>
    %c6_85 = arith.constant 6 : index
    %c0_86 = arith.constant 0 : index
    %84 = vector.load %arg10[%c6_85, %c0_86] : memref<36x16xf32, #tpu.memory_space<vmem>>, vector<30x16xf32>
    tpu.vector_store %arg10[%c6_85, %c0_86], %83 {strides = array<i32>} : memref<36x16xf32, #tpu.memory_space<vmem>>, vector<30x16xf32>,
    %c64_87 = arith.constant 64 : index
    %c0_88 = arith.constant 0 : index
    %85 = vector.load %arg5[%c64_87, %c0_88] : memref<288x16xbf16, #tpu.memory_space<vmem>>, vector<32x16xbf16>
    %cst_89 = arith.constant dense<0.000000e+00> : vector<36x16xf32>
    %86 = tpu.matmul %72, %85, %cst_89 {dimension_numbers = #tpu.dot_dimension_numbers<[1], [0], [0], [1], [0, 0, 1, 1], [], []>} : vector<36x32xbf16>, vector<32x16xbf16>, vector<36x16xf32> -> vector<36x16xf32>
    %c5_90 = arith.constant 5 : index
    %c0_91 = arith.constant 0 : index
    %87 = vector.load %arg10[%c5_90, %c0_91] : memref<36x16xf32, #tpu.memory_space<vmem>>, vector<31x16xf32>
    %88 = vector.extract_strided_slice %86 {offsets = [0, 0], sizes = [31, 16], strides = [1, 1]} : vector<36x16xf32> to vector<31x16xf32>
    %89 = arith.addf %87, %88 : vector<31x16xf32>
    %c5_92 = arith.constant 5 : index
    %c0_93 = arith.constant 0 : index
    %90 = vector.load %arg10[%c5_92, %c0_93] : memref<36x16xf32, #tpu.memory_space<vmem>>, vector<31x16xf32>
    tpu.vector_store %arg10[%c5_92, %c0_93], %89 {strides = array<i32>} : memref<36x16xf32, #tpu.memory_space<vmem>>, vector<31x16xf32>,
    %c96_94 = arith.constant 96 : index
    %c0_95 = arith.constant 0 : index
    %91 = vector.load %arg5[%c96_94, %c0_95] : memref<288x16xbf16, #tpu.memory_space<vmem>>, vector<32x16xbf16>
    %cst_96 = arith.constant dense<0.000000e+00> : vector<36x16xf32>
    %92 = tpu.matmul %72, %91, %cst_96 {dimension_numbers = #tpu.dot_dimension_numbers<[1], [0], [0], [1], [0, 0, 1, 1], [], []>} : vector<36x32xbf16>, vector<32x16xbf16>, vector<36x16xf32> -> vector<36x16xf32>
    %c1_97 = arith.constant 1 : index
    %c0_98 = arith.constant 0 : index
    %93 = vector.load %arg10[%c1_97, %c0_98] : memref<36x16xf32, #tpu.memory_space<vmem>>, vector<35x16xf32>
    %94 = vector.extract_strided_slice %92 {offsets = [0, 0], sizes = [35, 16], strides = [1, 1]} : vector<36x16xf32> to vector<35x16xf32>
    %95 = arith.addf %93, %94 : vector<35x16xf32>
    %c1_99 = arith.constant 1 : index
    %c0_100 = arith.constant 0 : index
    %96 = vector.load %arg10[%c1_99, %c0_100] : memref<36x16xf32, #tpu.memory_space<vmem>>, vector<35x16xf32>
    tpu.vector_store %arg10[%c1_99, %c0_100], %95 {strides = array<i32>} : memref<36x16xf32, #tpu.memory_space<vmem>>, vector<35x16xf32>,
    %c128_101 = arith.constant 128 : index
    %c0_102 = arith.constant 0 : index
    %97 = vector.load %arg5[%c128_101, %c0_102] : memref<288x16xbf16, #tpu.memory_space<vmem>>, vector<32x16xbf16>
    %cst_103 = arith.constant dense<0.000000e+00> : vector<36x16xf32>
    %98 = tpu.matmul %72, %97, %cst_103 {dimension_numbers = #tpu.dot_dimension_numbers<[1], [0], [0], [1], [0, 0, 1, 1], [], []>} : vector<36x32xbf16>, vector<32x16xbf16>, vector<36x16xf32> -> vector<36x16xf32>
    %c0_104 = arith.constant 0 : index
    %c0_105 = arith.constant 0 : index
    %99 = vector.load %arg10[%c0_104, %c0_105] : memref<36x16xf32, #tpu.memory_space<vmem>>, vector<36x16xf32>
    %100 = arith.addf %99, %98 : vector<36x16xf32>
    %c0_106 = arith.constant 0 : index
    %c0_107 = arith.constant 0 : index
    %101 = vector.load %arg10[%c0_106, %c0_107] : memref<36x16xf32, #tpu.memory_space<vmem>>, vector<36x16xf32>
    tpu.vector_store %arg10[%c0_106, %c0_107], %100 {strides = array<i32>} : memref<36x16xf32, #tpu.memory_space<vmem>>, vector<36x16xf32>,
    %c160_108 = arith.constant 160 : index
    %c0_109 = arith.constant 0 : index
    %102 = vector.load %arg5[%c160_108, %c0_109] : memref<288x16xbf16, #tpu.memory_space<vmem>>, vector<32x16xbf16>
    %cst_110 = arith.constant dense<0.000000e+00> : vector<36x16xf32>
    %103 = tpu.matmul %72, %102, %cst_110 {dimension_numbers = #tpu.dot_dimension_numbers<[1], [0], [0], [1], [0, 0, 1, 1], [], []>} : vector<36x32xbf16>, vector<32x16xbf16>, vector<36x16xf32> -> vector<36x16xf32>
    %c0_111 = arith.constant 0 : index
    %c0_112 = arith.constant 0 : index
    %104 = vector.load %arg10[%c0_111, %c0_112] : memref<36x16xf32, #tpu.memory_space<vmem>>, vector<35x16xf32>
    %105 = vector.extract_strided_slice %103 {offsets = [1, 0], sizes = [35, 16], strides = [1, 1]} : vector<36x16xf32> to vector<35x16xf32>
    %106 = arith.addf %104, %105 : vector<35x16xf32>
    %c0_113 = arith.constant 0 : index
    %c0_114 = arith.constant 0 : index
    %107 = vector.load %arg10[%c0_113, %c0_114] : memref<36x16xf32, #tpu.memory_space<vmem>>, vector<35x16xf32>
    tpu.vector_store %arg10[%c0_113, %c0_114], %106 {strides = array<i32>} : memref<36x16xf32, #tpu.memory_space<vmem>>, vector<35x16xf32>,
    %c192_115 = arith.constant 192 : index
    %c0_116 = arith.constant 0 : index
    %108 = vector.load %arg5[%c192_115, %c0_116] : memref<288x16xbf16, #tpu.memory_space<vmem>>, vector<32x16xbf16>
    %cst_117 = arith.constant dense<0.000000e+00> : vector<36x16xf32>
    %109 = tpu.matmul %72, %108, %cst_117 {dimension_numbers = #tpu.dot_dimension_numbers<[1], [0], [0], [1], [0, 0, 1, 1], [], []>} : vector<36x32xbf16>, vector<32x16xbf16>, vector<36x16xf32> -> vector<36x16xf32>
    %c0_118 = arith.constant 0 : index
    %c0_119 = arith.constant 0 : index
    %110 = vector.load %arg10[%c0_118, %c0_119] : memref<36x16xf32, #tpu.memory_space<vmem>>, vector<31x16xf32>
    %111 = vector.extract_strided_slice %109 {offsets = [5, 0], sizes = [31, 16], strides = [1, 1]} : vector<36x16xf32> to vector<31x16xf32>
    %112 = arith.addf %110, %111 : vector<31x16xf32>
    %c0_120 = arith.constant 0 : index
    %c0_121 = arith.constant 0 : index
    %113 = vector.load %arg10[%c0_120, %c0_121] : memref<36x16xf32, #tpu.memory_space<vmem>>, vector<31x16xf32>
    tpu.vector_store %arg10[%c0_120, %c0_121], %112 {strides = array<i32>} : memref<36x16xf32, #tpu.memory_space<vmem>>, vector<31x16xf32>,
    %c224_122 = arith.constant 224 : index
    %c0_123 = arith.constant 0 : index
    %114 = vector.load %arg5[%c224_122, %c0_123] : memref<288x16xbf16, #tpu.memory_space<vmem>>, vector<32x16xbf16>
    %cst_124 = arith.constant dense<0.000000e+00> : vector<36x16xf32>
    %115 = tpu.matmul %72, %114, %cst_124 {dimension_numbers = #tpu.dot_dimension_numbers<[1], [0], [0], [1], [0, 0, 1, 1], [], []>} : vector<36x32xbf16>, vector<32x16xbf16>, vector<36x16xf32> -> vector<36x16xf32>
    %c0_125 = arith.constant 0 : index
    %c0_126 = arith.constant 0 : index
    %116 = vector.load %arg10[%c0_125, %c0_126] : memref<36x16xf32, #tpu.memory_space<vmem>>, vector<30x16xf32>
    %117 = vector.extract_strided_slice %115 {offsets = [6, 0], sizes = [30, 16], strides = [1, 1]} : vector<36x16xf32> to vector<30x16xf32>
    %118 = arith.addf %116, %117 : vector<30x16xf32>
    %c0_127 = arith.constant 0 : index
    %c0_128 = arith.constant 0 : index
    %119 = vector.load %arg10[%c0_127, %c0_128] : memref<36x16xf32, #tpu.memory_space<vmem>>, vector<30x16xf32>
    tpu.vector_store %arg10[%c0_127, %c0_128], %118 {strides = array<i32>} : memref<36x16xf32, #tpu.memory_space<vmem>>, vector<30x16xf32>,
    %c256_129 = arith.constant 256 : index
    %c0_130 = arith.constant 0 : index
    %120 = vector.load %arg5[%c256_129, %c0_130] : memref<288x16xbf16, #tpu.memory_space<vmem>>, vector<32x16xbf16>
    %cst_131 = arith.constant dense<0.000000e+00> : vector<36x16xf32>
    %121 = tpu.matmul %72, %120, %cst_131 {dimension_numbers = #tpu.dot_dimension_numbers<[1], [0], [0], [1], [0, 0, 1, 1], [], []>} : vector<36x32xbf16>, vector<32x16xbf16>, vector<36x16xf32> -> vector<36x16xf32>
    %c0_132 = arith.constant 0 : index
    %c0_133 = arith.constant 0 : index
    %122 = vector.load %arg10[%c0_132, %c0_133] : memref<36x16xf32, #tpu.memory_space<vmem>>, vector<29x16xf32>
    %123 = vector.extract_strided_slice %121 {offsets = [7, 0], sizes = [29, 16], strides = [1, 1]} : vector<36x16xf32> to vector<29x16xf32>
    %124 = arith.addf %122, %123 : vector<29x16xf32>
    %c0_134 = arith.constant 0 : index
    %c0_135 = arith.constant 0 : index
    %125 = vector.load %arg10[%c0_134, %c0_135] : memref<36x16xf32, #tpu.memory_space<vmem>>, vector<29x16xf32>
    tpu.vector_store %arg10[%c0_134, %c0_135], %124 {strides = array<i32>} : memref<36x16xf32, #tpu.memory_space<vmem>>, vector<29x16xf32>,
    %c0_136 = arith.constant 0 : index
    %c0_137 = arith.constant 0 : index
    %126 = vector.load %arg10[%c0_136, %c0_137] : memref<36x16xf32, #tpu.memory_space<vmem>>, vector<36x16xf32>
    %cst_138 = arith.constant 0.000000e+00 : f32
    %127 = vector.broadcast %cst_138 : f32 to vector<36x16xf32>
    %128 = arith.maximumf %126, %127 : vector<36x16xf32>
    %129 = arith.truncf %128 : vector<36x16xf32> to vector<36x16xbf16>
    %c0_139 = arith.constant 0 : index
    %c0_140 = arith.constant 0 : index
    %130 = vector.load %arg6[%c0_139, %c0_140] : memref<16x32xbf16, #tpu.memory_space<vmem>>, vector<16x32xbf16>
    %cst_141 = arith.constant dense<0.000000e+00> : vector<36x32xf32>
    %131 = tpu.matmul %129, %130, %cst_141 {dimension_numbers = #tpu.dot_dimension_numbers<[1], [0], [0], [1], [0, 0, 1, 1], [], []>} : vector<36x16xbf16>, vector<16x32xbf16>, vector<36x32xf32> -> vector<36x32xf32>
    %132 = arith.addf %62, %131 : vector<36x32xf32>
    %cst_142 = arith.constant 0.000000e+00 : f32
    %133 = vector.broadcast %cst_142 : f32 to vector<36x32xf32>
    %134 = arith.maximumf %132, %133 : vector<36x32xf32>
    %c0_143 = arith.constant 0 : index
    %c0_144 = arith.constant 0 : index
    %135 = vector.load %arg2[%c0_143, %c0_144] : memref<36x1xf32, #tpu.memory_space<vmem>>, vector<36x1xf32>
    %136 = vector.broadcast %135 : vector<36x1xf32> to vector<36x32xf32>
    %137 = arith.mulf %134, %136 : vector<36x32xf32>
    %138 = arith.truncf %137 : vector<36x32xf32> to vector<36x32xbf16>
    %c0_145 = arith.constant 0 : index
    %c0_146 = arith.constant 0 : index
    %139 = vector.load %arg8[%c0_145, %c0_146] : memref<36x32xbf16, #tpu.memory_space<vmem>>, vector<36x32xbf16>
    tpu.vector_store %arg8[%c0_145, %c0_146], %138 {strides = array<i32>} : memref<36x32xbf16, #tpu.memory_space<vmem>>, vector<36x32xbf16>,
    %cst_147 = arith.constant 0.000000e+00 : f32
    %140 = vector.broadcast %cst_147 : f32 to vector<36x16xf32>
    %c0_148 = arith.constant 0 : index
    %c0_149 = arith.constant 0 : index
    %141 = vector.load %arg10[%c0_148, %c0_149] : memref<36x16xf32, #tpu.memory_space<vmem>>, vector<36x16xf32>
    tpu.vector_store %arg10[%c0_148, %c0_149], %140 {strides = array<i32>} : memref<36x16xf32, #tpu.memory_space<vmem>>, vector<36x16xf32>,
    %c0_150 = arith.constant 0 : index
    %c0_151 = arith.constant 0 : index
    %142 = vector.load %arg8[%c0_150, %c0_151] : memref<36x32xbf16, #tpu.memory_space<vmem>>, vector<36x32xbf16>
    %c0_152 = arith.constant 0 : index
    %c0_153 = arith.constant 0 : index
    %143 = vector.load %arg5[%c0_152, %c0_153] : memref<288x16xbf16, #tpu.memory_space<vmem>>, vector<32x16xbf16>
    %cst_154 = arith.constant dense<0.000000e+00> : vector<36x16xf32>
    %144 = tpu.matmul %142, %143, %cst_154 {dimension_numbers = #tpu.dot_dimension_numbers<[1], [0], [0], [1], [0, 0, 1, 1], [], []>} : vector<36x32xbf16>, vector<32x16xbf16>, vector<36x16xf32> -> vector<36x16xf32>
    %c7_155 = arith.constant 7 : index
    %c0_156 = arith.constant 0 : index
    %145 = vector.load %arg10[%c7_155, %c0_156] : memref<36x16xf32, #tpu.memory_space<vmem>>, vector<29x16xf32>
    %146 = vector.extract_strided_slice %144 {offsets = [0, 0], sizes = [29, 16], strides = [1, 1]} : vector<36x16xf32> to vector<29x16xf32>
    %147 = arith.addf %145, %146 : vector<29x16xf32>
    %c7_157 = arith.constant 7 : index
    %c0_158 = arith.constant 0 : index
    %148 = vector.load %arg10[%c7_157, %c0_158] : memref<36x16xf32, #tpu.memory_space<vmem>>, vector<29x16xf32>
    tpu.vector_store %arg10[%c7_157, %c0_158], %147 {strides = array<i32>} : memref<36x16xf32, #tpu.memory_space<vmem>>, vector<29x16xf32>,
    %c32_159 = arith.constant 32 : index
    %c0_160 = arith.constant 0 : index
    %149 = vector.load %arg5[%c32_159, %c0_160] : memref<288x16xbf16, #tpu.memory_space<vmem>>, vector<32x16xbf16>
    %cst_161 = arith.constant dense<0.000000e+00> : vector<36x16xf32>
    %150 = tpu.matmul %142, %149, %cst_161 {dimension_numbers = #tpu.dot_dimension_numbers<[1], [0], [0], [1], [0, 0, 1, 1], [], []>} : vector<36x32xbf16>, vector<32x16xbf16>, vector<36x16xf32> -> vector<36x16xf32>
    %c6_162 = arith.constant 6 : index
    %c0_163 = arith.constant 0 : index
    %151 = vector.load %arg10[%c6_162, %c0_163] : memref<36x16xf32, #tpu.memory_space<vmem>>, vector<30x16xf32>
    %152 = vector.extract_strided_slice %150 {offsets = [0, 0], sizes = [30, 16], strides = [1, 1]} : vector<36x16xf32> to vector<30x16xf32>
    %153 = arith.addf %151, %152 : vector<30x16xf32>
    %c6_164 = arith.constant 6 : index
    %c0_165 = arith.constant 0 : index
    %154 = vector.load %arg10[%c6_164, %c0_165] : memref<36x16xf32, #tpu.memory_space<vmem>>, vector<30x16xf32>
    tpu.vector_store %arg10[%c6_164, %c0_165], %153 {strides = array<i32>} : memref<36x16xf32, #tpu.memory_space<vmem>>, vector<30x16xf32>,
    %c64_166 = arith.constant 64 : index
    %c0_167 = arith.constant 0 : index
    %155 = vector.load %arg5[%c64_166, %c0_167] : memref<288x16xbf16, #tpu.memory_space<vmem>>, vector<32x16xbf16>
    %cst_168 = arith.constant dense<0.000000e+00> : vector<36x16xf32>
    %156 = tpu.matmul %142, %155, %cst_168 {dimension_numbers = #tpu.dot_dimension_numbers<[1], [0], [0], [1], [0, 0, 1, 1], [], []>} : vector<36x32xbf16>, vector<32x16xbf16>, vector<36x16xf32> -> vector<36x16xf32>
    %c5_169 = arith.constant 5 : index
    %c0_170 = arith.constant 0 : index
    %157 = vector.load %arg10[%c5_169, %c0_170] : memref<36x16xf32, #tpu.memory_space<vmem>>, vector<31x16xf32>
    %158 = vector.extract_strided_slice %156 {offsets = [0, 0], sizes = [31, 16], strides = [1, 1]} : vector<36x16xf32> to vector<31x16xf32>
    %159 = arith.addf %157, %158 : vector<31x16xf32>
    %c5_171 = arith.constant 5 : index
    %c0_172 = arith.constant 0 : index
    %160 = vector.load %arg10[%c5_171, %c0_172] : memref<36x16xf32, #tpu.memory_space<vmem>>, vector<31x16xf32>
    tpu.vector_store %arg10[%c5_171, %c0_172], %159 {strides = array<i32>} : memref<36x16xf32, #tpu.memory_space<vmem>>, vector<31x16xf32>,
    %c96_173 = arith.constant 96 : index
    %c0_174 = arith.constant 0 : index
    %161 = vector.load %arg5[%c96_173, %c0_174] : memref<288x16xbf16, #tpu.memory_space<vmem>>, vector<32x16xbf16>
    %cst_175 = arith.constant dense<0.000000e+00> : vector<36x16xf32>
    %162 = tpu.matmul %142, %161, %cst_175 {dimension_numbers = #tpu.dot_dimension_numbers<[1], [0], [0], [1], [0, 0, 1, 1], [], []>} : vector<36x32xbf16>, vector<32x16xbf16>, vector<36x16xf32> -> vector<36x16xf32>
    %c1_176 = arith.constant 1 : index
    %c0_177 = arith.constant 0 : index
    %163 = vector.load %arg10[%c1_176, %c0_177] : memref<36x16xf32, #tpu.memory_space<vmem>>, vector<35x16xf32>
    %164 = vector.extract_strided_slice %162 {offsets = [0, 0], sizes = [35, 16], strides = [1, 1]} : vector<36x16xf32> to vector<35x16xf32>
    %165 = arith.addf %163, %164 : vector<35x16xf32>
    %c1_178 = arith.constant 1 : index
    %c0_179 = arith.constant 0 : index
    %166 = vector.load %arg10[%c1_178, %c0_179] : memref<36x16xf32, #tpu.memory_space<vmem>>, vector<35x16xf32>
    tpu.vector_store %arg10[%c1_178, %c0_179], %165 {strides = array<i32>} : memref<36x16xf32, #tpu.memory_space<vmem>>, vector<35x16xf32>,
    %c128_180 = arith.constant 128 : index
    %c0_181 = arith.constant 0 : index
    %167 = vector.load %arg5[%c128_180, %c0_181] : memref<288x16xbf16, #tpu.memory_space<vmem>>, vector<32x16xbf16>
    %cst_182 = arith.constant dense<0.000000e+00> : vector<36x16xf32>
    %168 = tpu.matmul %142, %167, %cst_182 {dimension_numbers = #tpu.dot_dimension_numbers<[1], [0], [0], [1], [0, 0, 1, 1], [], []>} : vector<36x32xbf16>, vector<32x16xbf16>, vector<36x16xf32> -> vector<36x16xf32>
    %c0_183 = arith.constant 0 : index
    %c0_184 = arith.constant 0 : index
    %169 = vector.load %arg10[%c0_183, %c0_184] : memref<36x16xf32, #tpu.memory_space<vmem>>, vector<36x16xf32>
    %170 = arith.addf %169, %168 : vector<36x16xf32>
    %c0_185 = arith.constant 0 : index
    %c0_186 = arith.constant 0 : index
    %171 = vector.load %arg10[%c0_185, %c0_186] : memref<36x16xf32, #tpu.memory_space<vmem>>, vector<36x16xf32>
    tpu.vector_store %arg10[%c0_185, %c0_186], %170 {strides = array<i32>} : memref<36x16xf32, #tpu.memory_space<vmem>>, vector<36x16xf32>,
    %c160_187 = arith.constant 160 : index
    %c0_188 = arith.constant 0 : index
    %172 = vector.load %arg5[%c160_187, %c0_188] : memref<288x16xbf16, #tpu.memory_space<vmem>>, vector<32x16xbf16>
    %cst_189 = arith.constant dense<0.000000e+00> : vector<36x16xf32>
    %173 = tpu.matmul %142, %172, %cst_189 {dimension_numbers = #tpu.dot_dimension_numbers<[1], [0], [0], [1], [0, 0, 1, 1], [], []>} : vector<36x32xbf16>, vector<32x16xbf16>, vector<36x16xf32> -> vector<36x16xf32>
    %c0_190 = arith.constant 0 : index
    %c0_191 = arith.constant 0 : index
    %174 = vector.load %arg10[%c0_190, %c0_191] : memref<36x16xf32, #tpu.memory_space<vmem>>, vector<35x16xf32>
    %175 = vector.extract_strided_slice %173 {offsets = [1, 0], sizes = [35, 16], strides = [1, 1]} : vector<36x16xf32> to vector<35x16xf32>
    %176 = arith.addf %174, %175 : vector<35x16xf32>
    %c0_192 = arith.constant 0 : index
    %c0_193 = arith.constant 0 : index
    %177 = vector.load %arg10[%c0_192, %c0_193] : memref<36x16xf32, #tpu.memory_space<vmem>>, vector<35x16xf32>
    tpu.vector_store %arg10[%c0_192, %c0_193], %176 {strides = array<i32>} : memref<36x16xf32, #tpu.memory_space<vmem>>, vector<35x16xf32>,
    %c192_194 = arith.constant 192 : index
    %c0_195 = arith.constant 0 : index
    %178 = vector.load %arg5[%c192_194, %c0_195] : memref<288x16xbf16, #tpu.memory_space<vmem>>, vector<32x16xbf16>
    %cst_196 = arith.constant dense<0.000000e+00> : vector<36x16xf32>
    %179 = tpu.matmul %142, %178, %cst_196 {dimension_numbers = #tpu.dot_dimension_numbers<[1], [0], [0], [1], [0, 0, 1, 1], [], []>} : vector<36x32xbf16>, vector<32x16xbf16>, vector<36x16xf32> -> vector<36x16xf32>
    %c0_197 = arith.constant 0 : index
    %c0_198 = arith.constant 0 : index
    %180 = vector.load %arg10[%c0_197, %c0_198] : memref<36x16xf32, #tpu.memory_space<vmem>>, vector<31x16xf32>
    %181 = vector.extract_strided_slice %179 {offsets = [5, 0], sizes = [31, 16], strides = [1, 1]} : vector<36x16xf32> to vector<31x16xf32>
    %182 = arith.addf %180, %181 : vector<31x16xf32>
    %c0_199 = arith.constant 0 : index
    %c0_200 = arith.constant 0 : index
    %183 = vector.load %arg10[%c0_199, %c0_200] : memref<36x16xf32, #tpu.memory_space<vmem>>, vector<31x16xf32>
    tpu.vector_store %arg10[%c0_199, %c0_200], %182 {strides = array<i32>} : memref<36x16xf32, #tpu.memory_space<vmem>>, vector<31x16xf32>,
    %c224_201 = arith.constant 224 : index
    %c0_202 = arith.constant 0 : index
    %184 = vector.load %arg5[%c224_201, %c0_202] : memref<288x16xbf16, #tpu.memory_space<vmem>>, vector<32x16xbf16>
    %cst_203 = arith.constant dense<0.000000e+00> : vector<36x16xf32>
    %185 = tpu.matmul %142, %184, %cst_203 {dimension_numbers = #tpu.dot_dimension_numbers<[1], [0], [0], [1], [0, 0, 1, 1], [], []>} : vector<36x32xbf16>, vector<32x16xbf16>, vector<36x16xf32> -> vector<36x16xf32>
    %c0_204 = arith.constant 0 : index
    %c0_205 = arith.constant 0 : index
    %186 = vector.load %arg10[%c0_204, %c0_205] : memref<36x16xf32, #tpu.memory_space<vmem>>, vector<30x16xf32>
    %187 = vector.extract_strided_slice %185 {offsets = [6, 0], sizes = [30, 16], strides = [1, 1]} : vector<36x16xf32> to vector<30x16xf32>
    %188 = arith.addf %186, %187 : vector<30x16xf32>
    %c0_206 = arith.constant 0 : index
    %c0_207 = arith.constant 0 : index
    %189 = vector.load %arg10[%c0_206, %c0_207] : memref<36x16xf32, #tpu.memory_space<vmem>>, vector<30x16xf32>
    tpu.vector_store %arg10[%c0_206, %c0_207], %188 {strides = array<i32>} : memref<36x16xf32, #tpu.memory_space<vmem>>, vector<30x16xf32>,
    %c256_208 = arith.constant 256 : index
    %c0_209 = arith.constant 0 : index
    %190 = vector.load %arg5[%c256_208, %c0_209] : memref<288x16xbf16, #tpu.memory_space<vmem>>, vector<32x16xbf16>
    %cst_210 = arith.constant dense<0.000000e+00> : vector<36x16xf32>
    %191 = tpu.matmul %142, %190, %cst_210 {dimension_numbers = #tpu.dot_dimension_numbers<[1], [0], [0], [1], [0, 0, 1, 1], [], []>} : vector<36x32xbf16>, vector<32x16xbf16>, vector<36x16xf32> -> vector<36x16xf32>
    %c0_211 = arith.constant 0 : index
    %c0_212 = arith.constant 0 : index
    %192 = vector.load %arg10[%c0_211, %c0_212] : memref<36x16xf32, #tpu.memory_space<vmem>>, vector<29x16xf32>
    %193 = vector.extract_strided_slice %191 {offsets = [7, 0], sizes = [29, 16], strides = [1, 1]} : vector<36x16xf32> to vector<29x16xf32>
    %194 = arith.addf %192, %193 : vector<29x16xf32>
    %c0_213 = arith.constant 0 : index
    %c0_214 = arith.constant 0 : index
    %195 = vector.load %arg10[%c0_213, %c0_214] : memref<36x16xf32, #tpu.memory_space<vmem>>, vector<29x16xf32>
    tpu.vector_store %arg10[%c0_213, %c0_214], %194 {strides = array<i32>} : memref<36x16xf32, #tpu.memory_space<vmem>>, vector<29x16xf32>,
    %c0_215 = arith.constant 0 : index
    %c0_216 = arith.constant 0 : index
    %196 = vector.load %arg10[%c0_215, %c0_216] : memref<36x16xf32, #tpu.memory_space<vmem>>, vector<36x16xf32>
    %cst_217 = arith.constant 0.000000e+00 : f32
    %197 = vector.broadcast %cst_217 : f32 to vector<36x16xf32>
    %198 = arith.maximumf %196, %197 : vector<36x16xf32>
    %199 = arith.truncf %198 : vector<36x16xf32> to vector<36x16xbf16>
    %c0_218 = arith.constant 0 : index
    %c0_219 = arith.constant 0 : index
    %200 = vector.load %arg6[%c0_218, %c0_219] : memref<16x32xbf16, #tpu.memory_space<vmem>>, vector<16x32xbf16>
    %cst_220 = arith.constant dense<0.000000e+00> : vector<36x32xf32>
    %201 = tpu.matmul %199, %200, %cst_220 {dimension_numbers = #tpu.dot_dimension_numbers<[1], [0], [0], [1], [0, 0, 1, 1], [], []>} : vector<36x16xbf16>, vector<16x32xbf16>, vector<36x32xf32> -> vector<36x32xf32>
    %202 = arith.addf %132, %201 : vector<36x32xf32>
    %cst_221 = arith.constant 0.000000e+00 : f32
    %203 = vector.broadcast %cst_221 : f32 to vector<36x32xf32>
    %204 = arith.maximumf %202, %203 : vector<36x32xf32>
    %c0_222 = arith.constant 0 : index
    %c0_223 = arith.constant 0 : index
    %c0_224 = arith.constant 0 : index
    %205 = vector.load %arg7[%c0_222, %c0_223, %c0_224] : memref<1x36x32xf32, #tpu.memory_space<vmem>>, vector<1x36x32xf32>
    %206 = vector.shape_cast %205 : vector<1x36x32xf32> to vector<36x32xf32>
    %207 = vector.shape_cast %204 : vector<36x32xf32> to vector<1x36x32xf32>
    tpu.vector_store %arg7[%c0_222, %c0_223, %c0_224], %207 {strides = array<i32>} : memref<1x36x32xf32, #tpu.memory_space<vmem>>, vector<1x36x32xf32>,
    return
  }
  func.func @transform_0(%arg0: i32) -> (i32, i32, i32) {
    %c0_i32 = arith.constant 0 : i32
    %c0_i32_0 = arith.constant 0 : i32
    %c0_i32_1 = arith.constant 0 : i32
    return %arg0, %c0_i32, %c0_i32_0 : i32, i32, i32
  }
  func.func @transform_1(%arg0: i32) -> (i32, i32) {
    %c0_i32 = arith.constant 0 : i32
    %c0_i32_0 = arith.constant 0 : i32
    %c0_i32_1 = arith.constant 0 : i32
    return %c0_i32, %c0_i32_0 : i32, i32
  }
  func.func @transform_2(%arg0: i32) -> (i32, i32) {
    %c0_i32 = arith.constant 0 : i32
    %c0_i32_0 = arith.constant 0 : i32
    %c0_i32_1 = arith.constant 0 : i32
    return %c0_i32, %c0_i32_0 : i32, i32
  }
  func.func @transform_3(%arg0: i32) -> (i32, i32) {
    %c0_i32 = arith.constant 0 : i32
    %c0_i32_0 = arith.constant 0 : i32
    %c0_i32_1 = arith.constant 0 : i32
    return %c0_i32, %c0_i32_0 : i32, i32
  }
  func.func @transform_4(%arg0: i32) -> (i32, i32) {
    %c0_i32 = arith.constant 0 : i32
    %c0_i32_0 = arith.constant 0 : i32
    %c0_i32_1 = arith.constant 0 : i32
    return %c0_i32, %c0_i32_0 : i32, i32
  }
  func.func @transform_5(%arg0: i32) -> (i32, i32) {
    %c0_i32 = arith.constant 0 : i32
    %c0_i32_0 = arith.constant 0 : i32
    %c0_i32_1 = arith.constant 0 : i32
    return %c0_i32, %c0_i32_0 : i32, i32
  }
  func.func @transform_6(%arg0: i32) -> (i32, i32, i32) {
    %c0_i32 = arith.constant 0 : i32
    %c0_i32_0 = arith.constant 0 : i32
    %c0_i32_1 = arith.constant 0 : i32
    return %arg0, %c0_i32, %c0_i32_0 : i32, i32, i32
  }
}

</mosaic_0001>

<bundles_post_ra>
// kernel: encoder_forward_pallas.3
= control target key start
LH: loop header
LB: loop body
LE: loop exit
PB: predicated region body
PF: predicated region fallthrough
CT: control target
= control target key end

     0   :  { %s1186_s12 = smov 0   ;;  %s1400_s0 = inlined_call_operand.vmem [shape: bf16[2,81,16], index: 0, kind: input, shape index: {}]   ;;  %s1401_s1 = inlined_call_operand.vmem [shape: bf16[64,16], index: 1, kind: input, shape index: {}]   ;;  %s1402_s2 = inlined_call_operand.vmem [shape: f32[1,16], index: 2, kind: input, shape index: {}]   ;;  %s1403_s3 = inlined_call_operand.vmem [shape: bf16[2,81,16], index: 3, kind: output, shape index: {}]  }
   0x1 LB: > { %s987_s13 = sadd.s32 4294967295, %s1163_s12   ;;  %p991_p0 = scmp.ge.s32.totalorder %s1163_s12, 1  ;;  %s1163_s12 = sphi %s1186_s12, %s13_s12  }
   0x2   : > { %p137_p1 = scmp.lt.s32.totalorder %s1163_s12, 3 }
   0x4   : > { %p138_p2 = pnand %p991_p0, %p137_p1 }
   0x5   : > { %p161_p3 = scmp.lt.s32.totalorder (!%p138_p2), %s987_s13, 1 }
   0x6   : > { %141 = sbr.rel (%p138_p2) target bundleno = 287 (0x11f), region = 32 }
   0xb   : > { %v1147_v0 = vld [vmem:[%s1401_s1] sm:$0xff]   ;;  %v1148_v1 = vld [vmem:[%s1401_s1 + $0x8] sm:$0xff]   ;;  %vm183_vm0 = vcmask 130048   ;;  %s1407_s13 = smov (!%p161_p3, %s987_s13), 1  ;;  %v1150_v2 = vld [vmem:[%s1401_s1 + $0x10] sm:$0xff]   ;;  %v1165_v4 = vmov 0.0  }
   0xc   : > { %1081 = vmatprep.subr.bf16.mxu0 %v1147_v0  ;;  %1095 = vmatprep.subr.bf16.mxu1 %v1148_v1  ;;  %v1154_v3 = vld [vmem:[%s1401_s1 + $0x18] sm:$0xff]   ;;  %s1137_s22 = smul.u32 44, %s1407_s13  ;;  %186 = vst.msk [vmem:[#allocation2 + $0x10] sm:$0xff] %vm183_vm0, %v1165_v4  ;;  %184 = vst.msk [vmem:[#allocation2] sm:$0xff] %vm183_vm0, %v1165_v4  ;;  %vm194_vm1 = vcmask 122880   ;;  %vm472_vm2 = vcmask 1046528  }
   0xd   : > { %1082 = vmatpush3.bf16.msra.mxu0 %v1147_v0  ;;  %1096 = vmatpush3.bf16.msra.mxu1 %v1148_v1  ;;  %185 = vst.msk [vmem:[#allocation2 + $0x8] sm:$0xff] %vm183_vm0, %v1165_v4  ;;  %187 = vst.msk [vmem:[#allocation2 + $0x18] sm:$0xff] %vm183_vm0, %v1165_v4  ;;  %vm927_vm3 = vsmask.f32 256  ;;  %vm782_vm5 = vcmask 1045504   ;;  %vm915_vm6 = vcmask 125952  }
   0xe   : > { %1109 = vmatprep.subr.bf16.mxu0 %v1150_v2  ;;  %188 = vst.msk [vmem:[#allocation2 + $0x20] sm:$0xff] %vm183_vm0, %v1165_v4  ;;  %189 = vst.msk [vmem:[#allocation2 + $0x28] sm:$0xff] %vm183_vm0, %v1165_v4  ;;  %1123 = vmatprep.subr.bf16.mxu1 %v1154_v3  ;;  %s165_s25 = scalar_lea.vmem %s1400_s0, %s1137_s22  ;;  %s1293_s30 = scalar_lea.vmem %s1403_s3, %s1137_s22  ;;  %vm828_vm7 = vcmask 129024  }
   0xf   : > { %190 = vst.msk [vmem:[#allocation2 + $0x30] sm:$0xff] %vm183_vm0, %v1165_v4  ;;  %191 = vst.msk [vmem:[#allocation2 + $0x38] sm:$0xff] %vm183_vm0, %v1165_v4  ;;  %v1149_v5 = vld [vmem:[%s165_s25] sm:$0xff]   ;;  %v1151_v6 = vld [vmem:[%s165_s25 + $0x8] sm:$0xff]  }
  0x10   : > { %192 = vst.msk [vmem:[#allocation2 + $0x40] sm:$0xff] %vm183_vm0, %v1165_v4  ;;  %193 = vst.msk [vmem:[#allocation2 + $0x48] sm:$0xff] %vm183_vm0, %v1165_v4  ;;  %1083 = vmatprep.mubr.msk.bf16.mxu0 %vm183_vm0, %v1149_v5  ;;  %1097 = vmatprep.mubr.msk.bf16.mxu1 %vm183_vm0, %v1149_v5  ;;  %v1152_v7 = vld [vmem:[%s165_s25 + $0x10] sm:$0xff]   ;;  %v1153_v8 = vld [vmem:[%s165_s25 + $0x18] sm:$0xff]  }
  0x11   : > { %1084 = vmatmul.mubr.msk.bf16.vlgmr.msra.gmra.mxu0 %vm183_vm0, %v1151_v6  ;;  %1098 = vmatmul.mubr.msk.bf16.vlgmr.msra.gmra.mxu1 %vm183_vm0, %v1151_v6  ;;  %v1155_v9 = vld [vmem:[%s165_s25 + $0x20] sm:$0xff]   ;;  %v1156_v10 = vld [vmem:[%s165_s25 + $0x28] ss:$0 sps:$4 sm:$0x11]   ;;  %195 = vst.msk [vmem:[#allocation2 + $0x50] sm:$0x1] %vm194_vm1, %v1165_v4  ;;  %vm1301_vm4 = vmand %vm194_vm1, %vm927_vm3 }
  0x12   : > { %1110 = vmatpush3.bf16.msra.mxu0 %v1150_v2  ;;  %1087 = vmatprep.mubr.msk.bf16.mxu0 %vm183_vm0, %v1152_v7 }
  0x13   : > { %1101 = vmatprep.mubr.msk.bf16.mxu1 %vm183_vm0, %v1152_v7  ;;  %1124 = vmatpush3.bf16.msra.mxu1 %v1154_v3  ;;  %v332_v11 = vld [vmem:[#allocation2 + $0x10] sm:$0xff]  ;;  %v330_v14 = vld [vmem:[#allocation2] sm:$0xff] }
  0x14   : > { %v333_v18 = vld [vmem:[#allocation2 + $0x18] sm:$0xff]  ;;  %v331_v23 = vld [vmem:[#allocation2 + $0x8] sm:$0xff] }
  0x15   : > { %v334_v35 = vld [vmem:[#allocation2 + $0x20] sm:$0xff]  ;;  %v335_v49 = vld [vmem:[#allocation2 + $0x28] sm:$0xff] }
  0x16   : > { %v336_v29 = vld [vmem:[#allocation2 + $0x30] sm:$0xff]  ;;  %v337_v41 = vld [vmem:[#allocation2 + $0x38] sm:$0xff] }
  0x17   : > { %v338_v2 = vld [vmem:[#allocation2 + $0x40] sm:$0xff] }
  0x18   : > { %v340_v57 = vld [vmem:[#allocation2 + $0x50] sm:$0x1] }
  0x19   : > { %1088 = vmatmul.mubr.msk.bf16.gmra.mxu0 %vm183_vm0, %v1153_v8  ;;  %1102 = vmatmul.mubr.msk.bf16.gmra.mxu1 %vm183_vm0, %v1153_v8 }
  0x1a   : > { %1091 = vmatprep.mubr.msk.bf16.mxu0 %vm183_vm0, %v1155_v9  ;;  %1105 = vmatprep.mubr.msk.bf16.mxu1 %vm183_vm0, %v1155_v9 }
  0x21   : > { %1092 = vmatmul.mubr.msk.bf16.gmra.mxu0 %vm183_vm0, %v1156_v10  ;;  %1106 = vmatmul.mubr.msk.bf16.gmra.mxu1 %vm183_vm0, %v1156_v10 }
  0x22   : > { %1111 = vmatprep.mubr.msk.bf16.mxu0 %vm183_vm0, %v1149_v5  ;;  %1125 = vmatprep.mubr.msk.bf16.mxu1 %vm183_vm0, %v1149_v5 }
  0x29   : > { %1112 = vmatmul.mubr.msk.bf16.vlgmr.msra.gmra.mxu0 %vm183_vm0, %v1151_v6  ;;  %1126 = vmatmul.mubr.msk.bf16.vlgmr.msra.gmra.mxu1 %vm183_vm0, %v1151_v6 }
  0x2a   : > { %1115 = vmatprep.mubr.msk.bf16.mxu0 %vm183_vm0, %v1152_v7  ;;  %1129 = vmatprep.mubr.msk.bf16.mxu1 %vm183_vm0, %v1152_v7 }
  0x31   : > { %1116 = vmatmul.mubr.msk.bf16.gmra.mxu0 %vm183_vm0, %v1153_v8  ;;  %1130 = vmatmul.mubr.msk.bf16.gmra.mxu1 %vm183_vm0, %v1153_v8 }
  0x32   : > { %1119 = vmatprep.mubr.msk.bf16.mxu0 %vm183_vm0, %v1155_v9  ;;  %1133 = vmatprep.mubr.msk.bf16.mxu1 %vm183_vm0, %v1155_v9 }
  0x39   : > { %1120 = vmatmul.mubr.msk.bf16.gmra.mxu0 %vm183_vm0, %v1156_v10  ;;  %1134 = vmatmul.mubr.msk.bf16.gmra.mxu1 %vm183_vm0, %v1156_v10 }
  0xd1   : > { %v1085_v12 = vpop.f32.mrf.mxu0  ;;  %v1099_v13 = vpop.f32.mrf.mxu1 }
  0xd2   : > { %v343_v15 = vadd.f32 %v1085_v12, %v332_v11  ;;  %v476_v20 = vrot.slane %v1099_v13, 1 }
  0xd3   : > { %v284_v16 = vpop.f32.mrf.mxu0  ;;  %v405_v17 = vpop.f32.mrf.mxu1 }
  0xd4   : > { %354 = vst.msk [vmem:[#allocation2 + $0x10] sm:$0xff] %vm183_vm0, %v343_v15  ;;  %v341_v19 = vadd.f32 %v330_v14, %v284_v16  ;;  %v473_v26 = vrot.slane %v405_v17, 1  ;;  %v339_v15 = vld [vmem:[#allocation2 + $0x48] sm:$0xff] }
  0xd5   : > { %v1086_v21 = vpop.f32.mrf.mxu0  ;;  %v1100_v22 = vpop.f32.mrf.mxu1 }
  0xd6   : > { %352 = vst.msk [vmem:[#allocation2] sm:$0xff] %vm183_vm0, %v341_v19  ;;  %v344_v24 = vadd.f32 %v1086_v21, %v333_v18  ;;  %v478_v25 = vrot.slane %v1100_v22, 1 }
  0xd7   : > { %v287_v27 = vpop.f32.mrf.mxu0  ;;  %v408_v28 = vpop.f32.mrf.mxu1 }
  0xd8   : > { %355 = vst.msk [vmem:[#allocation2 + $0x18] sm:$0xff] %vm183_vm0, %v344_v24  ;;  %v342_v30 = vadd.f32 %v331_v23, %v287_v27  ;;  %v474_v31 = vrot.slane %v408_v28, 1  ;;  %v479_v32 = vsel %vm472_vm2, %v476_v20, %v478_v25 }
  0xd9   : > { %v1089_v33 = vpop.f32.mrf.mxu0  ;;  %v1253_v34 = vpop.f32.mrf.mxu1 }
  0xda   : > { %353 = vst.msk [vmem:[#allocation2 + $0x8] sm:$0xff] %vm183_vm0, %v342_v30  ;;  %v347_v36 = vadd.f32 %v1089_v33, %v336_v29  ;;  %v475_v38 = vsel %vm472_vm2, %v473_v26, %v474_v31  ;;  %v484_v46 = vrot.slane %v1253_v34, 1  ;;  %v477_v62 = vsel %vm472_vm2, %v474_v31, %v476_v20  ;;  %v1281_v26 = vld [vmem:[%s1402_s2] ss:$0 sm:$0xff] }
  0xdb   : > { %v453_v37 = vld [vmem:[#allocation2 + $0x10] sm:$0xff]  ;;  %v300_v39 = vpop.f32.mrf.mxu0  ;;  %v421_v40 = vpop.f32.mrf.mxu1 }
  0xdc   : > { %v506_v42 = vadd.f32 %v479_v32, %v453_v37  ;;  %358 = vst.msk [vmem:[#allocation2 + $0x30] sm:$0xff] %vm183_vm0, %v347_v36  ;;  %v345_v43 = vadd.f32 %v334_v35, %v300_v39  ;;  %v480_v44 = vrot.slane %v421_v40, 1 }
  0xdd   : > { %v451_v45 = vld [vmem:[#allocation2] sm:$0xff]  ;;  %v1090_v47 = vpop.f32.mrf.mxu0  ;;  %v1104_v48 = vpop.f32.mrf.mxu1 }
  0xde   : > { %516 = vst.msk [vmem:[#allocation2 + $0x10] sm:$0xff] %vm183_vm0, %v506_v42  ;;  %v504_v50 = vadd.f32 %v475_v38, %v451_v45  ;;  %356 = vst.msk [vmem:[#allocation2 + $0x20] sm:$0xff] %vm183_vm0, %v345_v43  ;;  %v481_v51 = vsel %vm472_vm2, %v478_v25, %v480_v44  ;;  %v348_v52 = vadd.f32 %v1090_v47, %v337_v41  ;;  %v486_v53 = vrot.slane %v1104_v48, 1 }
  0xdf   : > { %v454_v54 = vld [vmem:[#allocation2 + $0x18] sm:$0xff]  ;;  %v303_v55 = vpop.f32.mrf.mxu0  ;;  %v424_v56 = vpop.f32.mrf.mxu1 }
  0xe0   : > { %514 = vst.msk [vmem:[#allocation2] sm:$0xff] %vm183_vm0, %v504_v50  ;;  %v507_v58 = vadd.f32 %v481_v51, %v454_v54  ;;  %359 = vst.msk [vmem:[#allocation2 + $0x38] sm:$0xff] %vm183_vm0, %v348_v52  ;;  %v346_v59 = vadd.f32 %v335_v49, %v303_v55  ;;  %v482_v60 = vrot.slane %v424_v56, 1  ;;  %v487_v63 = vsel %vm472_vm2, %v484_v46, %v486_v53 }
  0xe1   : > { %v452_v61 = vld [vmem:[#allocation2 + $0x8] sm:$0xff]  ;;  %v1093_v0 = vpop.f32.mrf.mxu0  ;;  %v1266_v1 = vpop.f32.mrf.mxu1 }
  0xe2   : > { %v505_v3 = vadd.f32 %v477_v62, %v452_v61  ;;  %517 = vst.msk [vmem:[#allocation2 + $0x18] sm:$0xff] %vm183_vm0, %v507_v58  ;;  %357 = vst.msk [vmem:[#allocation2 + $0x28] sm:$0xff] %vm183_vm0, %v346_v59  ;;  %v351_v4 = vadd.f32 %v1093_v0, %v340_v57  ;;  %v483_v6 = vsel %vm472_vm2, %v480_v44, %v482_v60  ;;  %v492_v35 = vrot.slane %v1266_v1, 1  ;;  %v929_v44 = vld [vmem:[%s1293_s30 + $0x28] sm:$0x1] }
  0xe3   : > { %v457_v5 = vld [vmem:[#allocation2 + $0x30] sm:$0xff]  ;;  %v316_v7 = vpop.f32.mrf.mxu0  ;;  %v437_v8 = vpop.f32.mrf.mxu1  ;;  %v485_v25 = vsel %vm472_vm2, %v482_v60, %v484_v46 }
  0xe4   : > { %515 = vst.msk [vmem:[#allocation2 + $0x8] sm:$0xff] %vm183_vm0, %v505_v3  ;;  %v510_v9 = vadd.f32 %v487_v63, %v457_v5  ;;  %v349_v10 = vadd.f32 %v338_v2, %v316_v7  ;;  %v488_v11 = vrot.slane %v437_v8, 1 }
  0xe5   : > { %362 = vst.msk [vmem:[#allocation2 + $0x50] sm:$0x1] %vm194_vm1, %v351_v4  ;;  %v455_v12 = vld [vmem:[#allocation2 + $0x20] sm:$0xff]  ;;  %v1094_v13 = vpop.f32.mrf.mxu0  ;;  %v1108_v14 = vpop.f32.mrf.mxu1  ;;  %v613_v5 = vld [vmem:[#allocation2 + $0x10] sm:$0xff] }
  0xe6   : > { %520 = vst.msk [vmem:[#allocation2 + $0x30] sm:$0xff] %vm183_vm0, %v510_v9  ;;  %v508_v16 = vadd.f32 %v483_v6, %v455_v12  ;;  %360 = vst.msk [vmem:[#allocation2 + $0x40] sm:$0xff] %vm183_vm0, %v349_v10  ;;  %v489_v17 = vsel %vm472_vm2, %v486_v53, %v488_v11 }
  0xe7   : > { %v458_v18 = vld [vmem:[#allocation2 + $0x38] sm:$0xff]  ;;  %v319_v19 = vpop.f32.mrf.mxu0  ;;  %v440_v20 = vpop.f32.mrf.mxu1  ;;  %v611_v58 = vld [vmem:[#allocation2] sm:$0xff] }
  0xe8   : > { %518 = vst.msk [vmem:[#allocation2 + $0x20] sm:$0xff] %vm183_vm0, %v508_v16  ;;  %v511_v21 = vadd.f32 %v489_v17, %v458_v18  ;;  %v350_v22 = vadd.f32 %v339_v15, %v319_v19  ;;  %v490_v23 = vrot.slane %v440_v20, 1 }
  0xe9   : > { %v456_v24 = vld [vmem:[#allocation2 + $0x28] sm:$0xff]  ;;  %v1113_v27 = vpop.f32.mrf.mxu0  ;;  %v1283_v28 = vpop.f32.mrf.mxu1  ;;  %v614_v20 = vld [vmem:[#allocation2 + $0x18] sm:$0xff] }
  0xea   : > { %v509_v29 = vadd.f32 %v485_v25, %v456_v24  ;;  %521 = vst.msk [vmem:[#allocation2 + $0x38] sm:$0xff] %vm183_vm0, %v511_v21  ;;  %361 = vst.msk [vmem:[#allocation2 + $0x48] sm:$0xff] %vm183_vm0, %v350_v22  ;;  %v491_v31 = vsel %vm472_vm2, %v488_v11, %v490_v23  ;;  %v631_v41 = vrot.slane %v1113_v27, 1  ;;  %v493_v52 = vsel %vm472_vm2, %v490_v23, %v492_v35 }
  0xeb   : > { %v566_v32 = vpop.f32.mrf.mxu0  ;;  %v718_v33 = vpop.f32.mrf.mxu1  ;;  %v612_v48 = vld [vmem:[#allocation2 + $0x8] sm:$0xff]  ;;  %v784_v0 = vrot.slane %v1283_v28, 2 }
  0xec   : > { %v840_v30 = vld [vmem:[#allocation2 + $0x50] sm:$0x1]  ;;  %519 = vst.msk [vmem:[#allocation2 + $0x28] sm:$0xff] %vm183_vm0, %v509_v29 }
  0xed   : > { %v858_v34 = vadd.f32 %v1281_v26, %v840_v30  ;;  %v459_v36 = vld [vmem:[#allocation2 + $0x40] sm:$0xff]  ;;  %v1114_v37 = vpop.f32.mrf.mxu0  ;;  %v1298_v38 = vpop.f32.mrf.mxu1 }
  0xee   : > { %v512_v40 = vadd.f32 %v491_v31, %v459_v36  ;;  %v633_v42 = vrot.slane %v1114_v37, 1  ;;  %v786_v3 = vrot.slane %v1298_v38, 2 }
  0xef   : > { %v869_v39 = vmax.f32 %v858_v34, 0.0  ;;  %v568_v45 = vpop.f32.mrf.mxu0  ;;  %v720_v46 = vpop.f32.mrf.mxu1  ;;  %v615_v21 = vld [vmem:[#allocation2 + $0x20] sm:$0xff] }
  0xf0   : > { %522 = vst.msk [vmem:[#allocation2 + $0x40] sm:$0xff] %vm183_vm0, %v512_v40  ;;  %v634_v49 = vsel %vm472_vm2, %v631_v41, %v633_v42  ;;  %v630_v50 = vrot.slane %v568_v45, 1  ;;  %v783_v11 = vrot.slane %v720_v46, 2  ;;  %v787_v19 = vsel %vm782_vm5, %v784_v0, %v786_v3 }
  0xf1   : > { %v1052_v47 = vpack.c.bf16 %v869_v39, %v869_v39  ;;  %v460_v51 = vld [vmem:[#allocation2 + $0x48] sm:$0xff]  ;;  %v659_v53 = vadd.f32 %v634_v49, %v612_v48  ;;  %v1117_v54 = vpop.f32.mrf.mxu0  ;;  %v1309_v55 = vpop.f32.mrf.mxu1 }
  0xf2   : > { %v513_v57 = vadd.f32 %v493_v52, %v460_v51  ;;  %v632_v59 = vsel %vm472_vm2, %v630_v50, %v631_v41  ;;  %v639_v4 = vrot.slane %v1117_v54, 1  ;;  %v785_v34 = vsel %vm782_vm5, %v783_v11, %v784_v0 }
  0xf3   : > { %v930_v56 = vsel %vm1301_vm4, %v1052_v47, %v929_v44  ;;  %668 = vst.msk [vmem:[#allocation2 + $0x8] sm:$0xff] %vm183_vm0, %v659_v53  ;;  %v658_v60 = vadd.f32 %v632_v59, %v611_v58  ;;  %v581_v61 = vpop.f32.mrf.mxu0  ;;  %v1316_v62 = vpop.f32.mrf.mxu1  ;;  %v616_v12 = vld [vmem:[#allocation2 + $0x28] sm:$0xff]  ;;  %v792_v40 = vrot.slane %v1309_v55, 2  ;;  %v618_v55 = vld [vmem:[#allocation2 + $0x38] sm:$0xff] }
  0xf4   : > { %931 = vst [vmem:[%s1293_s30 + $0x28] sm:$0x1] %v930_v56  ;;  %523 = vst.msk [vmem:[#allocation2 + $0x48] sm:$0xff] %vm183_vm0, %v513_v57  ;;  %v635_v63 = vrot.slane %v581_v61, 1  ;;  %v788_v27 = vrot.slane %v1316_v62, 2 }
  0xf5   : > { %667 = vst.msk [vmem:[#allocation2] sm:$0xff] %vm183_vm0, %v658_v60  ;;  %v1118_v1 = vpop.f32.mrf.mxu0  ;;  %v1321_v2 = vpop.f32.mrf.mxu1 }
  0xf6   : > { %v636_v6 = vsel %vm472_vm2, %v633_v42, %v635_v63  ;;  %v641_v7 = vrot.slane %v1118_v1, 1  ;;  %v794_v41 = vrot.slane %v1321_v2, 2  ;;  %v617_v42 = vld [vmem:[#allocation2 + $0x30] sm:$0xff]  ;;  %v789_v44 = vsel %vm782_vm5, %v786_v3, %v788_v27 }
  0xf7   : > { %v660_v8 = vadd.f32 %v636_v6, %v613_v5  ;;  %v584_v9 = vpop.f32.mrf.mxu0  ;;  %v1325_v10 = vpop.f32.mrf.mxu1  ;;  %v619_v56 = vld [vmem:[#allocation2 + $0x40] sm:$0xff] }
  0xf8   : > { %v642_v13 = vsel %vm472_vm2, %v639_v4, %v641_v7  ;;  %v637_v14 = vrot.slane %v584_v9, 1  ;;  %v790_v49 = vrot.slane %v1325_v10, 2  ;;  %v795_v54 = vsel %vm782_vm5, %v792_v40, %v794_v41 }
  0xf9   : > { %669 = vst.msk [vmem:[#allocation2 + $0x10] sm:$0xff] %vm183_vm0, %v660_v8  ;;  %v663_v15 = vadd.f32 %v642_v13, %v616_v12  ;;  %v1121_v16 = vpop.f32.mrf.mxu0  ;;  %v1329_v17 = vpop.f32.mrf.mxu1 }
  0xfa   : > { %v764_v18 = vld [vmem:[#allocation2 + $0x8] sm:$0xff]  ;;  %v638_v22 = vsel %vm472_vm2, %v635_v63, %v637_v14  ;;  %v640_v23 = vsel %vm472_vm2, %v637_v14, %v639_v4  ;;  %v647_v50 = vrot.slane %v1121_v16, 1  ;;  %v791_v1 = vsel %vm782_vm5, %v788_v27, %v790_v49 }
  0xfb   : > { %v839_v24 = vld [vmem:[#allocation2 + $0x48] sm:$0xff]  ;;  %v812_v25 = vadd.f32 %v787_v19, %v764_v18  ;;  %672 = vst.msk [vmem:[#allocation2 + $0x28] sm:$0xff] %vm183_vm0, %v663_v15  ;;  %v661_v28 = vadd.f32 %v638_v22, %v614_v20  ;;  %v662_v29 = vadd.f32 %v640_v23, %v615_v21  ;;  %v597_v30 = vpop.f32.mrf.mxu0  ;;  %v1336_v31 = vpop.f32.mrf.mxu1  ;;  %v793_v2 = vsel %vm782_vm5, %v790_v49, %v792_v40 }
  0xfc   : > { %v857_v32 = vadd.f32 %v1281_v26, %v839_v24  ;;  %v763_v33 = vld [vmem:[#allocation2] sm:$0xff]  ;;  %v643_v35 = vrot.slane %v597_v30, 1  ;;  %v796_v3 = vrot.slane %v1336_v31, 2  ;;  %v800_v11 = vrot.slane %v1329_v17, 2 }
  0xfd   : > { %821 = vst.msk [vmem:[#allocation2 + $0x8] sm:$0xff] %vm183_vm0, %v812_v25  ;;  %v811_v36 = vadd.f32 %v785_v34, %v763_v33  ;;  %670 = vst.msk [vmem:[#allocation2 + $0x18] sm:$0xff] %vm183_vm0, %v661_v28  ;;  %v1122_v37 = vpop.f32.mrf.mxu0  ;;  %v1136_v38 = vpop.f32.mrf.mxu1 }
  0xfe   : > { %671 = vst.msk [vmem:[#allocation2 + $0x20] sm:$0xff] %vm183_vm0, %v662_v29  ;;  %v868_v39 = vmax.f32 %v857_v32, 0.0  ;;  %v644_v43 = vsel %vm472_vm2, %v641_v7, %v643_v35  ;;  %v797_v13 = vsel %vm782_vm5, %v794_v41, %v796_v3 }
  0xff   : > { %820 = vst.msk [vmem:[#allocation2] sm:$0xff] %vm183_vm0, %v811_v36  ;;  %v664_v45 = vadd.f32 %v644_v43, %v617_v42  ;;  %v600_v46 = vpop.f32.mrf.mxu0  ;;  %v752_v7 = vpop.f32.mrf.mxu1 }
 0x100   : > { %v1051_v47 = vpack.c.bf16 %v868_v39, %v868_v39  ;;  %v765_v48 = vld [vmem:[#allocation2 + $0x10] sm:$0xff]  ;;  %v645_v51 = vrot.slane %v600_v46, 1  ;;  %v798_v14 = vrot.slane %v752_v7, 2 }
 0x101   : > { %v813_v52 = vadd.f32 %v789_v44, %v765_v48  ;;  %673 = vst.msk [vmem:[#allocation2 + $0x30] sm:$0xff] %vm183_vm0, %v664_v45 }
 0x102   : > { %925 = vst.msk [vmem:[%s1293_s30 + $0x24] sm:$0xf] %vm915_vm6, %v1051_v47  ;;  %v768_v53 = vld [vmem:[#allocation2 + $0x28] sm:$0xff]  ;;  %v646_v57 = vsel %vm472_vm2, %v643_v35, %v645_v51  ;;  %v648_v58 = vsel %vm472_vm2, %v645_v51, %v647_v50  ;;  %v799_v17 = vsel %vm782_vm5, %v796_v3, %v798_v14  ;;  %v801_v25 = vsel %vm782_vm5, %v798_v14, %v800_v11 }
 0x103   : > { %822 = vst.msk [vmem:[#allocation2 + $0x10] sm:$0xff] %vm183_vm0, %v813_v52  ;;  %v816_v59 = vadd.f32 %v795_v54, %v768_v53  ;;  %v665_v60 = vadd.f32 %v646_v57, %v618_v55  ;;  %v666_v61 = vadd.f32 %v648_v58, %v619_v56 }
 0x104   : > { %v831_v62 = vld [vmem:[#allocation2 + $0x8] sm:$0xff]  ;;  %v766_v63 = vld [vmem:[#allocation2 + $0x18] sm:$0xff] }
 0x105   : > { %v767_v0 = vld [vmem:[#allocation2 + $0x20] sm:$0xff]  ;;  %v849_v4 = vadd.f32 %v1281_v26, %v831_v62  ;;  %825 = vst.msk [vmem:[#allocation2 + $0x28] sm:$0xff] %vm183_vm0, %v816_v59  ;;  %v814_v5 = vadd.f32 %v791_v1, %v766_v63  ;;  %674 = vst.msk [vmem:[#allocation2 + $0x38] sm:$0xff] %vm183_vm0, %v665_v60 }
 0x106   : > { %v815_v6 = vadd.f32 %v793_v2, %v767_v0  ;;  %675 = vst.msk [vmem:[#allocation2 + $0x40] sm:$0xff] %vm183_vm0, %v666_v61  ;;  %v830_v8 = vld [vmem:[#allocation2] sm:$0xff] }
 0x107   : > { %v860_v9 = vmax.f32 %v849_v4, 0.0  ;;  %v848_v10 = vadd.f32 %v1281_v26, %v830_v8  ;;  %823 = vst.msk [vmem:[#allocation2 + $0x18] sm:$0xff] %vm183_vm0, %v814_v5 }
 0x108   : > { %824 = vst.msk [vmem:[#allocation2 + $0x20] sm:$0xff] %vm183_vm0, %v815_v6  ;;  %v769_v12 = vld [vmem:[#allocation2 + $0x30] sm:$0xff] }
 0x109   : > { %v1043_v15 = vpack.c.bf16 %v860_v9, %v860_v9  ;;  %v859_v16 = vmax.f32 %v848_v10, 0.0  ;;  %v817_v18 = vadd.f32 %v797_v13, %v769_v12 }
 0x10a   : > { %v832_v19 = vld [vmem:[#allocation2 + $0x10] sm:$0xff] }
 0x10b   : > { %917 = vst.msk [vmem:[%s1293_s30 + $0x4] sm:$0xf] %vm915_vm6, %v1043_v15  ;;  %v1042_v20 = vpack.c.bf16 %v859_v16, %v859_v16  ;;  %v850_v21 = vadd.f32 %v1281_v26, %v832_v19 }
 0x10c   : > { %826 = vst.msk [vmem:[#allocation2 + $0x30] sm:$0xff] %vm183_vm0, %v817_v18  ;;  %v835_v22 = vld [vmem:[#allocation2 + $0x28] sm:$0xff]  ;;  %v770_v23 = vld [vmem:[#allocation2 + $0x38] sm:$0xff] }
 0x10d   : > { %v771_v24 = vld [vmem:[#allocation2 + $0x40] sm:$0x7f]  ;;  %916 = vst.msk [vmem:[%s1293_s30] sm:$0xf] %vm915_vm6, %v1042_v20  ;;  %v861_v27 = vmax.f32 %v850_v21, 0.0  ;;  %v853_v28 = vadd.f32 %v1281_v26, %v835_v22  ;;  %v818_v29 = vadd.f32 %v799_v17, %v770_v23 }
 0x10e   : > { %v819_v30 = vadd.f32 %v801_v25, %v771_v24  ;;  %v833_v31 = vld [vmem:[#allocation2 + $0x18] sm:$0xff] }
 0x10f   : > { %v834_v32 = vld [vmem:[#allocation2 + $0x20] sm:$0xff]  ;;  %v1044_v33 = vpack.c.bf16 %v861_v27, %v861_v27  ;;  %v864_v34 = vmax.f32 %v853_v28, 0.0  ;;  %v851_v35 = vadd.f32 %v1281_v26, %v833_v31  ;;  %827 = vst.msk [vmem:[#allocation2 + $0x38] sm:$0xff] %vm183_vm0, %v818_v29 }
 0x110   : > { %v852_v36 = vadd.f32 %v1281_v26, %v834_v32  ;;  %829 = vst.msk [vmem:[#allocation2 + $0x40] sm:$0x7f] %vm828_vm7, %v819_v30 }
 0x111   : > { %918 = vst.msk [vmem:[%s1293_s30 + $0x8] sm:$0xf] %vm915_vm6, %v1044_v33  ;;  %v1047_v37 = vpack.c.bf16 %v864_v34, %v864_v34  ;;  %v862_v38 = vmax.f32 %v851_v35, 0.0 }
 0x112   : > { %v863_v39 = vmax.f32 %v852_v36, 0.0 }
 0x113   : > { %v836_v40 = vld [vmem:[#allocation2 + $0x30] sm:$0xff]  ;;  %921 = vst.msk [vmem:[%s1293_s30 + $0x14] sm:$0xf] %vm915_vm6, %v1047_v37  ;;  %v1045_v41 = vpack.c.bf16 %v862_v38, %v862_v38 }
 0x114   : > { %v1046_v42 = vpack.c.bf16 %v863_v39, %v863_v39  ;;  %v854_v43 = vadd.f32 %v1281_v26, %v836_v40 }
 0x115   : > { %919 = vst.msk [vmem:[%s1293_s30 + $0xc] sm:$0xf] %vm915_vm6, %v1045_v41 }
 0x116   : > { %920 = vst.msk [vmem:[%s1293_s30 + $0x10] sm:$0xf] %vm915_vm6, %v1046_v42  ;;  %v865_v44 = vmax.f32 %v854_v43, 0.0  ;;  %v837_v45 = vld [vmem:[#allocation2 + $0x38] sm:$0xff] }
 0x117   : > { %v838_v46 = vld [vmem:[#allocation2 + $0x40] sm:$0xff]  ;;  %v855_v48 = vadd.f32 %v1281_v26, %v837_v45 }
 0x118   : > { %v1048_v47 = vpack.c.bf16 %v865_v44, %v865_v44  ;;  %v856_v49 = vadd.f32 %v1281_v26, %v838_v46 }
 0x119   : > { %v866_v50 = vmax.f32 %v855_v48, 0.0 }
 0x11a   : > { %922 = vst.msk [vmem:[%s1293_s30 + $0x18] sm:$0xf] %vm915_vm6, %v1048_v47  ;;  %v867_v51 = vmax.f32 %v856_v49, 0.0 }
 0x11b   : > { %v1049_v52 = vpack.c.bf16 %v866_v50, %v866_v50 }
 0x11c   : > { %v1050_v53 = vpack.c.bf16 %v867_v51, %v867_v51 }
 0x11d   : > { %923 = vst.msk [vmem:[%s1293_s30 + $0x1c] sm:$0xf] %vm915_vm6, %v1049_v52 }
 0x11e   : > { %924 = vst.msk [vmem:[%s1293_s30 + $0x20] sm:$0xf] %vm915_vm6, %v1050_v53 }
 0x11f PF: > { %s13_s12 = sadd.s32 1, %s1163_s12  }
 0x120   : > { %p10_p4 = scmp.ge.s32.totalorder %s13_s12, 4  }
 0x122   :  { %12 = sbr.rel (!%p10_p4) target bundleno = 1 (0x1), region = 62 }

// kernel: encoder_forward_pallas.4
= control target key start
LH: loop header
LB: loop body
LE: loop exit
PB: predicated region body
PF: predicated region fallthrough
CT: control target
= control target key end

     0   :  { %s884_s12 = smov 0   ;;  %s1006_s0 = inlined_call_operand.vmem [shape: bf16[2,25,64], index: 0, kind: input, shape index: {}]   ;;  %s1007_s1 = inlined_call_operand.vmem [shape: bf16[256,32], index: 1, kind: input, shape index: {}]   ;;  %s1008_s2 = inlined_call_operand.vmem [shape: f32[1,32], index: 2, kind: input, shape index: {}]   ;;  %s1009_s3 = inlined_call_operand.vmem [shape: bf16[2,25,32], index: 3, kind: output, shape index: {}]  }
   0x1 LB: > { %s708_s13 = sadd.s32 4294967295, %s861_s12   ;;  %p712_p0 = scmp.ge.s32.totalorder %s861_s12, 1  ;;  %s861_s12 = sphi %s884_s12, %s13_s12  }
   0x2   : > { %p137_p1 = scmp.lt.s32.totalorder %s861_s12, 3 }
   0x4   : > { %p138_p2 = pnand %p712_p0, %p137_p1 }
   0x5   : > { %p161_p3 = scmp.lt.s32.totalorder (!%p138_p2), %s708_s13, 1 }
   0x6   : > { %141 = sbr.rel (%p138_p2) target bundleno = 274 (0x112), region = 32 }
   0xb   : > { %v837_v0 = vld [vmem:[%s1007_s1 + $0x18] sm:$0xff]   ;;  %v839_v2 = vld [vmem:[%s1007_s1 + $0x10] sm:$0xff]   ;;  %s1011_s13 = smov (!%p161_p3, %s708_s13), 1  ;;  %vm176_vm0 = vcmask 261120   ;;  %v841_v4 = vld [vmem:[%s1007_s1 + $0x8] sm:$0xff]   ;;  %v863_v6 = vmov 0.0  }
   0xc   : > { %v838_v1 = vld [vmem:[%s1007_s1 + $0x38] sm:$0xff]   ;;  %780 = vmatprep.subr.bf16.mxu0 %v837_v0  ;;  %v840_v3 = vld [vmem:[%s1007_s1 + $0x30] sm:$0xff]   ;;  %s750_s24 = sshll.u32 %s1011_s13, 4  ;;  %v842_v5 = vld [vmem:[%s1007_s1 + $0x28] sm:$0xff]   ;;  %179 = vst.msk [vmem:[#allocation2 + $0x10] sm:$0xff] %vm176_vm0, %v863_v6  ;;  %vm224_vm1 = vcmask 523264  }
   0xd   : > { %781 = vmatpush3.bf16.msra.mxu0 %v837_v0  ;;  %792 = vmatprep.subr.bf16.mxu1 %v838_v1  ;;  %s165_s29 = scalar_lea.vmem %s1006_s0, %s750_s24  ;;  %177 = vst.msk [vmem:[#allocation2] sm:$0xff] %vm176_vm0, %v863_v6  ;;  %178 = vst.msk [vmem:[#allocation2 + $0x8] sm:$0xff] %vm176_vm0, %v863_v6  ;;  %v843_v7 = vld [vmem:[%s1007_s1] sm:$0xff]   ;;  %v847_v10 = vld [vmem:[%s1007_s1 + $0x58] sm:$0xff]   ;;  %vm180_vm2 = vcmask 253952   ;;  %vm380_vm3 = vcmask 1046528   ;;  %s977_s30 = scalar_lea.vmem %s1009_s3, %s750_s24 }
   0xe   : > { %793 = vmatpush3.bf16.msra.mxu1 %v838_v1  ;;  %782 = vmatprep.subr.bf16.mxu0 %v839_v2  ;;  %v845_v8 = vld [vmem:[%s165_s29] sm:$0xff]   ;;  %v849_v11 = vld [vmem:[%s1007_s1 + $0x78] sm:$0xff]   ;;  %v846_v12 = vld [vmem:[%s165_s29 + $0x8] sm:$0x1f]   ;;  %181 = vst.msk [vmem:[#allocation2 + $0x18] sm:$0x1] %vm180_vm2, %v863_v6 }
   0xf   : > { %794 = vmatprep.subr.bf16.mxu1 %v840_v3  ;;  %v844_v9 = vld [vmem:[%s1007_s1 + $0x20] sm:$0xff]   ;;  %788 = vmatprep.mubr.msk.bf16.mxu0 %vm224_vm1, %v845_v8  ;;  %v848_v13 = vld [vmem:[%s1007_s1 + $0x50] sm:$0xff]   ;;  %v850_v15 = vld [vmem:[%s1007_s1 + $0x48] sm:$0xff]   ;;  %vm648_vm4 = vsmask.f32 256  ;;  %vm485_vm6 = vcmask 1042432  }
  0x10   : > { %800 = vmatprep.mubr.msk.bf16.mxu1 %vm224_vm1, %v845_v8  ;;  %v851_v14 = vld [vmem:[%s1007_s1 + $0x70] sm:$0xff]   ;;  %v853_v16 = vld [vmem:[%s1007_s1 + $0x68] sm:$0xff]   ;;  %v852_v17 = vld [vmem:[%s1007_s1 + $0x40] sm:$0xff]   ;;  %vm501_vm7 = vcmask 257024   ;;  %vm591_vm8 = vcmask 1041408   ;;  %vm607_vm9 = vcmask 256000  }
  0x11   : > { %783 = vmatpush3.bf16.msra.mxu0 %v839_v2  ;;  %v854_v18 = vld [vmem:[%s1007_s1 + $0x60] sm:$0xff]   ;;  %vm649_vm5 = vmand %vm180_vm2, %vm648_vm4  ;;  %v650_v54 = vld [vmem:[%s977_s30 + $0xc] sm:$0x1] }
  0x12   : > { %795 = vmatpush3.bf16.msra.mxu1 %v840_v3  ;;  %784 = vmatprep.subr.bf16.mxu0 %v841_v4  ;;  %v968_v42 = vld [vmem:[%s1008_s2] ss:$0 sm:$0xff] }
  0x13   : > { %796 = vmatprep.subr.bf16.mxu1 %v842_v5  ;;  %v282_v19 = vld [vmem:[#allocation2 + $0x10] sm:$0xff] }
  0x14   : > { %v280_v21 = vld [vmem:[#allocation2] sm:$0xff]  ;;  %v281_v30 = vld [vmem:[#allocation2 + $0x8] sm:$0xff] }
  0x15   : > { %785 = vmatpush3.bf16.msra.mxu0 %v841_v4  ;;  %v283_v25 = vld [vmem:[#allocation2 + $0x18] sm:$0x1] }
  0x16   : > { %797 = vmatpush3.bf16.msra.mxu1 %v842_v5  ;;  %786 = vmatprep.subr.bf16.mxu0 %v843_v7 }
  0x17   : > { %798 = vmatprep.subr.bf16.mxu1 %v844_v9 }
  0x19   : > { %787 = vmatpush3.bf16.msra.mxu0 %v843_v7 }
  0x1a   : > { %799 = vmatpush3.bf16.msra.mxu1 %v844_v9  ;;  %804 = vmatprep.subr.bf16.mxu0 %v847_v10 }
  0x1b   : > { %816 = vmatprep.subr.bf16.mxu1 %v849_v11 }
  0x1c   : > { %789 = vmatmul.mubr.msk.bf16.vlgmr.msra.gmra.mxu0 %vm224_vm1, %v846_v12 }
  0x1d   : > { %801 = vmatmul.mubr.msk.bf16.vlgmr.msra.gmra.mxu1 %vm224_vm1, %v846_v12  ;;  %805 = vmatpush3.bf16.msra.mxu0 %v847_v10 }
  0x1e   : > { %806 = vmatprep.subr.bf16.mxu0 %v848_v13  ;;  %817 = vmatpush3.bf16.msra.mxu1 %v849_v11 }
  0x1f   : > { %818 = vmatprep.subr.bf16.mxu1 %v851_v14  ;;  %812 = vmatprep.mubr.msk.bf16.mxu0 %vm224_vm1, %v845_v8 }
  0x20   : > { %824 = vmatprep.mubr.msk.bf16.mxu1 %vm224_vm1, %v845_v8 }
  0x21   : > { %807 = vmatpush3.bf16.msra.mxu0 %v848_v13 }
  0x22   : > { %808 = vmatprep.subr.bf16.mxu0 %v850_v15  ;;  %819 = vmatpush3.bf16.msra.mxu1 %v851_v14 }
  0x23   : > { %820 = vmatprep.subr.bf16.mxu1 %v853_v16 }
  0x25   : > { %809 = vmatpush3.bf16.msra.mxu0 %v850_v15 }
  0x26   : > { %810 = vmatprep.subr.bf16.mxu0 %v852_v17  ;;  %821 = vmatpush3.bf16.msra.mxu1 %v853_v16 }
  0x27   : > { %822 = vmatprep.subr.bf16.mxu1 %v854_v18 }
  0x29   : > { %811 = vmatpush3.bf16.msra.mxu0 %v852_v17 }
  0x2a   : > { %823 = vmatpush3.bf16.msra.mxu1 %v854_v18 }
  0x2c   : > { %813 = vmatmul.mubr.msk.bf16.vlgmr.msra.gmra.mxu0 %vm224_vm1, %v846_v12 }
  0x2d   : > { %825 = vmatmul.mubr.msk.bf16.vlgmr.msra.gmra.mxu1 %vm224_vm1, %v846_v12 }
  0xdc   : > { %v790_v20 = vpop.f32.mrf.mxu0 }
  0xdd   : > { %v286_v22 = vadd.f32 %v790_v20, %v282_v19  ;;  %v802_v23 = vpop.f32.mrf.mxu1 }
  0xde   : > { %v265_v24 = vpop.f32.mrf.mxu0  ;;  %v384_v28 = vrot.slane %v802_v23, 1 }
  0xdf   : > { %290 = vst.msk [vmem:[#allocation2 + $0x10] sm:$0xff] %vm176_vm0, %v286_v22  ;;  %v284_v26 = vadd.f32 %v280_v21, %v265_v24  ;;  %v358_v27 = vpop.f32.mrf.mxu1 }
  0xe0   : > { %v791_v29 = vpop.f32.mrf.mxu0  ;;  %v381_v37 = vrot.slane %v358_v27, 1 }
  0xe1   : > { %288 = vst.msk [vmem:[#allocation2] sm:$0xff] %vm176_vm0, %v284_v26  ;;  %v287_v31 = vadd.f32 %v791_v29, %v283_v25  ;;  %v803_v32 = vpop.f32.mrf.mxu1 }
  0xe2   : > { %v386_v33 = vrot.slane %v803_v32, 1  ;;  %v268_v34 = vpop.f32.mrf.mxu0 }
  0xe3   : > { %291 = vst.msk [vmem:[#allocation2 + $0x18] sm:$0x1] %vm180_vm2, %v287_v31  ;;  %v285_v35 = vadd.f32 %v281_v30, %v268_v34  ;;  %v361_v36 = vpop.f32.mrf.mxu1 }
  0xe4   : > { %v387_v38 = vsel %vm380_vm3, %v384_v28, %v386_v33  ;;  %v382_v39 = vrot.slane %v361_v36, 1 }
  0xe5   : > { %289 = vst.msk [vmem:[#allocation2 + $0x8] sm:$0xff] %vm176_vm0, %v285_v35 }
  0xe6   : > { %v375_v40 = vld [vmem:[#allocation2 + $0x10] sm:$0xff]  ;;  %v383_v44 = vsel %vm380_vm3, %v381_v37, %v382_v39  ;;  %v385_v49 = vsel %vm380_vm3, %v382_v39, %v384_v28 }
  0xe7   : > { %v393_v41 = vadd.f32 %v387_v38, %v375_v40 }
  0xe8   : > { %v373_v43 = vld [vmem:[#allocation2] sm:$0xff] }
  0xe9   : > { %396 = vst.msk [vmem:[#allocation2 + $0x10] sm:$0xff] %vm176_vm0, %v393_v41  ;;  %v391_v45 = vadd.f32 %v383_v44, %v373_v43 }
  0xea   : > { %v612_v46 = vld [vmem:[#allocation2 + $0x18] sm:$0x1] }
  0xeb   : > { %v623_v47 = vadd.f32 %v968_v42, %v612_v46  ;;  %394 = vst.msk [vmem:[#allocation2] sm:$0xff] %vm176_vm0, %v391_v45 }
  0xec   : > { %v374_v48 = vld [vmem:[#allocation2 + $0x8] sm:$0xff]  ;;  %v814_v50 = vpop.f32.mrf.mxu0 }
  0xed   : > { %v627_v51 = vmax.f32 %v623_v47, 0.0  ;;  %v392_v52 = vadd.f32 %v385_v49, %v374_v48  ;;  %v826_v53 = vpop.f32.mrf.mxu1  ;;  %v489_v60 = vrot.slane %v814_v50, 5 }
  0xee   : > { %v463_v55 = vpop.f32.mrf.mxu0  ;;  %v595_v12 = vrot.slane %v826_v53, 6 }
  0xef   : > { %v755_v56 = vpack.c.bf16 %v627_v51, %v627_v51  ;;  %395 = vst.msk [vmem:[#allocation2 + $0x8] sm:$0xff] %vm176_vm0, %v392_v52  ;;  %v569_v58 = vpop.f32.mrf.mxu1  ;;  %v486_v63 = vrot.slane %v463_v55, 5 }
  0xf0   : > { %v815_v57 = vpop.f32.mrf.mxu0  ;;  %v480_v0 = vld [vmem:[#allocation2 + $0x10] sm:$0xf]  ;;  %v592_v14 = vrot.slane %v569_v58, 6 }
  0xf1   : > { %v651_v59 = vsel %vm649_vm5, %v755_v56, %v650_v54  ;;  %v491_v61 = vrot.slane %v815_v57, 5  ;;  %v827_v4 = vpop.f32.mrf.mxu1 }
  0xf2   : > { %652 = vst [vmem:[%s977_s30 + $0xc] sm:$0x1] %v651_v59  ;;  %v466_v62 = vpop.f32.mrf.mxu0  ;;  %v478_v5 = vld [vmem:[#allocation2] sm:$0xff]  ;;  %v597_v13 = vrot.slane %v827_v4, 6 }
  0xf3   : > { %v492_v1 = vsel %vm485_vm6, %v489_v60, %v491_v61  ;;  %v487_v2 = vrot.slane %v466_v62, 5  ;;  %v572_v11 = vpop.f32.mrf.mxu1 }
  0xf4   : > { %v498_v3 = vadd.f32 %v492_v1, %v480_v0  ;;  %v593_v15 = vrot.slane %v572_v11, 6  ;;  %v598_v17 = vsel %vm591_vm8, %v595_v12, %v597_v13 }
  0xf5   : > { %v488_v6 = vsel %vm485_vm6, %v486_v63, %v487_v2  ;;  %v490_v7 = vsel %vm485_vm6, %v487_v2, %v489_v60 }
  0xf6   : > { %502 = vst.msk [vmem:[#allocation2 + $0x10] sm:$0xf] %vm501_vm7, %v498_v3  ;;  %v479_v8 = vld [vmem:[#allocation2 + $0x8] sm:$0xff]  ;;  %v496_v9 = vadd.f32 %v488_v6, %v478_v5  ;;  %v594_v20 = vsel %vm591_vm8, %v592_v14, %v593_v15  ;;  %v596_v22 = vsel %vm591_vm8, %v593_v15, %v595_v12 }
  0xf7   : > { %v497_v10 = vadd.f32 %v490_v7, %v479_v8 }
  0xf8   : > { %499 = vst.msk [vmem:[#allocation2] sm:$0xff] %vm176_vm0, %v496_v9 }
  0xf9   : > { %500 = vst.msk [vmem:[#allocation2 + $0x8] sm:$0xff] %vm176_vm0, %v497_v10 }
  0xfd   : > { %v586_v16 = vld [vmem:[#allocation2 + $0x10] sm:$0x7] }
  0xfe   : > { %v604_v18 = vadd.f32 %v598_v17, %v586_v16 }
  0xff   : > { %v584_v19 = vld [vmem:[#allocation2] sm:$0xff] }
 0x100   : > { %608 = vst.msk [vmem:[#allocation2 + $0x10] sm:$0x7] %vm607_vm9, %v604_v18  ;;  %v585_v21 = vld [vmem:[#allocation2 + $0x8] sm:$0xff]  ;;  %v602_v23 = vadd.f32 %v594_v20, %v584_v19 }
 0x101   : > { %v603_v24 = vadd.f32 %v596_v22, %v585_v21 }
 0x102   : > { %605 = vst.msk [vmem:[#allocation2] sm:$0xff] %vm176_vm0, %v602_v23 }
 0x103   : > { %606 = vst.msk [vmem:[#allocation2 + $0x8] sm:$0xff] %vm176_vm0, %v603_v24 }
 0x107   : > { %v611_v25 = vld [vmem:[#allocation2 + $0x10] sm:$0xff] }
 0x108   : > { %v622_v26 = vadd.f32 %v968_v42, %v611_v25 }
 0x109   : > { %v609_v27 = vld [vmem:[#allocation2] sm:$0xff] }
 0x10a   : > { %v626_v28 = vmax.f32 %v622_v26, 0.0  ;;  %v610_v29 = vld [vmem:[#allocation2 + $0x8] sm:$0xff]  ;;  %v620_v30 = vadd.f32 %v968_v42, %v609_v27 }
 0x10b   : > { %v621_v31 = vadd.f32 %v968_v42, %v610_v29 }
 0x10c   : > { %v754_v32 = vpack.c.bf16 %v626_v28, %v626_v28  ;;  %v624_v33 = vmax.f32 %v620_v30, 0.0 }
 0x10d   : > { %v625_v34 = vmax.f32 %v621_v31, 0.0 }
 0x10e   : > { %646 = vst.msk [vmem:[%s977_s30 + $0x8] sm:$0xf] %vm501_vm7, %v754_v32  ;;  %v752_v35 = vpack.c.bf16 %v624_v33, %v624_v33 }
 0x10f   : > { %v753_v36 = vpack.c.bf16 %v625_v34, %v625_v34 }
 0x110   : > { %644 = vst.msk [vmem:[%s977_s30] sm:$0xf] %vm501_vm7, %v752_v35 }
 0x111   : > { %645 = vst.msk [vmem:[%s977_s30 + $0x4] sm:$0xf] %vm501_vm7, %v753_v36 }
 0x112 PF: > { %s13_s12 = sadd.s32 1, %s861_s12  }
 0x113   : > { %p10_p4 = scmp.ge.s32.totalorder %s13_s12, 4  }
 0x115   :  { %12 = sbr.rel (!%p10_p4) target bundleno = 1 (0x1), region = 62 }

// kernel: encoder_forward_pallas.5
= control target key start
LH: loop header
LB: loop body
LE: loop exit
PB: predicated region body
PF: predicated region fallthrough
CT: control target
= control target key end

     0   :  { %s4192_s21 = smov 0   ;;  %s5115_s0 = inlined_call_operand.vmem [shape: bf16[2,36,32], index: 0, kind: input, shape index: {}]   ;;  %s5116_s1 = inlined_call_operand.vmem [shape: f32[36,1], index: 1, kind: input, shape index: {}]   ;;  %s5117_s2 = inlined_call_operand.vmem [shape: bf16[288,32], index: 2, kind: input, shape index: {}]   ;;  %s5118_s3 = inlined_call_operand.vmem [shape: f32[1,32], index: 3, kind: input, shape index: {}]   ;;  %s5119_s4 = inlined_call_operand.vmem [shape: bf16[288,16], index: 4, kind: input, shape index: {}]   ;;  %s5120_s5 = inlined_call_operand.vmem [shape: bf16[16,32], index: 5, kind: input, shape index: {}]   ;;  %s5121_s6 = inlined_call_operand.vmem [shape: f32[2,36,32], index: 6, kind: output, shape index: {}]  }
   0x1 LB: > { %s3277_s22 = sadd.s32 4294967295, %s4152_s21   ;;  %p3281_p0 = scmp.ge.s32.totalorder %s4152_s21, 1  ;;  %s4152_s21 = sphi %s4192_s21, %s16_s21  }
   0x2   : > { %p212_p1 = scmp.lt.s32.totalorder %s4152_s21, 3 }
   0x4   : > { %p213_p2 = pnand %p3281_p0, %p212_p1 }
   0x5   : > { %p242_p3 = scmp.lt.s32.totalorder (!%p213_p2), %s3277_s22, 1 }
   0x6   : > { %216 = sbr.rel (%p213_p2) target bundleno = 1411 (0x583), region = 44 }
   0xb   : > { %v4081_v0 = vld [vmem:[%s5117_s2 + $0x8] sm:$0xff]   ;;  %v4154_v1 = vmov 0.0   ;;  %v4082_v2 = vld [vmem:[%s5117_s2] sm:$0xff]   ;;  %vm258_vm0 = vcmask 257024   ;;  %vm265_vm1 = vcmask 261120   ;;  %vm4155_vm2 = vmmov 0  }
   0xc   : > { %4062 = vmatprep.subr.bf16.mxu1 %v4154_v1  ;;  %3602 = vmatprep.subr.bf16.mxu0 %v4154_v1  ;;  %266 = vst.msk [vmem:[#allocation3] sm:$0xff] %vm265_vm1, %v4154_v1  ;;  %267 = vst.msk [vmem:[#allocation3 + $0x8] sm:$0xff] %vm265_vm1, %v4154_v1  ;;  %s5123_s22 = smov (!%p242_p3, %s3277_s22), 1  ;;  %vm263_vm3 = vcmask 254976   ;;  %v4156_v3 = vmov 0   ;;  %v4085_v9 = vld [vmem:[%s5117_s2 + $0x18] sm:$0xff]  }
   0xd   : > { %4064 = vmatpush3.bf16.msra.mxu1 %v4081_v0  ;;  %3603 = vmatpush3.bf16.msra.mxu0 %v4081_v0  ;;  %268 = vst.msk [vmem:[#allocation3 + $0x10] sm:$0xff] %vm265_vm1, %v4154_v1  ;;  %269 = vst.msk [vmem:[#allocation3 + $0x18] sm:$0xff] %vm265_vm1, %v4154_v1  ;;  %s4066_s27 = smul.u32 20, %s5123_s22  ;;  %v4088_v10 = vld [vmem:[%s5117_s2 + $0x28] sm:$0xff]   ;;  %v4089_v13 = vld [vmem:[%s5117_s2 + $0x20] sm:$0xff]   ;;  %vm380_vm4 = vcmask 258048  }
   0xe   : > { %4063 = vmatprep.subr.bf16.mxu1 %v4154_v1  ;;  %3604 = vmatprep.subr.bf16.mxu0 %v4154_v1  ;;  %270 = vst.msk [vmem:[#allocation3 + $0x20] sm:$0xf] %vm258_vm0, %v4154_v1  ;;  %v4087_v14 = vld [vmem:[%s5117_s2 + $0x10] sm:$0xff]   ;;  %v1163_v15 = vld [vmem:[%s5116_s1] sm:$0xff]  ;;  %v4091_v17 = vld [vmem:[%s5117_s2 + $0x48] sm:$0xff]   ;;  %vm464_vm5 = vcmask 259072  }
   0xf   : > { %3606 = vmatprep.mubr.msk.bf16.mxu0 %vm4155_vm2, %v4154_v1  ;;  %3610 = vmatprep.mubr.msk.bf16.mxu1 %vm4155_vm2, %v4154_v1  ;;  %s246_s30 = scalar_lea.vmem %s5115_s0, %s4066_s27  ;;  %v1165_v18 = vld [vmem:[%s5116_s1 + $0x10] sm:$0xff]  ;;  %v1164_v19 = vld [vmem:[%s5116_s1 + $0x8] sm:$0xff]  ;;  %v1166_v20 = vld [vmem:[%s5116_s1 + $0x18] sm:$0xff]  ;;  %vm548_vm6 = vcmask 260096   ;;  %vm636_vm7 = vcmask 256000   ;;  %vm807_vm8 = vcmask 1046528  }
  0x10   : > { %4079 = vset.pattern.permute.xlu0 %v4156_v3  ;;  %4080 = vset.pattern.permute.xlu1 %v4156_v3  ;;  %v253_v4 = vld [vmem:[%s246_s30] sm:$0xf]  ;;  %v254_v5 = vld [vmem:[%s246_s30 + $0x4] sm:$0xf]  ;;  %v255_v6 = vld [vmem:[%s246_s30 + $0x8] sm:$0xf] }
  0x11   : > { %4065 = vmatpush3.bf16.msra.mxu1 %v4082_v2  ;;  %3605 = vmatpush3.bf16.msra.mxu0 %v4082_v2  ;;  %259 = vst.msk [vmem:[#allocation2] sm:$0xf] %vm258_vm0, %v253_v4  ;;  %260 = vst.msk [vmem:[#allocation2 + $0x4] sm:$0xf] %vm258_vm0, %v254_v5  ;;  %v256_v7 = vld [vmem:[%s246_s30 + $0xc] sm:$0xf] }
  0x12   : > { %3618 = vmatprep.subr.bf16.mxu1 %v4154_v1  ;;  %3634 = vmatprep.subr.bf16.mxu0 %v4154_v1  ;;  %261 = vst.msk [vmem:[#allocation2 + $0x8] sm:$0xf] %vm258_vm0, %v255_v6  ;;  %v257_v8 = vld [vmem:[%s246_s30 + $0x10] sm:$0x3]  ;;  %262 = vst.msk [vmem:[#allocation2 + $0xc] sm:$0xf] %vm258_vm0, %v256_v7 }
  0x13   : > { %264 = vst.msk [vmem:[#allocation2 + $0x10] sm:$0x3] %vm263_vm3, %v257_v8  ;;  %1170 = vperm.xlu0 %4079, %v1163_v15   ;;  %1180 = vperm.xlu1 %4080, %v1165_v18   ;;  %v1167_v21 = vld [vmem:[%s5116_s1 + $0x20] sm:$0xf]  ;;  %v4090_v23 = vld [vmem:[%s5117_s2 + $0x38] sm:$0xff]   ;;  %v4092_v24 = vld [vmem:[%s5117_s2 + $0x30] sm:$0xff]  }
  0x14   : > { %v4093_v22 = vld [vmem:[%s5117_s2 + $0x40] sm:$0xff]   ;;  %v4095_v25 = vld [vmem:[%s5117_s2 + $0x68] sm:$0xff]   ;;  %v4094_v27 = vld [vmem:[%s5117_s2 + $0x58] sm:$0xff]   ;;  %vm913_vm9 = vcmask 1042432   ;;  %vm1016_vm10 = vcmask 1041408   ;;  %vm1119_vm11 = vcmask 1040384  }
  0x15   : > { %v4097_v26 = vld [vmem:[%s5117_s2 + $0x60] sm:$0xff]   ;;  %v4096_v28 = vld [vmem:[%s5117_s2 + $0x50] sm:$0xff]   ;;  %v4099_v29 = vld [vmem:[%s5117_s2 + $0x88] sm:$0xff]   ;;  %vm1224_vm12 = vcmask 130048   ;;  %vm1229_vm13 = vcmask 125952   ;;  %vm1340_vm14 = vcmask 126976  }
  0x16   : > { %v4101_v30 = vld [vmem:[%s5117_s2 + $0x80] sm:$0xff]   ;;  %v4098_v31 = vld [vmem:[%s5117_s2 + $0x78] sm:$0xff]   ;;  %v4100_v32 = vld [vmem:[%s5117_s2 + $0x70] sm:$0xff]   ;;  %1225 = vst.msk [vmem:[#allocation4] sm:$0xff] %vm1224_vm12, %v4154_v1  ;;  %vm1424_vm15 = vcmask 128000   ;;  %s4067_s19 = smul.u32 40, %s5123_s22 }
  0x17   : > { %1175 = vperm.xlu0 %4079, %v1164_v19   ;;  %1185 = vperm.xlu1 %4080, %v1166_v20   ;;  %v2197_v33 = vld [vmem:[%s5116_s1 + $0x20] sm:$0xf]  ;;  %v371_v35 = vld [vmem:[#allocation3 + $0x17] sm:$0xff]  ;;  %v4104_v40 = vld [vmem:[%s5119_s4 + $0x18] sm:$0xff]   ;;  %1226 = vst.msk [vmem:[#allocation4 + $0x8] sm:$0xff] %vm1224_vm12, %v4154_v1 }
  0x18   : > { %v4243_v11 = vld [vmem:[#allocation2] sm:$0xff]   ;;  %v4102_v39 = vld [vmem:[%s5119_s4 + $0x8] sm:$0xff]   ;;  %v372_v45 = vld [vmem:[#allocation3 + $0x1f] sm:$0x1f]  ;;  %1227 = vst.msk [vmem:[#allocation4 + $0x10] sm:$0xff] %vm1224_vm12, %v4154_v1  ;;  %s251_s24 = scalar_lea.vmem %s5121_s6, %s4067_s19 }
  0x19   : > { %v4245_v12 = vld [vmem:[#allocation2 + $0x8] sm:$0xff]   ;;  %3607 = vmatmul.mubr.msk.bf16.vlgmr.msra.gmra.mxu0 %vm265_vm1, %v4243_v11  ;;  %v369_v34 = vld [vmem:[#allocation3 + $0x7] sm:$0xff]  ;;  %v4105_v50 = vld [vmem:[%s5119_s4 + $0x10] sm:$0xff]   ;;  %1228 = vst.msk [vmem:[#allocation4 + $0x18] sm:$0xff] %vm1224_vm12, %v4154_v1 }
  0x1a   : > { %3611 = vmatmul.mubr.msk.bf16.vlgmr.msra.gmra.mxu1 %vm265_vm1, %v4245_v12  ;;  %3635 = vmatpush3.bf16.msra.mxu0 %v4088_v10  ;;  %v4264_v16 = vld [vmem:[#allocation2 + $0x10] ss:$0 sps:$4 sm:$0x33]   ;;  %v370_v43 = vld [vmem:[#allocation3 + $0xf] sm:$0xff]  ;;  %1230 = vst.msk [vmem:[#allocation4 + $0x20] sm:$0xf] %vm1229_vm13, %v4154_v1 }
  0x1b   : > { %3619 = vmatpush3.bf16.msra.mxu1 %v4085_v9  ;;  %3614 = vmatprep.mubr.msk.bf16.mxu1 %vm4155_vm2, %v4154_v1  ;;  %v4103_v49 = vld [vmem:[%s5119_s4] sm:$0xff]  }
  0x1c   : > { %3620 = vmatprep.subr.bf16.mxu1 %v4154_v1  ;;  %3636 = vmatprep.subr.bf16.mxu0 %v4154_v1 }
  0x1d   : > { %3638 = vmatprep.mubr.msk.bf16.mxu0 %vm4155_vm2, %v4154_v1  ;;  %1190 = vperm.xlu0 %4079, %v1167_v21  }
  0x1e   : > { %3637 = vmatpush3.bf16.msra.mxu0 %v4089_v13  ;;  %2200 = vperm.xlu1 %4080, %v1163_v15  }
  0x1f   : > { %3621 = vmatpush3.bf16.msra.mxu1 %v4087_v14  ;;  %3666 = vmatprep.subr.bf16.mxu0 %v4154_v1 }
  0x20   : > { %3650 = vmatprep.subr.bf16.mxu1 %v4154_v1 }
  0x21   : > { %3639 = vmatmul.mubr.msk.bf16.vlgmr.msra.gmra.mxu0 %vm265_vm1, %v4243_v11  ;;  %2205 = vperm.xlu0 %4079, %v1164_v19  }
  0x22   : > { %3615 = vmatmul.mubr.msk.bf16.gmra.mxu1 %vm265_vm1, %v4264_v16  ;;  %3642 = vmatprep.mubr.msk.bf16.mxu0 %vm4155_vm2, %v4154_v1 }
  0x23   : > { %3622 = vmatprep.mubr.msk.bf16.mxu1 %vm4155_vm2, %v4154_v1  ;;  %3667 = vmatpush3.bf16.msra.mxu0 %v4091_v17 }
  0x24   : > { %3668 = vmatprep.subr.bf16.mxu0 %v4154_v1  ;;  %2210 = vperm.xlu1 %4080, %v1165_v18  }
  0x25   : > { %2215 = vperm.xlu0 %4079, %v1166_v20  }
  0x27   : > { %3669 = vmatpush3.bf16.msra.mxu0 %v4093_v22 }
  0x28   : > { %3698 = vmatprep.subr.bf16.mxu0 %v4154_v1  ;;  %2220 = vperm.xlu1 %4080, %v2197_v33  }
  0x29   : > { %3643 = vmatmul.mubr.msk.bf16.gmra.mxu0 %vm265_vm1, %v4245_v12 }
  0x2a   : > { %3623 = vmatmul.mubr.msk.bf16.vlgmr.msra.gmra.mxu1 %vm265_vm1, %v4243_v11  ;;  %3646 = vmatprep.mubr.msk.bf16.mxu0 %vm4155_vm2, %v4154_v1 }
  0x2b   : > { %3651 = vmatpush3.bf16.msra.mxu1 %v4090_v23  ;;  %3626 = vmatprep.mubr.msk.bf16.mxu1 %vm4155_vm2, %v4154_v1 }
  0x2c   : > { %3652 = vmatprep.subr.bf16.mxu1 %v4154_v1 }
  0x2f   : > { %3653 = vmatpush3.bf16.msra.mxu1 %v4092_v24 }
  0x30   : > { %3682 = vmatprep.subr.bf16.mxu1 %v4154_v1 }
  0x31   : > { %3647 = vmatmul.mubr.msk.bf16.gmra.mxu0 %vm265_vm1, %v4264_v16 }
  0x32   : > { %3627 = vmatmul.mubr.msk.bf16.gmra.mxu1 %vm265_vm1, %v4245_v12  ;;  %3670 = vmatprep.mubr.msk.bf16.mxu0 %vm4155_vm2, %v4154_v1 }
  0x33   : > { %3630 = vmatprep.mubr.msk.bf16.mxu1 %vm4155_vm2, %v4154_v1 }
  0x39   : > { %3671 = vmatmul.mubr.msk.bf16.vlgmr.msra.gmra.mxu0 %vm265_vm1, %v4243_v11 }
  0x3a   : > { %3631 = vmatmul.mubr.msk.bf16.gmra.mxu1 %vm265_vm1, %v4264_v16  ;;  %3674 = vmatprep.mubr.msk.bf16.mxu0 %vm4155_vm2, %v4154_v1 }
  0x3b   : > { %3654 = vmatprep.mubr.msk.bf16.mxu1 %vm4155_vm2, %v4154_v1  ;;  %3699 = vmatpush3.bf16.msra.mxu0 %v4095_v25 }
  0x3c   : > { %3700 = vmatprep.subr.bf16.mxu0 %v4154_v1 }
  0x3f   : > { %3701 = vmatpush3.bf16.msra.mxu0 %v4097_v26 }
  0x40   : > { %3730 = vmatprep.subr.bf16.mxu0 %v4154_v1 }
  0x41   : > { %3675 = vmatmul.mubr.msk.bf16.gmra.mxu0 %vm265_vm1, %v4245_v12 }
  0x42   : > { %3655 = vmatmul.mubr.msk.bf16.vlgmr.msra.gmra.mxu1 %vm265_vm1, %v4243_v11  ;;  %3678 = vmatprep.mubr.msk.bf16.mxu0 %vm4155_vm2, %v4154_v1 }
  0x43   : > { %3683 = vmatpush3.bf16.msra.mxu1 %v4094_v27  ;;  %3658 = vmatprep.mubr.msk.bf16.mxu1 %vm4155_vm2, %v4154_v1 }
  0x44   : > { %3684 = vmatprep.subr.bf16.mxu1 %v4154_v1 }
  0x47   : > { %3685 = vmatpush3.bf16.msra.mxu1 %v4096_v28 }
  0x48   : > { %3714 = vmatprep.subr.bf16.mxu1 %v4154_v1 }
  0x49   : > { %3679 = vmatmul.mubr.msk.bf16.gmra.mxu0 %vm265_vm1, %v4264_v16 }
  0x4a   : > { %3659 = vmatmul.mubr.msk.bf16.gmra.mxu1 %vm265_vm1, %v4245_v12  ;;  %3702 = vmatprep.mubr.msk.bf16.mxu0 %vm4155_vm2, %v4154_v1 }
  0x4b   : > { %3662 = vmatprep.mubr.msk.bf16.mxu1 %vm4155_vm2, %v4154_v1 }
  0x51   : > { %3703 = vmatmul.mubr.msk.bf16.vlgmr.msra.gmra.mxu0 %vm265_vm1, %v4243_v11 }
  0x52   : > { %3663 = vmatmul.mubr.msk.bf16.gmra.mxu1 %vm265_vm1, %v4264_v16  ;;  %3706 = vmatprep.mubr.msk.bf16.mxu0 %vm4155_vm2, %v4154_v1 }
  0x53   : > { %3686 = vmatprep.mubr.msk.bf16.mxu1 %vm4155_vm2, %v4154_v1  ;;  %3731 = vmatpush3.bf16.msra.mxu0 %v4099_v29 }
  0x54   : > { %3732 = vmatprep.subr.bf16.mxu0 %v4154_v1 }
  0x57   : > { %3733 = vmatpush3.bf16.msra.mxu0 %v4101_v30 }
  0x58   : > { %3762 = vmatprep.subr.bf16.mxu0 %v4154_v1 }
  0x59   : > { %3707 = vmatmul.mubr.msk.bf16.gmra.mxu0 %vm265_vm1, %v4245_v12 }
  0x5a   : > { %3687 = vmatmul.mubr.msk.bf16.vlgmr.msra.gmra.mxu1 %vm265_vm1, %v4243_v11  ;;  %3710 = vmatprep.mubr.msk.bf16.mxu0 %vm4155_vm2, %v4154_v1 }
  0x5b   : > { %3715 = vmatpush3.bf16.msra.mxu1 %v4098_v31  ;;  %3690 = vmatprep.mubr.msk.bf16.mxu1 %vm4155_vm2, %v4154_v1 }
  0x5c   : > { %3716 = vmatprep.subr.bf16.mxu1 %v4154_v1 }
  0x5f   : > { %3717 = vmatpush3.bf16.msra.mxu1 %v4100_v32 }
  0x60   : > { %3746 = vmatprep.subr.bf16.mxu1 %v4154_v1 }
  0x61   : > { %3711 = vmatmul.mubr.msk.bf16.gmra.mxu0 %vm265_vm1, %v4264_v16 }
  0x62   : > { %3691 = vmatmul.mubr.msk.bf16.gmra.mxu1 %vm265_vm1, %v4245_v12  ;;  %3734 = vmatprep.mubr.msk.bf16.mxu0 %vm4155_vm2, %v4154_v1 }
  0x63   : > { %3694 = vmatprep.mubr.msk.bf16.mxu1 %vm4155_vm2, %v4154_v1 }
  0x69   : > { %3735 = vmatmul.mubr.msk.bf16.vlgmr.msra.gmra.mxu0 %vm265_vm1, %v4243_v11 }
  0x6a   : > { %3695 = vmatmul.mubr.msk.bf16.gmra.mxu1 %vm265_vm1, %v4264_v16  ;;  %3738 = vmatprep.mubr.msk.bf16.mxu0 %vm4155_vm2, %v4154_v1 }
  0x6b   : > { %3718 = vmatprep.mubr.msk.bf16.mxu1 %vm4155_vm2, %v4154_v1  ;;  %3763 = vmatpush3.bf16.msra.mxu0 %v4104_v40 }
  0x6c   : > { %3764 = vmatprep.subr.bf16.mxu0 %v4154_v1 }
  0x6f   : > { %3765 = vmatpush3.bf16.msra.mxu0 %v4105_v50 }
  0x70   : > { %3794 = vmatprep.subr.bf16.mxu0 %v4154_v1 }
  0x71   : > { %3739 = vmatmul.mubr.msk.bf16.gmra.mxu0 %vm265_vm1, %v4245_v12 }
  0x72   : > { %3719 = vmatmul.mubr.msk.bf16.vlgmr.msra.gmra.mxu1 %vm265_vm1, %v4243_v11  ;;  %3742 = vmatprep.mubr.msk.bf16.mxu0 %vm4155_vm2, %v4154_v1 }
  0x73   : > { %3722 = vmatprep.mubr.msk.bf16.mxu1 %vm4155_vm2, %v4154_v1  ;;  %3747 = vmatpush3.bf16.msra.mxu1 %v4102_v39 }
  0x74   : > { %3748 = vmatprep.subr.bf16.mxu1 %v4154_v1 }
  0x77   : > { %3749 = vmatpush3.bf16.msra.mxu1 %v4103_v49 }
  0x78   : > { %3778 = vmatprep.subr.bf16.mxu1 %v4154_v1 }
  0x79   : > { %3743 = vmatmul.mubr.msk.bf16.gmra.mxu0 %vm265_vm1, %v4264_v16 }
  0x7a   : > { %3723 = vmatmul.mubr.msk.bf16.gmra.mxu1 %vm265_vm1, %v4245_v12  ;;  %3766 = vmatprep.mubr.msk.bf16.mxu0 %vm4155_vm2, %v4154_v1 }
  0x7b   : > { %3726 = vmatprep.mubr.msk.bf16.mxu1 %vm4155_vm2, %v4154_v1 }
  0x82   : > { %3727 = vmatmul.mubr.msk.bf16.gmra.mxu1 %vm265_vm1, %v4264_v16 }
  0x83   : > { %3750 = vmatprep.mubr.msk.bf16.mxu1 %vm4155_vm2, %v4154_v1 }
  0xd9   : > { %v348_v36 = vpop.f32.mrf.mxu0 }
  0xda   : > { %v373_v37 = vadd.f32 %v369_v34, %v348_v36  ;;  %v356_v38 = vpop.f32.mrf.mxu1 }
  0xdb   : > { %v375_v41 = vadd.f32 %v371_v35, %v356_v38  ;;  %v3608_v42 = vpop.f32.mrf.mxu0 }
  0xdc   : > { %377 = vst.msk [vmem:[#allocation3 + $0x7] sm:$0xff] %vm265_vm1, %v373_v37  ;;  %v3612_v44 = vpop.f32.mrf.mxu1 }
  0xdd   : > { %379 = vst.msk [vmem:[#allocation3 + $0x17] sm:$0xff] %vm265_vm1, %v375_v41  ;;  %v351_v46 = vpop.f32.mrf.mxu0 }
  0xde   : > { %v374_v47 = vadd.f32 %v370_v43, %v351_v46  ;;  %v359_v48 = vpop.f32.mrf.mxu1 }
  0xdf   : > { %v376_v51 = vadd.f32 %v372_v45, %v359_v48  ;;  %v3609_v52 = vpop.f32.mrf.mxu0 }
  0xe0   : > { %378 = vst.msk [vmem:[#allocation3 + $0xf] sm:$0xff] %vm265_vm1, %v374_v47  ;;  %v3613_v53 = vpop.f32.mrf.mxu1 }
  0xe1   : > { %381 = vst.msk [vmem:[#allocation3 + $0x1f] sm:$0x1f] %vm380_vm4, %v376_v51  ;;  %v516_v54 = vpop.f32.mrf.mxu0 }
  0xe2   : > { %v364_v55 = vpop.f32.mrf.mxu1 }
  0xe3   : > { %v3640_v56 = vpop.f32.mrf.mxu0  ;;  %v453_v62 = vld [vmem:[#allocation3 + $0x6] sm:$0xff] }
  0xe4   : > { %v3616_v57 = vpop.f32.mrf.mxu1 }
  0xe5   : > { %v519_v58 = vpop.f32.mrf.mxu0 }
  0xe6   : > { %v366_v59 = vpop.f32.mrf.mxu1 }
  0xe7   : > { %v3641_v60 = vpop.f32.mrf.mxu0  ;;  %v454_v5 = vld [vmem:[#allocation3 + $0xe] sm:$0xff]  ;;  %v455_v13 = vld [vmem:[#allocation3 + $0x16] sm:$0xff] }
  0xe8   : > { %v3617_v61 = vpop.f32.mrf.mxu1  ;;  %v456_v21 = vld [vmem:[#allocation3 + $0x1e] sm:$0x3f] }
  0xe9   : > { %v524_v63 = vpop.f32.mrf.mxu0 }
  0xea   : > { %v432_v0 = vpop.f32.mrf.mxu1 }
  0xeb   : > { %v457_v2 = vadd.f32 %v453_v62, %v432_v0  ;;  %v3644_v3 = vpop.f32.mrf.mxu0 }
  0xec   : > { %v3624_v4 = vpop.f32.mrf.mxu1 }
  0xed   : > { %461 = vst.msk [vmem:[#allocation3 + $0x6] sm:$0xff] %vm265_vm1, %v457_v2  ;;  %v527_v6 = vpop.f32.mrf.mxu0 }
  0xee   : > { %v435_v7 = vpop.f32.mrf.mxu1 }
  0xef   : > { %v458_v8 = vadd.f32 %v454_v5, %v435_v7  ;;  %v3645_v9 = vpop.f32.mrf.mxu0 }
  0xf0   : > { %v3625_v10 = vpop.f32.mrf.mxu1 }
  0xf1   : > { %462 = vst.msk [vmem:[#allocation3 + $0xe] sm:$0xff] %vm265_vm1, %v458_v8  ;;  %v532_v11 = vpop.f32.mrf.mxu0 }
  0xf2   : > { %v440_v12 = vpop.f32.mrf.mxu1 }
  0xf3   : > { %v459_v14 = vadd.f32 %v455_v13, %v440_v12  ;;  %v3648_v15 = vpop.f32.mrf.mxu0 }
  0xf4   : > { %v537_v16 = vld [vmem:[#allocation3 + $0x5] sm:$0xff]  ;;  %v3628_v17 = vpop.f32.mrf.mxu1 }
  0xf5   : > { %v541_v18 = vadd.f32 %v537_v16, %v516_v54  ;;  %463 = vst.msk [vmem:[#allocation3 + $0x16] sm:$0xff] %vm265_vm1, %v459_v14  ;;  %v534_v19 = vpop.f32.mrf.mxu0 }
  0xf6   : > { %v443_v20 = vpop.f32.mrf.mxu1 }
  0xf7   : > { %545 = vst.msk [vmem:[#allocation3 + $0x5] sm:$0xff] %vm265_vm1, %v541_v18  ;;  %v460_v22 = vadd.f32 %v456_v21, %v443_v20  ;;  %v3649_v23 = vpop.f32.mrf.mxu0 }
  0xf8   : > { %v538_v24 = vld [vmem:[#allocation3 + $0xd] sm:$0xff]  ;;  %v3629_v25 = vpop.f32.mrf.mxu1 }
  0xf9   : > { %v542_v26 = vadd.f32 %v538_v24, %v519_v58  ;;  %465 = vst.msk [vmem:[#allocation3 + $0x1e] sm:$0x3f] %vm464_vm5, %v460_v22  ;;  %v688_v27 = vpop.f32.mrf.mxu0 }
  0xfa   : > { %v448_v28 = vpop.f32.mrf.mxu1 }
  0xfb   : > { %546 = vst.msk [vmem:[#allocation3 + $0xd] sm:$0xff] %vm265_vm1, %v542_v26  ;;  %v3672_v29 = vpop.f32.mrf.mxu0 }
  0xfc   : > { %v539_v30 = vld [vmem:[#allocation3 + $0x15] sm:$0xff]  ;;  %v3632_v31 = vpop.f32.mrf.mxu1 }
  0xfd   : > { %v543_v32 = vadd.f32 %v539_v30, %v524_v63  ;;  %v691_v33 = vpop.f32.mrf.mxu0 }
  0xfe   : > { %v450_v34 = vpop.f32.mrf.mxu1  ;;  %v622_v41 = vld [vmem:[#allocation3 + $0x1] sm:$0xff] }
  0xff   : > { %547 = vst.msk [vmem:[#allocation3 + $0x15] sm:$0xff] %vm265_vm1, %v543_v32  ;;  %v3673_v35 = vpop.f32.mrf.mxu0 }
 0x100   : > { %v540_v36 = vld [vmem:[#allocation3 + $0x1d] sm:$0x7f]  ;;  %v3633_v37 = vpop.f32.mrf.mxu1 }
 0x101   : > { %v544_v38 = vadd.f32 %v540_v36, %v527_v6  ;;  %v696_v39 = vpop.f32.mrf.mxu0 }
 0x102   : > { %v600_v40 = vpop.f32.mrf.mxu1  ;;  %v623_v47 = vld [vmem:[#allocation3 + $0x9] sm:$0xff] }
 0x103   : > { %549 = vst.msk [vmem:[#allocation3 + $0x1d] sm:$0x7f] %vm548_vm6, %v544_v38  ;;  %v627_v42 = vadd.f32 %v622_v41, %v600_v40  ;;  %v3676_v43 = vpop.f32.mrf.mxu0 }
 0x104   : > { %v3656_v44 = vpop.f32.mrf.mxu1 }
 0x105   : > { %632 = vst.msk [vmem:[#allocation3 + $0x1] sm:$0xff] %vm265_vm1, %v627_v42  ;;  %v699_v45 = vpop.f32.mrf.mxu0 }
 0x106   : > { %v603_v46 = vpop.f32.mrf.mxu1  ;;  %v624_v53 = vld [vmem:[#allocation3 + $0x11] sm:$0xff] }
 0x107   : > { %v628_v48 = vadd.f32 %v623_v47, %v603_v46  ;;  %v3677_v49 = vpop.f32.mrf.mxu0 }
 0x108   : > { %v3657_v50 = vpop.f32.mrf.mxu1 }
 0x109   : > { %633 = vst.msk [vmem:[#allocation3 + $0x9] sm:$0xff] %vm265_vm1, %v628_v48  ;;  %v704_v51 = vpop.f32.mrf.mxu0 }
 0x10a   : > { %v608_v52 = vpop.f32.mrf.mxu1  ;;  %v625_v61 = vld [vmem:[#allocation3 + $0x19] sm:$0xff]  ;;  %v626_v6 = vld [vmem:[#allocation3 + $0x21] sm:$0x7] }
 0x10b   : > { %v629_v54 = vadd.f32 %v624_v53, %v608_v52  ;;  %v3680_v55 = vpop.f32.mrf.mxu0 }
 0x10c   : > { %v710_v56 = vld [vmem:[#allocation3] sm:$0xff]  ;;  %v3660_v57 = vpop.f32.mrf.mxu1 }
 0x10d   : > { %v715_v58 = vadd.f32 %v710_v56, %v688_v27  ;;  %634 = vst.msk [vmem:[#allocation3 + $0x11] sm:$0xff] %vm265_vm1, %v629_v54  ;;  %v707_v59 = vpop.f32.mrf.mxu0 }
 0x10e   : > { %v611_v60 = vpop.f32.mrf.mxu1 }
 0x10f   : > { %720 = vst.msk [vmem:[#allocation3] sm:$0xff] %vm265_vm1, %v715_v58  ;;  %v630_v62 = vadd.f32 %v625_v61, %v611_v60  ;;  %v3681_v63 = vpop.f32.mrf.mxu0  ;;  %v4490_v61 = vpop.permute.xlu0 %1170 }
 0x110   : > { %v711_v0 = vld [vmem:[#allocation3 + $0x8] sm:$0xff]  ;;  %v3661_v2 = vpop.f32.mrf.mxu1 }
 0x111   : > { %v716_v3 = vadd.f32 %v711_v0, %v691_v33  ;;  %635 = vst.msk [vmem:[#allocation3 + $0x19] sm:$0xff] %vm265_vm1, %v630_v62  ;;  %v882_v4 = vpop.f32.mrf.mxu0 }
 0x112   : > { %v616_v5 = vpop.f32.mrf.mxu1  ;;  %v914_v43 = vrot.slane %v882_v4, 5 }
 0x113   : > { %721 = vst.msk [vmem:[#allocation3 + $0x8] sm:$0xff] %vm265_vm1, %v716_v3  ;;  %v631_v7 = vadd.f32 %v626_v6, %v616_v5  ;;  %v3704_v8 = vpop.f32.mrf.mxu0 }
 0x114   : > { %v712_v9 = vld [vmem:[#allocation3 + $0x10] sm:$0xff]  ;;  %v3664_v10 = vpop.f32.mrf.mxu1 }
 0x115   : > { %v717_v11 = vadd.f32 %v712_v9, %v696_v39  ;;  %637 = vst.msk [vmem:[#allocation3 + $0x21] sm:$0x7] %vm636_vm7, %v631_v7  ;;  %v4468_v12 = vpop.f32.mrf.mxu0 }
 0x116   : > { %v619_v13 = vpop.f32.mrf.mxu1  ;;  %v797_v30 = vld [vmem:[#allocation3] sm:$0xff]  ;;  %v915_v44 = vrot.slane %v4468_v12, 5 }
 0x117   : > { %722 = vst.msk [vmem:[#allocation3 + $0x10] sm:$0xff] %vm265_vm1, %v717_v11  ;;  %v3705_v14 = vpop.f32.mrf.mxu0  ;;  %v4503_v13 = vpop.permute.xlu0 %1175 }
 0x118   : > { %v713_v15 = vld [vmem:[#allocation3 + $0x18] sm:$0xff]  ;;  %v3665_v16 = vpop.f32.mrf.mxu1  ;;  %v916_v54 = vsel %vm913_vm9, %v914_v43, %v915_v44 }
 0x119   : > { %v718_v17 = vadd.f32 %v713_v15, %v699_v45  ;;  %v4471_v18 = vpop.f32.mrf.mxu0 }
 0x11a   : > { %v775_v19 = vpop.f32.mrf.mxu1  ;;  %v798_v38 = vld [vmem:[#allocation3 + $0x8] sm:$0xff]  ;;  %v917_v55 = vrot.slane %v4471_v18, 5 }
 0x11b   : > { %723 = vst.msk [vmem:[#allocation3 + $0x18] sm:$0xff] %vm265_vm1, %v718_v17  ;;  %v3708_v20 = vpop.f32.mrf.mxu0  ;;  %v808_v26 = vrot.slane %v775_v19, 1 }
 0x11c   : > { %v714_v21 = vld [vmem:[#allocation3 + $0x20] sm:$0xf]  ;;  %v3688_v22 = vpop.f32.mrf.mxu1  ;;  %v918_v6 = vsel %vm913_vm9, %v915_v44, %v917_v55  ;;  %v4510_v20 = vld [vmem:[%s5118_s3] ss:$0 sm:$0xff] }
 0x11d   : > { %v719_v23 = vadd.f32 %v714_v21, %v704_v51  ;;  %v4474_v24 = vpop.f32.mrf.mxu0 }
 0x11e   : > { %v778_v25 = vpop.f32.mrf.mxu1  ;;  %v799_v48 = vld [vmem:[#allocation3 + $0x10] sm:$0xff]  ;;  %v919_v7 = vrot.slane %v4474_v24, 5 }
 0x11f   : > { %724 = vst.msk [vmem:[#allocation3 + $0x20] sm:$0xf] %vm258_vm0, %v719_v23  ;;  %v809_v27 = vrot.slane %v778_v25, 1  ;;  %v3709_v28 = vpop.f32.mrf.mxu0 }
 0x120   : > { %v3689_v29 = vpop.f32.mrf.mxu1  ;;  %v920_v15 = vsel %vm913_vm9, %v917_v55, %v919_v7 }
 0x121   : > { %v810_v31 = vsel %vm807_vm8, %v808_v26, %v809_v27  ;;  %v4478_v32 = vpop.f32.mrf.mxu0 }
 0x122   : > { %v822_v33 = vadd.f32 %v810_v31, %v797_v30  ;;  %v783_v34 = vpop.f32.mrf.mxu1  ;;  %v800_v62 = vld [vmem:[#allocation3 + $0x18] sm:$0xff]  ;;  %v921_v16 = vrot.slane %v4478_v32, 5  ;;  %v1191_v32 = vpop.permute.xlu0 %1190 }
 0x123   : > { %v811_v35 = vrot.slane %v783_v34, 1  ;;  %v3712_v36 = vpop.f32.mrf.mxu0 }
 0x124   : > { %827 = vst.msk [vmem:[#allocation3] sm:$0xff] %vm265_vm1, %v822_v33  ;;  %v3692_v37 = vpop.f32.mrf.mxu1  ;;  %v922_v25 = vsel %vm913_vm9, %v919_v7, %v921_v16 }
 0x125   : > { %v812_v39 = vsel %vm807_vm8, %v809_v27, %v811_v35  ;;  %v901_v40 = vpop.f32.mrf.mxu0 }
 0x126   : > { %v823_v41 = vadd.f32 %v812_v39, %v798_v38  ;;  %v786_v42 = vpop.f32.mrf.mxu1  ;;  %v801_v59 = vld [vmem:[#allocation3 + $0x20] sm:$0x7] }
 0x127   : > { %v813_v45 = vrot.slane %v786_v42, 1  ;;  %v3713_v46 = vpop.f32.mrf.mxu0 }
 0x128   : > { %828 = vst.msk [vmem:[#allocation3 + $0x8] sm:$0xff] %vm265_vm1, %v823_v41  ;;  %v3693_v47 = vpop.f32.mrf.mxu1 }
 0x129   : > { %v814_v49 = vsel %vm807_vm8, %v811_v35, %v813_v45  ;;  %v4485_v50 = vpop.f32.mrf.mxu0 }
 0x12a   : > { %v824_v51 = vadd.f32 %v814_v49, %v799_v48  ;;  %v791_v52 = vpop.f32.mrf.mxu1  ;;  %v1120_v49 = vrot.slane %v4485_v50, 7 }
 0x12b   : > { %v904_v53 = vld [vmem:[#allocation3] sm:$0xff]  ;;  %v815_v56 = vrot.slane %v791_v52, 1  ;;  %v3736_v57 = vpop.f32.mrf.mxu0 }
 0x12c   : > { %v927_v58 = vadd.f32 %v916_v54, %v904_v53  ;;  %829 = vst.msk [vmem:[#allocation3 + $0x10] sm:$0xff] %vm265_vm1, %v824_v51  ;;  %v3696_v60 = vpop.f32.mrf.mxu1 }
 0x12d   : > { %v816_v63 = vsel %vm807_vm8, %v813_v45, %v815_v56  ;;  %v826_v0 = vadd.f32 %v815_v56, %v801_v59  ;;  %v4493_v2 = vpop.f32.mrf.mxu0 }
 0x12e   : > { %931 = vst.msk [vmem:[#allocation3] sm:$0xff] %vm265_vm1, %v927_v58  ;;  %v825_v3 = vadd.f32 %v816_v63, %v800_v62  ;;  %v794_v4 = vpop.f32.mrf.mxu1  ;;  %v1121_v51 = vrot.slane %v4493_v2, 7 }
 0x12f   : > { %v905_v5 = vld [vmem:[#allocation3 + $0x8] sm:$0xff]  ;;  %831 = vst.msk [vmem:[#allocation3 + $0x20] sm:$0x7] %vm636_vm7, %v826_v0  ;;  %v3737_v8 = vpop.f32.mrf.mxu0 }
 0x130   : > { %v928_v9 = vadd.f32 %v918_v6, %v905_v5  ;;  %830 = vst.msk [vmem:[#allocation3 + $0x18] sm:$0xff] %vm265_vm1, %v825_v3  ;;  %v3697_v10 = vpop.f32.mrf.mxu1  ;;  %v1122_v60 = vsel %vm1119_vm11, %v1120_v49, %v1121_v51  ;;  %v4114_v49 = vld [vmem:[%s5119_s4 + $0x40] sm:$0xff]  }
 0x131   : > { %v4500_v11 = vpop.f32.mrf.mxu0 }
 0x132   : > { %932 = vst.msk [vmem:[#allocation3 + $0x8] sm:$0xff] %vm265_vm1, %v928_v9  ;;  %v985_v12 = vpop.f32.mrf.mxu1  ;;  %v1123_v50 = vrot.slane %v4500_v11, 7 }
 0x133   : > { %v906_v14 = vld [vmem:[#allocation3 + $0x10] sm:$0xff]  ;;  %v3740_v17 = vpop.f32.mrf.mxu0  ;;  %v1017_v26 = vrot.slane %v985_v12, 6 }
 0x134   : > { %v929_v18 = vadd.f32 %v920_v15, %v906_v14  ;;  %v3720_v19 = vpop.f32.mrf.mxu1  ;;  %v1124_v7 = vsel %vm1119_vm11, %v1121_v51, %v1123_v50  ;;  %v4116_v51 = vld [vmem:[%s5119_s4 + $0x50] sm:$0xff]  }
 0x135   : > { %v4512_v21 = vpop.f32.mrf.mxu0  ;;  %v1007_v33 = vld [vmem:[#allocation3] sm:$0xff] }
 0x136   : > { %933 = vst.msk [vmem:[#allocation3 + $0x10] sm:$0xff] %vm265_vm1, %v929_v18  ;;  %v988_v22 = vpop.f32.mrf.mxu1  ;;  %v1145_v23 = vld [vmem:[#allocation3 + $0x20] sm:$0xf]  ;;  %v1125_v8 = vrot.slane %v4512_v21, 7 }
 0x137   : > { %v907_v24 = vld [vmem:[#allocation3 + $0x18] sm:$0x7f]  ;;  %v1018_v27 = vrot.slane %v988_v22, 6  ;;  %v4517_v28 = vadd.f32 %v4510_v20, %v1145_v23  ;;  %v3741_v29 = vpop.f32.mrf.mxu0 }
 0x138   : > { %v930_v30 = vadd.f32 %v922_v25, %v907_v24  ;;  %v3721_v31 = vpop.f32.mrf.mxu1  ;;  %v1126_v12 = vsel %vm1119_vm11, %v1123_v50, %v1125_v8 }
 0x139   : > { %v1019_v34 = vsel %vm1016_vm10, %v1017_v26, %v1018_v27  ;;  %v1162_v35 = vmax.f32 %v4517_v28, 0.0  ;;  %v1104_v36 = vpop.f32.mrf.mxu0  ;;  %v1008_v44 = vld [vmem:[#allocation3 + $0x8] sm:$0xff]  ;;  %v1181_v31 = vpop.permute.xlu1 %1180 }
 0x13a   : > { %934 = vst.msk [vmem:[#allocation3 + $0x18] sm:$0x7f] %vm548_vm6, %v930_v30  ;;  %v1030_v37 = vadd.f32 %v1019_v34, %v1007_v33  ;;  %v993_v38 = vpop.f32.mrf.mxu1  ;;  %v1127_v14 = vrot.slane %v1104_v36, 7 }
 0x13b   : > { %v1197_v39 = vmul.f32 %v1191_v32, %v1162_v35  ;;  %v1020_v40 = vrot.slane %v993_v38, 6  ;;  %v3744_v41 = vpop.f32.mrf.mxu0 }
 0x13c   : > { %1034 = vst.msk [vmem:[#allocation3] sm:$0xff] %vm265_vm1, %v1030_v37  ;;  %v3724_v42 = vpop.f32.mrf.mxu1  ;;  %v1128_v19 = vsel %vm1119_vm11, %v1125_v8, %v1127_v14  ;;  %v4107_v41 = vld [vmem:[%s5119_s4 + $0x28] sm:$0xff]   ;;  %v1331_v8 = vld [vmem:[#allocation4 + $0x17] sm:$0xff] }
 0x13d   : > { %v3453_v43 = vpack.c.bf16 %v1197_v39, %v1197_v39  ;;  %v1021_v45 = vsel %vm1016_vm10, %v1018_v27, %v1020_v40  ;;  %v1107_v46 = vpop.f32.mrf.mxu0  ;;  %v1009_v55 = vld [vmem:[#allocation3 + $0x10] sm:$0xff]  ;;  %v1186_v39 = vpop.permute.xlu1 %1185 }
 0x13e   : > { %v1031_v47 = vadd.f32 %v1021_v45, %v1008_v44  ;;  %v996_v48 = vpop.f32.mrf.mxu1  ;;  %v4112_v44 = vld [vmem:[%s5119_s4 + $0x30] sm:$0xff]  }
 0x13f   : > { %1223 = vst.msk [vmem:[#allocation2 + $0x10] sm:$0x3] %vm263_vm3, %v3453_v43  ;;  %v1022_v52 = vrot.slane %v996_v48, 6  ;;  %v3745_v53 = vpop.f32.mrf.mxu0  ;;  %v4109_v43 = vld [vmem:[%s5119_s4 + $0x20] sm:$0xff]   ;;  %v4115_v48 = vld [vmem:[%s5119_s4 + $0x58] sm:$0xff]  }
 0x140   : > { %1035 = vst.msk [vmem:[#allocation3 + $0x8] sm:$0xff] %vm265_vm1, %v1031_v47  ;;  %v3725_v54 = vpop.f32.mrf.mxu1  ;;  %v4113_v47 = vld [vmem:[%s5119_s4 + $0x48] sm:$0xff]   ;;  %v4119_v53 = vld [vmem:[%s5119_s4 + $0x78] sm:$0xff]  }
 0x141   : > { %v1023_v56 = vsel %vm1016_vm10, %v1020_v40, %v1022_v52  ;;  %v1010_v2 = vld [vmem:[#allocation3 + $0x18] sm:$0x3f]  ;;  %v4118_v54 = vld [vmem:[%s5119_s4 + $0x60] sm:$0xff]  }
 0x142   : > { %v1032_v57 = vadd.f32 %v1023_v56, %v1009_v55  ;;  %v1001_v58 = vpop.f32.mrf.mxu1  ;;  %v4120_v55 = vld [vmem:[%s5119_s4 + $0x70] sm:$0xff]   ;;  %v4121_v56 = vld [vmem:[%s5119_s4 + $0x88] sm:$0xff]  }
 0x143   : > { %v1110_v59 = vld [vmem:[#allocation3] sm:$0xff]  ;;  %v1024_v62 = vrot.slane %v1001_v58, 6  ;;  %v4123_v58 = vld [vmem:[%s5120_s5] sm:$0xff]  }
 0x144   : > { %v1133_v63 = vadd.f32 %v1122_v60, %v1110_v59  ;;  %1036 = vst.msk [vmem:[#allocation3 + $0x10] sm:$0xff] %vm265_vm1, %v1032_v57  ;;  %v3728_v0 = vpop.f32.mrf.mxu1  ;;  %v4122_v57 = vld [vmem:[%s5119_s4 + $0x80] sm:$0xff]  }
 0x145   : > { %v1025_v3 = vsel %vm1016_vm10, %v1022_v52, %v1024_v62  ;;  %v4117_v52 = vld [vmem:[%s5119_s4 + $0x68] sm:$0xff]  }
 0x146   : > { %1137 = vst.msk [vmem:[#allocation3] sm:$0xff] %vm265_vm1, %v1133_v63  ;;  %v1033_v4 = vadd.f32 %v1025_v3, %v1010_v2  ;;  %v1004_v5 = vpop.f32.mrf.mxu1  ;;  %v4608_v46 = vld [vmem:[#allocation2 + $0x10] ss:$0 sps:$4 sm:$0x33]   ;;  %v1329_v59 = vld [vmem:[#allocation4 + $0x7] sm:$0xff] }
 0x147   : > { %v1111_v6 = vld [vmem:[#allocation3 + $0x8] sm:$0xff]  ;;  %v1330_v2 = vld [vmem:[#allocation4 + $0xf] sm:$0xff] }
 0x148   : > { %v1134_v9 = vadd.f32 %v1124_v7, %v1111_v6  ;;  %1037 = vst.msk [vmem:[#allocation3 + $0x18] sm:$0x3f] %vm464_vm5, %v1033_v4  ;;  %v3729_v10 = vpop.f32.mrf.mxu1  ;;  %vm1596_vm5 = vcmask 124928  }
 0x14a   : > { %1138 = vst.msk [vmem:[#allocation3 + $0x8] sm:$0xff] %vm265_vm1, %v1134_v9 }
 0x14b   : > { %v1112_v11 = vld [vmem:[#allocation3 + $0x10] sm:$0xff] }
 0x14c   : > { %v1135_v15 = vadd.f32 %v1126_v12, %v1112_v11 }
 0x14d   : > { %v1141_v16 = vld [vmem:[#allocation3] sm:$0xff] }
 0x14e   : > { %v4540_v17 = vadd.f32 %v4510_v20, %v1141_v16  ;;  %1139 = vst.msk [vmem:[#allocation3 + $0x10] sm:$0xff] %vm265_vm1, %v1135_v15  ;;  %v1332_v16 = vld [vmem:[#allocation4 + $0x1f] sm:$0x1f] }
 0x14f   : > { %v1113_v18 = vld [vmem:[#allocation3 + $0x18] sm:$0x1f] }
 0x150   : > { %v1158_v21 = vmax.f32 %v4540_v17, 0.0  ;;  %v1136_v22 = vadd.f32 %v1128_v19, %v1113_v18  ;;  %v4124_v18 = vld [vmem:[%s5119_s4 + $0x8] sm:$0xff]  }
 0x151   : > { %v1142_v23 = vld [vmem:[#allocation3 + $0x8] sm:$0xff] }
 0x152   : > { %v1193_v24 = vmul.f32 %v4490_v61, %v1158_v21  ;;  %v4547_v25 = vadd.f32 %v4510_v20, %v1142_v23  ;;  %1140 = vst.msk [vmem:[#allocation3 + $0x18] sm:$0x1f] %vm380_vm4, %v1136_v22  ;;  %vm1508_vm4 = vcmask 129024  }
 0x154   : > { %v3449_v26 = vpack.c.bf16 %v1193_v24, %v1193_v24  ;;  %v1159_v27 = vmax.f32 %v4547_v25, 0.0 }
 0x155   : > { %v1143_v61 = vld [vmem:[#allocation3 + $0x10] sm:$0xff] }
 0x156   : > { %1219 = vst.msk [vmem:[#allocation2] sm:$0xf] %vm258_vm0, %v3449_v26  ;;  %v1194_v29 = vmul.f32 %v4503_v13, %v1159_v27  ;;  %v4562_v30 = vadd.f32 %v4510_v20, %v1143_v61 }
 0x158   : > { %v3450_v32 = vpack.c.bf16 %v1194_v29, %v1194_v29  ;;  %v1160_v33 = vmax.f32 %v4562_v30, 0.0 }
 0x159   : > { %v1144_v34 = vld [vmem:[#allocation3 + $0x18] sm:$0xff] }
 0x15a   : > { %1220 = vst.msk [vmem:[#allocation2 + $0x4] sm:$0xf] %vm258_vm0, %v3450_v32  ;;  %v1195_v35 = vmul.f32 %v1181_v31, %v1160_v33  ;;  %v4567_v36 = vadd.f32 %v4510_v20, %v1144_v34  ;;  %v4110_v20 = vld [vmem:[%s5119_s4 + $0x38] sm:$0xff]  }
 0x15c   : > { %v3451_v37 = vpack.c.bf16 %v1195_v35, %v1195_v35  ;;  %v1161_v38 = vmax.f32 %v4567_v36, 0.0 }
 0x15e   : > { %1221 = vst.msk [vmem:[#allocation2 + $0x8] sm:$0xf] %vm258_vm0, %v3451_v37  ;;  %v1196_v13 = vmul.f32 %v1186_v39, %v1161_v38 }
 0x160   : > { %v3452_v40 = vpack.c.bf16 %v1196_v13, %v1196_v13 }
 0x161   : > { %v4574_v42 = vld [vmem:[#allocation2] sm:$0xff]  }
 0x162   : > { %1222 = vst.msk [vmem:[#allocation2 + $0xc] sm:$0xf] %vm258_vm0, %v3452_v40  ;;  %3751 = vmatmul.mubr.msk.bf16.vlgmr.msra.gmra.mxu1 %vm265_vm1, %v4574_v42  ;;  %3767 = vmatmul.mubr.msk.bf16.vlgmr.msra.gmra.mxu0 %vm265_vm1, %v4574_v42 }
 0x163   : > { %3779 = vmatpush3.bf16.msra.mxu1 %v4107_v41  ;;  %3754 = vmatprep.mubr.msk.bf16.mxu1 %vm4155_vm2, %v4154_v1 }
 0x164   : > { %3770 = vmatprep.mubr.msk.bf16.mxu0 %vm4155_vm2, %v4154_v1  ;;  %3780 = vmatprep.subr.bf16.mxu1 %v4154_v1 }
 0x165   : > { %3795 = vmatpush3.bf16.msra.mxu0 %v4110_v20 }
 0x166   : > { %3796 = vmatprep.subr.bf16.mxu0 %v4154_v1 }
 0x167   : > { %3781 = vmatpush3.bf16.msra.mxu1 %v4109_v43 }
 0x168   : > { %3810 = vmatprep.subr.bf16.mxu1 %v4154_v1 }
 0x169   : > { %v4596_v45 = vld [vmem:[#allocation2 + $0x8] sm:$0xff]   ;;  %3797 = vmatpush3.bf16.msra.mxu0 %v4112_v44 }
 0x16a   : > { %3755 = vmatmul.mubr.msk.bf16.gmra.mxu1 %vm265_vm1, %v4596_v45  ;;  %3771 = vmatmul.mubr.msk.bf16.gmra.mxu0 %vm265_vm1, %v4596_v45 }
 0x16b   : > { %3758 = vmatprep.mubr.msk.bf16.mxu1 %vm4155_vm2, %v4154_v1  ;;  %3774 = vmatprep.mubr.msk.bf16.mxu0 %vm4155_vm2, %v4154_v1 }
 0x16c   : > { %3826 = vmatprep.subr.bf16.mxu0 %v4154_v1 }
 0x172   : > { %3759 = vmatmul.mubr.msk.bf16.gmra.mxu1 %vm265_vm1, %v4608_v46  ;;  %3775 = vmatmul.mubr.msk.bf16.gmra.mxu0 %vm265_vm1, %v4608_v46 }
 0x173   : > { %3782 = vmatprep.mubr.msk.bf16.mxu1 %vm4155_vm2, %v4154_v1  ;;  %3798 = vmatprep.mubr.msk.bf16.mxu0 %vm4155_vm2, %v4154_v1 }
 0x17a   : > { %3783 = vmatmul.mubr.msk.bf16.vlgmr.msra.gmra.mxu1 %vm265_vm1, %v4574_v42  ;;  %3799 = vmatmul.mubr.msk.bf16.vlgmr.msra.gmra.mxu0 %vm265_vm1, %v4574_v42 }
 0x17b   : > { %3811 = vmatpush3.bf16.msra.mxu1 %v4113_v47  ;;  %3786 = vmatprep.mubr.msk.bf16.mxu1 %vm4155_vm2, %v4154_v1 }
 0x17c   : > { %3802 = vmatprep.mubr.msk.bf16.mxu0 %vm4155_vm2, %v4154_v1  ;;  %3812 = vmatprep.subr.bf16.mxu1 %v4154_v1 }
 0x17d   : > { %3827 = vmatpush3.bf16.msra.mxu0 %v4115_v48 }
 0x17e   : > { %3828 = vmatprep.subr.bf16.mxu0 %v4154_v1 }
 0x17f   : > { %3813 = vmatpush3.bf16.msra.mxu1 %v4114_v49 }
 0x180   : > { %3842 = vmatprep.subr.bf16.mxu1 %v4154_v1 }
 0x181   : > { %3829 = vmatpush3.bf16.msra.mxu0 %v4116_v51 }
 0x182   : > { %3787 = vmatmul.mubr.msk.bf16.gmra.mxu1 %vm265_vm1, %v4596_v45  ;;  %3803 = vmatmul.mubr.msk.bf16.gmra.mxu0 %vm265_vm1, %v4596_v45 }
 0x183   : > { %3790 = vmatprep.mubr.msk.bf16.mxu1 %vm4155_vm2, %v4154_v1  ;;  %3806 = vmatprep.mubr.msk.bf16.mxu0 %vm4155_vm2, %v4154_v1 }
 0x184   : > { %3858 = vmatprep.subr.bf16.mxu0 %v4154_v1 }
 0x18a   : > { %3791 = vmatmul.mubr.msk.bf16.gmra.mxu1 %vm265_vm1, %v4608_v46  ;;  %3807 = vmatmul.mubr.msk.bf16.gmra.mxu0 %vm265_vm1, %v4608_v46 }
 0x18b   : > { %3814 = vmatprep.mubr.msk.bf16.mxu1 %vm4155_vm2, %v4154_v1  ;;  %3830 = vmatprep.mubr.msk.bf16.mxu0 %vm4155_vm2, %v4154_v1 }
 0x192   : > { %3815 = vmatmul.mubr.msk.bf16.vlgmr.msra.gmra.mxu1 %vm265_vm1, %v4574_v42  ;;  %3831 = vmatmul.mubr.msk.bf16.vlgmr.msra.gmra.mxu0 %vm265_vm1, %v4574_v42 }
 0x193   : > { %3843 = vmatpush3.bf16.msra.mxu1 %v4117_v52  ;;  %3818 = vmatprep.mubr.msk.bf16.mxu1 %vm4155_vm2, %v4154_v1 }
 0x194   : > { %3834 = vmatprep.mubr.msk.bf16.mxu0 %vm4155_vm2, %v4154_v1  ;;  %3844 = vmatprep.subr.bf16.mxu1 %v4154_v1 }
 0x195   : > { %3859 = vmatpush3.bf16.msra.mxu0 %v4119_v53 }
 0x196   : > { %3860 = vmatprep.subr.bf16.mxu0 %v4154_v1 }
 0x197   : > { %3845 = vmatpush3.bf16.msra.mxu1 %v4118_v54 }
 0x198   : > { %3874 = vmatprep.subr.bf16.mxu1 %v4154_v1 }
 0x199   : > { %3861 = vmatpush3.bf16.msra.mxu0 %v4120_v55 }
 0x19a   : > { %3819 = vmatmul.mubr.msk.bf16.gmra.mxu1 %vm265_vm1, %v4596_v45  ;;  %3835 = vmatmul.mubr.msk.bf16.gmra.mxu0 %vm265_vm1, %v4596_v45 }
 0x19b   : > { %3822 = vmatprep.mubr.msk.bf16.mxu1 %vm4155_vm2, %v4154_v1  ;;  %3838 = vmatprep.mubr.msk.bf16.mxu0 %vm4155_vm2, %v4154_v1 }
 0x19c   : > { %3890 = vmatprep.subr.bf16.mxu0 %v4154_v1 }
 0x1a2   : > { %3823 = vmatmul.mubr.msk.bf16.gmra.mxu1 %vm265_vm1, %v4608_v46  ;;  %3839 = vmatmul.mubr.msk.bf16.gmra.mxu0 %vm265_vm1, %v4608_v46 }
 0x1a3   : > { %3846 = vmatprep.mubr.msk.bf16.mxu1 %vm4155_vm2, %v4154_v1  ;;  %3862 = vmatprep.mubr.msk.bf16.mxu0 %vm4155_vm2, %v4154_v1 }
 0x1aa   : > { %3847 = vmatmul.mubr.msk.bf16.vlgmr.msra.gmra.mxu1 %vm265_vm1, %v4574_v42  ;;  %3863 = vmatmul.mubr.msk.bf16.vlgmr.msra.gmra.mxu0 %vm265_vm1, %v4574_v42 }
 0x1ab   : > { %3875 = vmatpush3.bf16.msra.mxu1 %v4121_v56  ;;  %3850 = vmatprep.mubr.msk.bf16.mxu1 %vm4155_vm2, %v4154_v1 }
 0x1ac   : > { %3866 = vmatprep.mubr.msk.bf16.mxu0 %vm4155_vm2, %v4154_v1  ;;  %3876 = vmatprep.subr.bf16.mxu1 %v4154_v1 }
 0x1ad   : > { %3891 = vmatpush3.bf16.msra.mxu0 %v4123_v58 }
 0x1ae   : > { %3920 = vmatprep.subr.bf16.mxu0 %v4154_v1 }
 0x1af   : > { %3877 = vmatpush3.bf16.msra.mxu1 %v4122_v57 }
 0x1b0   : > { %3904 = vmatprep.subr.bf16.mxu1 %v4154_v1 }
 0x1b2   : > { %3851 = vmatmul.mubr.msk.bf16.gmra.mxu1 %vm265_vm1, %v4596_v45  ;;  %3867 = vmatmul.mubr.msk.bf16.gmra.mxu0 %vm265_vm1, %v4596_v45 }
 0x1b3   : > { %3854 = vmatprep.mubr.msk.bf16.mxu1 %vm4155_vm2, %v4154_v1  ;;  %3870 = vmatprep.mubr.msk.bf16.mxu0 %vm4155_vm2, %v4154_v1 }
 0x1ba   : > { %3855 = vmatmul.mubr.msk.bf16.gmra.mxu1 %vm265_vm1, %v4608_v46  ;;  %3871 = vmatmul.mubr.msk.bf16.gmra.mxu0 %vm265_vm1, %v4608_v46 }
 0x1bb   : > { %3878 = vmatprep.mubr.msk.bf16.mxu1 %vm4155_vm2, %v4154_v1  ;;  %3892 = vmatprep.mubr.msk.bf16.mxu0 %vm4155_vm2, %v4154_v1 }
 0x1c2   : > { %3879 = vmatmul.mubr.msk.bf16.vlgmr.msra.gmra.mxu1 %vm265_vm1, %v4574_v42 }
 0x1c3   : > { %3882 = vmatprep.mubr.msk.bf16.mxu1 %vm4155_vm2, %v4154_v1  ;;  %3905 = vmatpush3.bf16.msra.mxu1 %v4124_v18 }
 0x1c4   : > { %3906 = vmatprep.subr.bf16.mxu1 %v4154_v1 }
 0x1ca   : > { %3883 = vmatmul.mubr.msk.bf16.gmra.mxu1 %vm265_vm1, %v4596_v45 }
 0x1cb   : > { %3886 = vmatprep.mubr.msk.bf16.mxu1 %vm4155_vm2, %v4154_v1 }
 0x1d2   : > { %3887 = vmatmul.mubr.msk.bf16.gmra.mxu1 %vm265_vm1, %v4608_v46 }
 0x1d3   : > { %3908 = vmatprep.mubr.msk.bf16.mxu1 %vm4155_vm2, %v4154_v1 }
 0x222   : > { %v1308_v60 = vpop.f32.mrf.mxu1  ;;  %v1392_v50 = vpop.f32.mrf.mxu0 }
 0x223   : > { %v1333_v62 = vadd.f32 %v1329_v59, %v1308_v60 }
 0x224   : > { %v3752_v63 = vpop.f32.mrf.mxu1  ;;  %v3768_v0 = vpop.f32.mrf.mxu0 }
 0x225   : > { %1337 = vst.msk [vmem:[#allocation4 + $0x7] sm:$0xff] %vm1224_vm12, %v1333_v62 }
 0x226   : > { %v1311_v3 = vpop.f32.mrf.mxu1  ;;  %v1395_v4 = vpop.f32.mrf.mxu0 }
 0x227   : > { %v1334_v5 = vadd.f32 %v1330_v2, %v1311_v3 }
 0x228   : > { %v3753_v6 = vpop.f32.mrf.mxu1  ;;  %v3769_v7 = vpop.f32.mrf.mxu0 }
 0x229   : > { %1338 = vst.msk [vmem:[#allocation4 + $0xf] sm:$0xff] %vm1224_vm12, %v1334_v5 }
 0x22a   : > { %v1316_v9 = vpop.f32.mrf.mxu1  ;;  %v1400_v10 = vpop.f32.mrf.mxu0 }
 0x22b   : > { %v1335_v11 = vadd.f32 %v1331_v8, %v1316_v9 }
 0x22c   : > { %v1413_v12 = vld [vmem:[#allocation4 + $0x6] sm:$0xff]  ;;  %v3756_v14 = vpop.f32.mrf.mxu1  ;;  %v3772_v15 = vpop.f32.mrf.mxu0 }
 0x22d   : > { %v1417_v19 = vadd.f32 %v1413_v12, %v1392_v50  ;;  %1339 = vst.msk [vmem:[#allocation4 + $0x17] sm:$0xff] %vm1224_vm12, %v1335_v11 }
 0x22e   : > { %v1319_v21 = vpop.f32.mrf.mxu1  ;;  %v1403_v22 = vpop.f32.mrf.mxu0 }
 0x22f   : > { %1421 = vst.msk [vmem:[#allocation4 + $0x6] sm:$0xff] %vm1224_vm12, %v1417_v19  ;;  %v1336_v23 = vadd.f32 %v1332_v16, %v1319_v21 }
 0x230   : > { %v1414_v24 = vld [vmem:[#allocation4 + $0xe] sm:$0xff]  ;;  %v3757_v26 = vpop.f32.mrf.mxu1  ;;  %v3773_v27 = vpop.f32.mrf.mxu0 }
 0x231   : > { %v1418_v61 = vadd.f32 %v1414_v24, %v1395_v4  ;;  %1341 = vst.msk [vmem:[#allocation4 + $0x1f] sm:$0x1f] %vm1340_vm14, %v1336_v23 }
 0x232   : > { %v1324_v29 = vpop.f32.mrf.mxu1  ;;  %v1408_v31 = vpop.f32.mrf.mxu0 }
 0x233   : > { %1422 = vst.msk [vmem:[#allocation4 + $0xe] sm:$0xff] %vm1224_vm12, %v1418_v61 }
 0x234   : > { %v1415_v32 = vld [vmem:[#allocation4 + $0x16] sm:$0xff]  ;;  %v3760_v33 = vpop.f32.mrf.mxu1  ;;  %v3776_v34 = vpop.f32.mrf.mxu0 }
 0x235   : > { %v1419_v35 = vadd.f32 %v1415_v32, %v1400_v10 }
 0x236   : > { %v1326_v37 = vpop.f32.mrf.mxu1  ;;  %v1410_v38 = vpop.f32.mrf.mxu0  ;;  %v1497_v20 = vld [vmem:[#allocation4 + $0x5] sm:$0xff] }
 0x237   : > { %1423 = vst.msk [vmem:[#allocation4 + $0x16] sm:$0xff] %vm1224_vm12, %v1419_v35 }
 0x238   : > { %v1416_v39 = vld [vmem:[#allocation4 + $0x1e] sm:$0x3f]  ;;  %v3761_v13 = vpop.f32.mrf.mxu1  ;;  %v3777_v40 = vpop.f32.mrf.mxu0 }
 0x239   : > { %v1420_v41 = vadd.f32 %v1416_v39, %v1403_v22 }
 0x23a   : > { %v1476_v42 = vpop.f32.mrf.mxu1  ;;  %v1560_v43 = vpop.f32.mrf.mxu0  ;;  %v1498_v48 = vld [vmem:[#allocation4 + $0xd] sm:$0xff] }
 0x23b   : > { %1425 = vst.msk [vmem:[#allocation4 + $0x1e] sm:$0x3f] %vm1424_vm15, %v1420_v41  ;;  %v1501_v44 = vadd.f32 %v1497_v20, %v1476_v42 }
 0x23c   : > { %v3784_v45 = vpop.f32.mrf.mxu1  ;;  %v3800_v46 = vpop.f32.mrf.mxu0 }
 0x23d   : > { %1505 = vst.msk [vmem:[#allocation4 + $0x5] sm:$0xff] %vm1224_vm12, %v1501_v44 }
 0x23e   : > { %v1479_v47 = vpop.f32.mrf.mxu1  ;;  %v1563_v49 = vpop.f32.mrf.mxu0  ;;  %v1499_v55 = vld [vmem:[#allocation4 + $0x15] sm:$0xff] }
 0x23f   : > { %v1502_v51 = vadd.f32 %v1498_v48, %v1479_v47 }
 0x240   : > { %v3785_v52 = vpop.f32.mrf.mxu1  ;;  %v3801_v53 = vpop.f32.mrf.mxu0 }
 0x241   : > { %1506 = vst.msk [vmem:[#allocation4 + $0xd] sm:$0xff] %vm1224_vm12, %v1502_v51 }
 0x242   : > { %v1484_v54 = vpop.f32.mrf.mxu1  ;;  %v1568_v56 = vpop.f32.mrf.mxu0  ;;  %v1500_v62 = vld [vmem:[#allocation4 + $0x1d] sm:$0x7f] }
 0x243   : > { %v1503_v57 = vadd.f32 %v1499_v55, %v1484_v54 }
 0x244   : > { %v1582_v58 = vld [vmem:[#allocation4 + $0x1] sm:$0xff]  ;;  %v3788_v59 = vpop.f32.mrf.mxu1  ;;  %v3804_v60 = vpop.f32.mrf.mxu0 }
 0x245   : > { %v1587_v50 = vadd.f32 %v1582_v58, %v1560_v43  ;;  %1507 = vst.msk [vmem:[#allocation4 + $0x15] sm:$0xff] %vm1224_vm12, %v1503_v57 }
 0x246   : > { %v1487_v63 = vpop.f32.mrf.mxu1  ;;  %v1571_v0 = vpop.f32.mrf.mxu0 }
 0x247   : > { %1592 = vst.msk [vmem:[#allocation4 + $0x1] sm:$0xff] %vm1224_vm12, %v1587_v50  ;;  %v1504_v2 = vadd.f32 %v1500_v62, %v1487_v63 }
 0x248   : > { %v1583_v3 = vld [vmem:[#allocation4 + $0x9] sm:$0xff]  ;;  %v3789_v4 = vpop.f32.mrf.mxu1  ;;  %v3805_v5 = vpop.f32.mrf.mxu0 }
 0x249   : > { %v1588_v6 = vadd.f32 %v1583_v3, %v1563_v49  ;;  %1509 = vst.msk [vmem:[#allocation4 + $0x1d] sm:$0x7f] %vm1508_vm4, %v1504_v2 }
 0x24a   : > { %v1492_v7 = vpop.f32.mrf.mxu1  ;;  %v1576_v8 = vpop.f32.mrf.mxu0 }
 0x24b   : > { %1593 = vst.msk [vmem:[#allocation4 + $0x9] sm:$0xff] %vm1224_vm12, %v1588_v6 }
 0x24c   : > { %v1584_v9 = vld [vmem:[#allocation4 + $0x11] sm:$0xff]  ;;  %v3792_v10 = vpop.f32.mrf.mxu1  ;;  %v3808_v11 = vpop.f32.mrf.mxu0 }
 0x24d   : > { %v1589_v12 = vadd.f32 %v1584_v9, %v1568_v56 }
 0x24e   : > { %v1494_v14 = vpop.f32.mrf.mxu1  ;;  %v1579_v15 = vpop.f32.mrf.mxu0  ;;  %v1670_v26 = vld [vmem:[#allocation4] sm:$0xff] }
 0x24f   : > { %1594 = vst.msk [vmem:[#allocation4 + $0x11] sm:$0xff] %vm1224_vm12, %v1589_v12 }
 0x250   : > { %v1585_v16 = vld [vmem:[#allocation4 + $0x19] sm:$0xff]  ;;  %v1586_v18 = vld [vmem:[#allocation4 + $0x21] sm:$0x7]  ;;  %v3793_v19 = vpop.f32.mrf.mxu1  ;;  %v3809_v21 = vpop.f32.mrf.mxu0 }
 0x251   : > { %v1590_v22 = vadd.f32 %v1585_v16, %v1571_v0  ;;  %v1591_v23 = vadd.f32 %v1586_v18, %v1576_v8 }
 0x252   : > { %v1648_v24 = vpop.f32.mrf.mxu1  ;;  %v1735_v27 = vpop.f32.mrf.mxu0  ;;  %v1671_v33 = vld [vmem:[#allocation4 + $0x8] sm:$0xff] }
 0x253   : > { %1595 = vst.msk [vmem:[#allocation4 + $0x19] sm:$0xff] %vm1224_vm12, %v1590_v22  ;;  %v1675_v61 = vadd.f32 %v1670_v26, %v1648_v24  ;;  %v1767_v13 = vrot.slane %v1735_v27, 1 }
 0x254   : > { %1597 = vst.msk [vmem:[#allocation4 + $0x21] sm:$0x7] %vm1596_vm5, %v1591_v23  ;;  %v3816_v29 = vpop.f32.mrf.mxu1  ;;  %v3832_v31 = vpop.f32.mrf.mxu0 }
 0x255   : > { %1680 = vst.msk [vmem:[#allocation4] sm:$0xff] %vm1224_vm12, %v1675_v61 }
 0x256   : > { %v1651_v32 = vpop.f32.mrf.mxu1  ;;  %v1738_v34 = vpop.f32.mrf.mxu0  ;;  %v1672_v41 = vld [vmem:[#allocation4 + $0x10] sm:$0xff] }
 0x257   : > { %v1676_v35 = vadd.f32 %v1671_v33, %v1651_v32  ;;  %v1768_v37 = vrot.slane %v1738_v34, 1 }
 0x258   : > { %v3817_v38 = vpop.f32.mrf.mxu1  ;;  %v3833_v39 = vpop.f32.mrf.mxu0 }
 0x259   : > { %1681 = vst.msk [vmem:[#allocation4 + $0x8] sm:$0xff] %vm1224_vm12, %v1676_v35  ;;  %v1769_v44 = vsel %vm807_vm8, %v1767_v13, %v1768_v37 }
 0x25a   : > { %v1656_v40 = vpop.f32.mrf.mxu1  ;;  %v1743_v42 = vpop.f32.mrf.mxu0  ;;  %v1673_v51 = vld [vmem:[#allocation4 + $0x18] sm:$0xff] }
 0x25b   : > { %v1677_v20 = vadd.f32 %v1672_v41, %v1656_v40  ;;  %v1770_v45 = vrot.slane %v1743_v42, 1  ;;  %v1674_v50 = vld [vmem:[#allocation4 + $0x20] sm:$0xf] }
 0x25c   : > { %v1757_v43 = vld [vmem:[#allocation4] sm:$0xff]  ;;  %v3820_v46 = vpop.f32.mrf.mxu1  ;;  %v3836_v47 = vpop.f32.mrf.mxu0 }
 0x25d   : > { %v1781_v48 = vadd.f32 %v1769_v44, %v1757_v43  ;;  %1682 = vst.msk [vmem:[#allocation4 + $0x10] sm:$0xff] %vm1224_vm12, %v1677_v20  ;;  %v1771_v55 = vsel %vm807_vm8, %v1768_v37, %v1770_v45 }
 0x25e   : > { %v1659_v49 = vpop.f32.mrf.mxu1  ;;  %v1746_v52 = vpop.f32.mrf.mxu0 }
 0x25f   : > { %1786 = vst.msk [vmem:[#allocation4] sm:$0xff] %vm1224_vm12, %v1781_v48  ;;  %v1678_v53 = vadd.f32 %v1673_v51, %v1659_v49  ;;  %v1772_v56 = vrot.slane %v1746_v52, 1 }
 0x260   : > { %v1758_v54 = vld [vmem:[#allocation4 + $0x8] sm:$0xff]  ;;  %v3821_v57 = vpop.f32.mrf.mxu1  ;;  %v3837_v58 = vpop.f32.mrf.mxu0 }
 0x261   : > { %v1782_v59 = vadd.f32 %v1771_v55, %v1758_v54  ;;  %1683 = vst.msk [vmem:[#allocation4 + $0x18] sm:$0xff] %vm1224_vm12, %v1678_v53  ;;  %v1773_v2 = vsel %vm807_vm8, %v1770_v45, %v1772_v56 }
 0x262   : > { %v1664_v60 = vpop.f32.mrf.mxu1  ;;  %v1751_v62 = vpop.f32.mrf.mxu0 }
 0x263   : > { %1787 = vst.msk [vmem:[#allocation4 + $0x8] sm:$0xff] %vm1224_vm12, %v1782_v59  ;;  %v1679_v63 = vadd.f32 %v1674_v50, %v1664_v60  ;;  %v1774_v3 = vrot.slane %v1751_v62, 1 }
 0x264   : > { %v1759_v0 = vld [vmem:[#allocation4 + $0x10] sm:$0xff]  ;;  %v3824_v4 = vpop.f32.mrf.mxu1  ;;  %v3840_v5 = vpop.f32.mrf.mxu0 }
 0x265   : > { %v1783_v6 = vadd.f32 %v1773_v2, %v1759_v0  ;;  %1684 = vst.msk [vmem:[#allocation4 + $0x20] sm:$0xf] %vm1229_vm13, %v1679_v63  ;;  %v1775_v10 = vsel %vm807_vm8, %v1772_v56, %v1774_v3 }
 0x266   : > { %v1667_v7 = vpop.f32.mrf.mxu1  ;;  %v1754_v8 = vpop.f32.mrf.mxu0  ;;  %v1863_v31 = vld [vmem:[#allocation4] sm:$0xff] }
 0x267   : > { %1788 = vst.msk [vmem:[#allocation4 + $0x10] sm:$0xff] %vm1224_vm12, %v1783_v6 }
 0x268   : > { %v1760_v9 = vld [vmem:[#allocation4 + $0x18] sm:$0xff]  ;;  %v3825_v11 = vpop.f32.mrf.mxu1  ;;  %v3841_v12 = vpop.f32.mrf.mxu0 }
 0x269   : > { %v1784_v14 = vadd.f32 %v1775_v10, %v1760_v9 }
 0x26a   : > { %v1841_v15 = vpop.f32.mrf.mxu1  ;;  %v1943_v16 = vpop.f32.mrf.mxu0  ;;  %v1864_v13 = vld [vmem:[#allocation4 + $0x8] sm:$0xff] }
 0x26b   : > { %1789 = vst.msk [vmem:[#allocation4 + $0x18] sm:$0xff] %vm1224_vm12, %v1784_v14  ;;  %v1872_v26 = vrot.slane %v1841_v15, 5  ;;  %v1974_v48 = vrot.slane %v1943_v16, 6 }
 0x26c   : > { %v1761_v18 = vld [vmem:[#allocation4 + $0x20] sm:$0x7]  ;;  %v3848_v19 = vpop.f32.mrf.mxu1  ;;  %v3864_v21 = vpop.f32.mrf.mxu0 }
 0x26d   : > { %v1785_v22 = vadd.f32 %v1774_v3, %v1761_v18 }
 0x26e   : > { %v1844_v23 = vpop.f32.mrf.mxu1  ;;  %v1946_v24 = vpop.f32.mrf.mxu0  ;;  %v1865_v49 = vld [vmem:[#allocation4 + $0x10] sm:$0xff] }
 0x26f   : > { %1790 = vst.msk [vmem:[#allocation4 + $0x20] sm:$0x7] %vm1596_vm5, %v1785_v22  ;;  %v1873_v27 = vrot.slane %v1844_v23, 5  ;;  %v1975_v44 = vrot.slane %v1946_v24, 6 }
 0x270   : > { %v3849_v61 = vpop.f32.mrf.mxu1  ;;  %v3865_v29 = vpop.f32.mrf.mxu0 }
 0x271   : > { %v1874_v32 = vsel %vm913_vm9, %v1872_v26, %v1873_v27  ;;  %v1976_v56 = vsel %vm1016_vm10, %v1974_v48, %v1975_v44 }
 0x272   : > { %v1885_v33 = vadd.f32 %v1874_v32, %v1863_v31  ;;  %v1849_v34 = vpop.f32.mrf.mxu1  ;;  %v1951_v35 = vpop.f32.mrf.mxu0  ;;  %v1866_v62 = vld [vmem:[#allocation4 + $0x18] sm:$0x7f] }
 0x273   : > { %v1875_v37 = vrot.slane %v1849_v34, 5  ;;  %v1977_v57 = vrot.slane %v1951_v35, 6 }
 0x274   : > { %1889 = vst.msk [vmem:[#allocation4] sm:$0xff] %vm1224_vm12, %v1885_v33  ;;  %v3852_v38 = vpop.f32.mrf.mxu1  ;;  %v3868_v39 = vpop.f32.mrf.mxu0 }
 0x275   : > { %v1876_v40 = vsel %vm913_vm9, %v1873_v27, %v1875_v37  ;;  %v1978_v5 = vsel %vm1016_vm10, %v1975_v44, %v1977_v57 }
 0x276   : > { %v4786_v41 = vld [vmem:[#allocation4 + $0x20] sm:$0xf]  ;;  %v1886_v42 = vadd.f32 %v1876_v40, %v1864_v13  ;;  %v1852_v20 = vpop.f32.mrf.mxu1  ;;  %v1954_v43 = vpop.f32.mrf.mxu0 }
 0x277   : > { %2258 = vst.msk [vmem:[#allocation4 + $0x20] sm:$0xf] %vm1229_vm13, %v4154_v1  ;;  %v1877_v45 = vrot.slane %v1852_v20, 5  ;;  %v1979_v6 = vrot.slane %v1954_v43, 6 }
 0x278   : > { %1890 = vst.msk [vmem:[#allocation4 + $0x8] sm:$0xff] %vm1224_vm12, %v1886_v42  ;;  %v3853_v46 = vpop.f32.mrf.mxu1  ;;  %v3869_v47 = vpop.f32.mrf.mxu0 }
 0x279   : > { %v1878_v51 = vsel %vm913_vm9, %v1875_v37, %v1877_v45  ;;  %v1980_v12 = vsel %vm1016_vm10, %v1977_v57, %v1979_v6 }
 0x27a   : > { %v1887_v52 = vadd.f32 %v1878_v51, %v1865_v49  ;;  %v1857_v53 = vpop.f32.mrf.mxu1  ;;  %v1959_v54 = vpop.f32.mrf.mxu0 }
 0x27b   : > { %v1965_v55 = vld [vmem:[#allocation4] sm:$0xff]  ;;  %v1879_v58 = vrot.slane %v1857_v53, 5  ;;  %v1981_v14 = vrot.slane %v1959_v54, 6 }
 0x27c   : > { %v1987_v59 = vadd.f32 %v1976_v56, %v1965_v55  ;;  %1891 = vst.msk [vmem:[#allocation4 + $0x10] sm:$0xff] %vm1224_vm12, %v1887_v52  ;;  %v3856_v60 = vpop.f32.mrf.mxu1  ;;  %v3872_v50 = vpop.f32.mrf.mxu0 }
 0x27d   : > { %v1880_v63 = vsel %vm913_vm9, %v1877_v45, %v1879_v58  ;;  %v1982_v21 = vsel %vm1016_vm10, %v1979_v6, %v1981_v14 }
 0x27e   : > { %1991 = vst.msk [vmem:[#allocation4] sm:$0xff] %vm1224_vm12, %v1987_v59  ;;  %v1888_v0 = vadd.f32 %v1880_v63, %v1866_v62  ;;  %v1860_v2 = vpop.f32.mrf.mxu1  ;;  %v1962_v3 = vpop.f32.mrf.mxu0  ;;  %v2106_v62 = vmax.f32 %v4786_v41, 0.0  ;;  %v4127_v41 = vld [vmem:[%s5119_s4 + $0x10] sm:$0xff]  }
 0x27f   : > { %v1966_v4 = vld [vmem:[#allocation4 + $0x8] sm:$0xff] }
 0x280   : > { %v1988_v7 = vadd.f32 %v1978_v5, %v1966_v4  ;;  %1892 = vst.msk [vmem:[#allocation4 + $0x18] sm:$0x7f] %vm1508_vm4, %v1888_v0  ;;  %v3857_v8 = vpop.f32.mrf.mxu1  ;;  %v3873_v9 = vpop.f32.mrf.mxu0  ;;  %v2109_v63 = vpack.c.bf16 %v2106_v62, %v2106_v62  ;;  %v4126_v0 = vld [vmem:[%s5119_s4 + $0x18] sm:$0xff]   ;;  %v4125_v2 = vld [vmem:[%s5119_s4] sm:$0xff]  }
 0x281   : > { %3907 = vmatpush3.bf16.msra.mxu1 %v4125_v2 }
 0x282   : > { %1992 = vst.msk [vmem:[#allocation4 + $0x8] sm:$0xff] %vm1224_vm12, %v1988_v7  ;;  %v2045_v10 = vpop.f32.mrf.mxu1  ;;  %3936 = vmatprep.subr.bf16.mxu1 %v4154_v1  ;;  %v2201_v7 = vpop.permute.xlu1 %2200 }
 0x283   : > { %v1967_v11 = vld [vmem:[#allocation4 + $0x10] sm:$0xff]  ;;  %v2076_v22 = vrot.slane %v2045_v10, 7 }
 0x284   : > { %v1989_v15 = vadd.f32 %v1980_v12, %v1967_v11  ;;  %v3880_v16 = vpop.f32.mrf.mxu1 }
 0x285   : > { %v2067_v27 = vld [vmem:[#allocation4] sm:$0xff] }
 0x286   : > { %1993 = vst.msk [vmem:[#allocation4 + $0x10] sm:$0xff] %vm1224_vm12, %v1989_v15  ;;  %v2048_v18 = vpop.f32.mrf.mxu1  ;;  %v2206_v15 = vpop.permute.xlu0 %2205 }
 0x287   : > { %v1968_v19 = vld [vmem:[#allocation4 + $0x18] sm:$0x3f]  ;;  %v2077_v23 = vrot.slane %v2048_v18, 7 }
 0x288   : > { %v1990_v24 = vadd.f32 %v1982_v21, %v1968_v19  ;;  %v3881_v26 = vpop.f32.mrf.mxu1 }
 0x289   : > { %v2078_v61 = vsel %vm1119_vm11, %v2076_v22, %v2077_v23  ;;  %v2068_v34 = vld [vmem:[#allocation4 + $0x8] sm:$0xff] }
 0x28a   : > { %1994 = vst.msk [vmem:[#allocation4 + $0x18] sm:$0x3f] %vm1424_vm15, %v1990_v24  ;;  %v2089_v29 = vadd.f32 %v2078_v61, %v2067_v27  ;;  %v2053_v31 = vpop.f32.mrf.mxu1 }
 0x28b   : > { %v2079_v32 = vrot.slane %v2053_v31, 7  ;;  %v2216_v31 = vpop.permute.xlu0 %2215 }
 0x28c   : > { %2093 = vst.msk [vmem:[#allocation4] sm:$0xff] %vm1224_vm12, %v2089_v29  ;;  %v3884_v33 = vpop.f32.mrf.mxu1 }
 0x28d   : > { %v2080_v35 = vsel %vm1119_vm11, %v2077_v23, %v2079_v32  ;;  %v2069_v40 = vld [vmem:[#allocation4 + $0x10] sm:$0xff]  ;;  %v2211_v23 = vpop.permute.xlu1 %2210 }
 0x28e   : > { %v2090_v37 = vadd.f32 %v2080_v35, %v2068_v34  ;;  %v2056_v38 = vpop.f32.mrf.mxu1 }
 0x28f   : > { %v2081_v39 = vrot.slane %v2056_v38, 7 }
 0x290   : > { %2094 = vst.msk [vmem:[#allocation4 + $0x8] sm:$0xff] %vm1224_vm12, %v2090_v37  ;;  %v3885_v13 = vpop.f32.mrf.mxu1 }
 0x291   : > { %v2082_v42 = vsel %vm1119_vm11, %v2079_v32, %v2081_v39  ;;  %v2070_v47 = vld [vmem:[#allocation4 + $0x18] sm:$0x1f]  ;;  %v2221_v38 = vpop.permute.xlu1 %2220 }
 0x292   : > { %v2091_v20 = vadd.f32 %v2082_v42, %v2069_v40  ;;  %v2061_v43 = vpop.f32.mrf.mxu1 }
 0x293   : > { %v2097_v44 = vld [vmem:[#allocation4] sm:$0xff]  ;;  %v2083_v45 = vrot.slane %v2061_v43, 7 }
 0x294   : > { %2254 = vst.msk [vmem:[#allocation4] sm:$0xff] %vm1224_vm12, %v4154_v1  ;;  %2095 = vst.msk [vmem:[#allocation4 + $0x10] sm:$0xff] %vm1224_vm12, %v2091_v20  ;;  %v3888_v46 = vpop.f32.mrf.mxu1  ;;  %v2102_v54 = vmax.f32 %v2097_v44, 0.0  ;;  %v4131_v43 = vld [vmem:[%s5119_s4 + $0x20] sm:$0xff]   ;;  %v4134_v44 = vld [vmem:[%s5119_s4 + $0x30] sm:$0xff]  }
 0x295   : > { %v2084_v48 = vsel %vm1119_vm11, %v2081_v39, %v2083_v45 }
 0x296   : > { %v2092_v49 = vadd.f32 %v2084_v48, %v2070_v47  ;;  %v2064_v51 = vpop.f32.mrf.mxu1  ;;  %v4135_v47 = vld [vmem:[%s5119_s4 + $0x48] sm:$0xff]   ;;  %v4137_v48 = vld [vmem:[%s5119_s4 + $0x58] sm:$0xff]  }
 0x297   : > { %v2098_v52 = vld [vmem:[#allocation4 + $0x8] sm:$0xff]  ;;  %v4138_v51 = vld [vmem:[%s5119_s4 + $0x50] sm:$0xff]  }
 0x298   : > { %2255 = vst.msk [vmem:[#allocation4 + $0x8] sm:$0xff] %vm1224_vm12, %v4154_v1  ;;  %v3889_v53 = vpop.f32.mrf.mxu1  ;;  %v2103_v55 = vmax.f32 %v2098_v52, 0.0  ;;  %v4139_v52 = vld [vmem:[%s5119_s4 + $0x68] sm:$0xff]  }
 0x299   : > { %2096 = vst.msk [vmem:[#allocation4 + $0x18] sm:$0x1f] %vm1340_vm14, %v2092_v49  ;;  %v4136_v49 = vld [vmem:[%s5119_s4 + $0x40] sm:$0xff]   ;;  %v4141_v53 = vld [vmem:[%s5119_s4 + $0x78] sm:$0xff]  }
 0x29a   : > { %v2107_v56 = vpack.c.bf16 %v2103_v55, %v2102_v54  ;;  %v4140_v54 = vld [vmem:[%s5119_s4 + $0x60] sm:$0xff]   ;;  %v4142_v55 = vld [vmem:[%s5119_s4 + $0x70] sm:$0xff]  }
 0x29b   : > { %v2099_v57 = vld [vmem:[#allocation4 + $0x10] sm:$0xff] }
 0x29c   : > { %3893 = vmatmul.mubr.msk.bf16.vlgmr.msra.gmra.mxu0 %vm1224_vm12, %v2107_v56  ;;  %2256 = vst.msk [vmem:[#allocation4 + $0x10] sm:$0xff] %vm1224_vm12, %v4154_v1  ;;  %v2104_v59 = vmax.f32 %v2099_v57, 0.0  ;;  %v4143_v56 = vld [vmem:[%s5119_s4 + $0x88] sm:$0xff]   ;;  %v4144_v57 = vld [vmem:[%s5119_s4 + $0x80] sm:$0xff]  }
 0x29d   : > { %3896 = vmatprep.mubr.msk.bf16.mxu0 %vm4155_vm2, %v4154_v1  ;;  %3921 = vmatpush3.bf16.msra.mxu0 %v4126_v0 }
 0x29e   : > { %3922 = vmatprep.subr.bf16.mxu0 %v4154_v1 }
 0x2a0   : > { %v2100_v58 = vld [vmem:[#allocation4 + $0x18] sm:$0xff] }
 0x2a1   : > { %v2105_v60 = vmax.f32 %v2100_v58, 0.0  ;;  %2257 = vst.msk [vmem:[#allocation4 + $0x18] sm:$0xff] %vm1224_vm12, %v4154_v1  ;;  %3923 = vmatpush3.bf16.msra.mxu0 %v4127_v41  ;;  %v4145_v58 = vld [vmem:[%s5120_s5] sm:$0xff]  }
 0x2a2   : > { %3952 = vmatprep.subr.bf16.mxu0 %v4154_v1 }
 0x2a3   : > { %v2108_v50 = vpack.c.bf16 %v2105_v60, %v2104_v59  ;;  %v2357_v59 = vld [vmem:[#allocation4 + $0x7] sm:$0xff]  ;;  %v2358_v2 = vld [vmem:[#allocation4 + $0xf] sm:$0xff] }
 0x2a5   : > { %3897 = vmatmul.mubr.msk.bf16.gmra.mxu0 %vm1224_vm12, %v2108_v50 }
 0x2a6   : > { %3900 = vmatprep.mubr.msk.bf16.mxu0 %vm4155_vm2, %v4154_v1 }
 0x2ad   : > { %3901 = vmatmul.mubr.msk.bf16.gmra.mxu0 %vm1224_vm12, %v2109_v63 }
 0x2ae   : > { %3924 = vmatprep.mubr.msk.bf16.mxu0 %vm4155_vm2, %v4154_v1 }
 0x35c   : > { %v2161_v3 = vpop.f32.mrf.mxu0 }
 0x35d   : > { %v4842_v4 = vadd.f32 %v2161_v3, %v4540_v17 }
 0x35e   : > { %v3894_v5 = vpop.f32.mrf.mxu0 }
 0x35f   : > { %v2188_v6 = vmax.f32 %v4842_v4, 0.0 }
 0x360   : > { %v2164_v8 = vpop.f32.mrf.mxu0 }
 0x361   : > { %v2223_v9 = vmul.f32 %v2201_v7, %v2188_v6  ;;  %v4846_v10 = vadd.f32 %v2164_v8, %v4547_v25  ;;  %v2359_v8 = vld [vmem:[#allocation4 + $0x17] sm:$0xff] }
 0x362   : > { %v3895_v11 = vpop.f32.mrf.mxu0 }
 0x363   : > { %v3454_v12 = vpack.c.bf16 %v2223_v9, %v2223_v9  ;;  %v2189_v14 = vmax.f32 %v4846_v10, 0.0 }
 0x365   : > { %v2169_v16 = vpop.f32.mrf.mxu0  ;;  %2249 = vst.msk [vmem:[#allocation2] sm:$0xf] %vm258_vm0, %v3454_v12  ;;  %v2224_v18 = vmul.f32 %v2206_v15, %v2189_v14 }
 0x366   : > { %v4851_v17 = vadd.f32 %v2169_v16, %v4562_v30 }
 0x367   : > { %v3898_v19 = vpop.f32.mrf.mxu0  ;;  %v3455_v21 = vpack.c.bf16 %v2224_v18, %v2224_v18  ;;  %v2360_v18 = vld [vmem:[#allocation4 + $0x1f] sm:$0x1f] }
 0x368   : > { %v2190_v22 = vmax.f32 %v4851_v17, 0.0 }
 0x369   : > { %v2172_v24 = vpop.f32.mrf.mxu0  ;;  %2250 = vst.msk [vmem:[#allocation2 + $0x4] sm:$0xf] %vm258_vm0, %v3455_v21 }
 0x36a   : > { %v2225_v25 = vmul.f32 %v2211_v23, %v2190_v22  ;;  %v4856_v26 = vadd.f32 %v2172_v24, %v4567_v36  ;;  %v4129_v36 = vld [vmem:[%s5119_s4 + $0x28] sm:$0xff]  }
 0x36b   : > { %v3899_v27 = vpop.f32.mrf.mxu0 }
 0x36c   : > { %v3456_v61 = vpack.c.bf16 %v2225_v25, %v2225_v25  ;;  %v2191_v29 = vmax.f32 %v4856_v26, 0.0 }
 0x36d   : > { %v2177_v32 = vpop.f32.mrf.mxu0 }
 0x36e   : > { %2251 = vst.msk [vmem:[#allocation2 + $0x8] sm:$0xf] %vm258_vm0, %v3456_v61  ;;  %v2226_v30 = vmul.f32 %v2216_v31, %v2191_v29  ;;  %v4861_v33 = vadd.f32 %v2177_v32, %v4517_v28  ;;  %v4132_v28 = vld [vmem:[%s5119_s4 + $0x38] sm:$0xff]  }
 0x36f   : > { %v3902_v34 = vpop.f32.mrf.mxu0 }
 0x370   : > { %v3457_v35 = vpack.c.bf16 %v2226_v30, %v2226_v30  ;;  %v2192_v37 = vmax.f32 %v4861_v33, 0.0  ;;  %v4867_v13 = vld [vmem:[#allocation2] sm:$0xff]  }
 0x371   : > { %v2180_v39 = vpop.f32.mrf.mxu0  ;;  %3909 = vmatmul.mubr.msk.bf16.vlgmr.msra.gmra.mxu1 %vm265_vm1, %v4867_v13  ;;  %3925 = vmatmul.mubr.msk.bf16.vlgmr.msra.gmra.mxu0 %vm265_vm1, %v4867_v13 }
 0x372   : > { %2252 = vst.msk [vmem:[#allocation2 + $0xc] sm:$0xf] %vm258_vm0, %v3457_v35  ;;  %v2227_v40 = vmul.f32 %v2221_v38, %v2192_v37  ;;  %3937 = vmatpush3.bf16.msra.mxu1 %v4129_v36  ;;  %3912 = vmatprep.mubr.msk.bf16.mxu1 %vm4155_vm2, %v4154_v1 }
 0x373   : > { %v3903_v42 = vpop.f32.mrf.mxu0  ;;  %3928 = vmatprep.mubr.msk.bf16.mxu0 %vm4155_vm2, %v4154_v1  ;;  %3938 = vmatprep.subr.bf16.mxu1 %v4154_v1 }
 0x374   : > { %v3458_v20 = vpack.c.bf16 %v2227_v40, %v2227_v40  ;;  %3953 = vmatpush3.bf16.msra.mxu0 %v4132_v28 }
 0x375   : > { %3954 = vmatprep.subr.bf16.mxu0 %v4154_v1 }
 0x376   : > { %2253 = vst.msk [vmem:[#allocation2 + $0x10] sm:$0x3] %vm263_vm3, %v3458_v20  ;;  %3939 = vmatpush3.bf16.msra.mxu1 %v4131_v43 }
 0x377   : > { %3968 = vmatprep.subr.bf16.mxu1 %v4154_v1 }
 0x378   : > { %3955 = vmatpush3.bf16.msra.mxu0 %v4134_v44 }
 0x379   : > { %v4890_v45 = vld [vmem:[#allocation2 + $0x8] sm:$0xff]   ;;  %3984 = vmatprep.subr.bf16.mxu0 %v4154_v1 }
 0x37a   : > { %3913 = vmatmul.mubr.msk.bf16.gmra.mxu1 %vm265_vm1, %v4890_v45  ;;  %3929 = vmatmul.mubr.msk.bf16.gmra.mxu0 %vm265_vm1, %v4890_v45 }
 0x37b   : > { %3916 = vmatprep.mubr.msk.bf16.mxu1 %vm4155_vm2, %v4154_v1  ;;  %3932 = vmatprep.mubr.msk.bf16.mxu0 %vm4155_vm2, %v4154_v1 }
 0x37d   : > { %v4902_v46 = vld [vmem:[#allocation2 + $0x10] ss:$0 sps:$4 sm:$0x33]  }
 0x382   : > { %3917 = vmatmul.mubr.msk.bf16.gmra.mxu1 %vm265_vm1, %v4902_v46  ;;  %3933 = vmatmul.mubr.msk.bf16.gmra.mxu0 %vm265_vm1, %v4902_v46 }
 0x383   : > { %3940 = vmatprep.mubr.msk.bf16.mxu1 %vm4155_vm2, %v4154_v1  ;;  %3956 = vmatprep.mubr.msk.bf16.mxu0 %vm4155_vm2, %v4154_v1 }
 0x38a   : > { %3941 = vmatmul.mubr.msk.bf16.vlgmr.msra.gmra.mxu1 %vm265_vm1, %v4867_v13  ;;  %3957 = vmatmul.mubr.msk.bf16.vlgmr.msra.gmra.mxu0 %vm265_vm1, %v4867_v13 }
 0x38b   : > { %3969 = vmatpush3.bf16.msra.mxu1 %v4135_v47  ;;  %3944 = vmatprep.mubr.msk.bf16.mxu1 %vm4155_vm2, %v4154_v1 }
 0x38c   : > { %3960 = vmatprep.mubr.msk.bf16.mxu0 %vm4155_vm2, %v4154_v1  ;;  %3970 = vmatprep.subr.bf16.mxu1 %v4154_v1 }
 0x38d   : > { %3985 = vmatpush3.bf16.msra.mxu0 %v4137_v48 }
 0x38e   : > { %3986 = vmatprep.subr.bf16.mxu0 %v4154_v1 }
 0x38f   : > { %3971 = vmatpush3.bf16.msra.mxu1 %v4136_v49 }
 0x390   : > { %4000 = vmatprep.subr.bf16.mxu1 %v4154_v1 }
 0x391   : > { %3987 = vmatpush3.bf16.msra.mxu0 %v4138_v51 }
 0x392   : > { %3945 = vmatmul.mubr.msk.bf16.gmra.mxu1 %vm265_vm1, %v4890_v45  ;;  %3961 = vmatmul.mubr.msk.bf16.gmra.mxu0 %vm265_vm1, %v4890_v45 }
 0x393   : > { %3948 = vmatprep.mubr.msk.bf16.mxu1 %vm4155_vm2, %v4154_v1  ;;  %3964 = vmatprep.mubr.msk.bf16.mxu0 %vm4155_vm2, %v4154_v1 }
 0x394   : > { %4016 = vmatprep.subr.bf16.mxu0 %v4154_v1 }
 0x39a   : > { %3949 = vmatmul.mubr.msk.bf16.gmra.mxu1 %vm265_vm1, %v4902_v46  ;;  %3965 = vmatmul.mubr.msk.bf16.gmra.mxu0 %vm265_vm1, %v4902_v46 }
 0x39b   : > { %3972 = vmatprep.mubr.msk.bf16.mxu1 %vm4155_vm2, %v4154_v1  ;;  %3988 = vmatprep.mubr.msk.bf16.mxu0 %vm4155_vm2, %v4154_v1 }
 0x3a2   : > { %3973 = vmatmul.mubr.msk.bf16.vlgmr.msra.gmra.mxu1 %vm265_vm1, %v4867_v13  ;;  %3989 = vmatmul.mubr.msk.bf16.vlgmr.msra.gmra.mxu0 %vm265_vm1, %v4867_v13 }
 0x3a3   : > { %4001 = vmatpush3.bf16.msra.mxu1 %v4139_v52  ;;  %3976 = vmatprep.mubr.msk.bf16.mxu1 %vm4155_vm2, %v4154_v1 }
 0x3a4   : > { %3992 = vmatprep.mubr.msk.bf16.mxu0 %vm4155_vm2, %v4154_v1  ;;  %4002 = vmatprep.subr.bf16.mxu1 %v4154_v1 }
 0x3a5   : > { %4017 = vmatpush3.bf16.msra.mxu0 %v4141_v53 }
 0x3a6   : > { %4018 = vmatprep.subr.bf16.mxu0 %v4154_v1 }
 0x3a7   : > { %4003 = vmatpush3.bf16.msra.mxu1 %v4140_v54 }
 0x3a8   : > { %4032 = vmatprep.subr.bf16.mxu1 %v4154_v1 }
 0x3a9   : > { %4019 = vmatpush3.bf16.msra.mxu0 %v4142_v55 }
 0x3aa   : > { %3977 = vmatmul.mubr.msk.bf16.gmra.mxu1 %vm265_vm1, %v4890_v45  ;;  %3993 = vmatmul.mubr.msk.bf16.gmra.mxu0 %vm265_vm1, %v4890_v45 }
 0x3ab   : > { %3980 = vmatprep.mubr.msk.bf16.mxu1 %vm4155_vm2, %v4154_v1  ;;  %3996 = vmatprep.mubr.msk.bf16.mxu0 %vm4155_vm2, %v4154_v1 }
 0x3ac   : > { %4048 = vmatprep.subr.bf16.mxu0 %v4154_v1 }
 0x3b2   : > { %3981 = vmatmul.mubr.msk.bf16.gmra.mxu1 %vm265_vm1, %v4902_v46  ;;  %3997 = vmatmul.mubr.msk.bf16.gmra.mxu0 %vm265_vm1, %v4902_v46 }
 0x3b3   : > { %4004 = vmatprep.mubr.msk.bf16.mxu1 %vm4155_vm2, %v4154_v1  ;;  %4020 = vmatprep.mubr.msk.bf16.mxu0 %vm4155_vm2, %v4154_v1 }
 0x3ba   : > { %4005 = vmatmul.mubr.msk.bf16.vlgmr.msra.gmra.mxu1 %vm265_vm1, %v4867_v13  ;;  %4021 = vmatmul.mubr.msk.bf16.vlgmr.msra.gmra.mxu0 %vm265_vm1, %v4867_v13 }
 0x3bb   : > { %4033 = vmatpush3.bf16.msra.mxu1 %v4143_v56  ;;  %4008 = vmatprep.mubr.msk.bf16.mxu1 %vm4155_vm2, %v4154_v1 }
 0x3bc   : > { %4024 = vmatprep.mubr.msk.bf16.mxu0 %vm4155_vm2, %v4154_v1  ;;  %4034 = vmatprep.subr.bf16.mxu1 %v4154_v1 }
 0x3bd   : > { %4049 = vmatpush3.bf16.msra.mxu0 %v4145_v58 }
 0x3bf   : > { %4035 = vmatpush3.bf16.msra.mxu1 %v4144_v57 }
 0x3c2   : > { %4009 = vmatmul.mubr.msk.bf16.gmra.mxu1 %vm265_vm1, %v4890_v45  ;;  %4025 = vmatmul.mubr.msk.bf16.gmra.mxu0 %vm265_vm1, %v4890_v45 }
 0x3c3   : > { %4012 = vmatprep.mubr.msk.bf16.mxu1 %vm4155_vm2, %v4154_v1  ;;  %4028 = vmatprep.mubr.msk.bf16.mxu0 %vm4155_vm2, %v4154_v1 }
 0x3ca   : > { %4013 = vmatmul.mubr.msk.bf16.gmra.mxu1 %vm265_vm1, %v4902_v46  ;;  %4029 = vmatmul.mubr.msk.bf16.gmra.mxu0 %vm265_vm1, %v4902_v46 }
 0x3cb   : > { %4036 = vmatprep.mubr.msk.bf16.mxu1 %vm4155_vm2, %v4154_v1  ;;  %4050 = vmatprep.mubr.msk.bf16.mxu0 %vm4155_vm2, %v4154_v1 }
 0x3d2   : > { %4037 = vmatmul.mubr.msk.bf16.vlgmr.msra.gmra.mxu1 %vm265_vm1, %v4867_v13 }
 0x3d3   : > { %4040 = vmatprep.mubr.msk.bf16.mxu1 %vm4155_vm2, %v4154_v1 }
 0x3da   : > { %4041 = vmatmul.mubr.msk.bf16.gmra.mxu1 %vm265_vm1, %v4890_v45 }
 0x3db   : > { %4044 = vmatprep.mubr.msk.bf16.mxu1 %vm4155_vm2, %v4154_v1 }
 0x3e2   : > { %4045 = vmatmul.mubr.msk.bf16.gmra.mxu1 %vm265_vm1, %v4902_v46 }
 0x431   : > { %v2336_v60 = vpop.f32.mrf.mxu1  ;;  %v2419_v50 = vpop.f32.mrf.mxu0 }
 0x432   : > { %v2361_v62 = vadd.f32 %v2357_v59, %v2336_v60 }
 0x433   : > { %v3910_v63 = vpop.f32.mrf.mxu1  ;;  %v3926_v0 = vpop.f32.mrf.mxu0 }
 0x434   : > { %2365 = vst.msk [vmem:[#allocation4 + $0x7] sm:$0xff] %vm1224_vm12, %v2361_v62 }
 0x435   : > { %v2339_v41 = vpop.f32.mrf.mxu1  ;;  %v2422_v3 = vpop.f32.mrf.mxu0 }
 0x436   : > { %v2362_v5 = vadd.f32 %v2358_v2, %v2339_v41 }
 0x437   : > { %v3911_v6 = vpop.f32.mrf.mxu1  ;;  %v3927_v7 = vpop.f32.mrf.mxu0 }
 0x438   : > { %2366 = vst.msk [vmem:[#allocation4 + $0xf] sm:$0xff] %vm1224_vm12, %v2362_v5 }
 0x43a   : > { %v2344_v9 = vpop.f32.mrf.mxu1  ;;  %v2427_v11 = vpop.f32.mrf.mxu0 }
 0x43b   : > { %v2363_v12 = vadd.f32 %v2359_v8, %v2344_v9  ;;  %v2440_v14 = vld [vmem:[#allocation4 + $0x6] sm:$0xff] }
 0x43c   : > { %v3914_v15 = vpop.f32.mrf.mxu1  ;;  %v3930_v16 = vpop.f32.mrf.mxu0  ;;  %v2444_v19 = vadd.f32 %v2440_v14, %v2419_v50 }
 0x43d   : > { %2367 = vst.msk [vmem:[#allocation4 + $0x17] sm:$0xff] %vm1224_vm12, %v2363_v12 }
 0x43e   : > { %v2347_v21 = vpop.f32.mrf.mxu1  ;;  %v2430_v22 = vpop.f32.mrf.mxu0  ;;  %2448 = vst.msk [vmem:[#allocation4 + $0x6] sm:$0xff] %vm1224_vm12, %v2444_v19 }
 0x43f   : > { %v2364_v23 = vadd.f32 %v2360_v18, %v2347_v21  ;;  %v2441_v24 = vld [vmem:[#allocation4 + $0xe] sm:$0xff] }
 0x440   : > { %v3915_v25 = vpop.f32.mrf.mxu1  ;;  %v3931_v27 = vpop.f32.mrf.mxu0  ;;  %v2445_v61 = vadd.f32 %v2441_v24, %v2422_v3 }
 0x441   : > { %2368 = vst.msk [vmem:[#allocation4 + $0x1f] sm:$0x1f] %vm1340_vm14, %v2364_v23 }
 0x442   : > { %v2352_v29 = vpop.f32.mrf.mxu1  ;;  %v2435_v31 = vpop.f32.mrf.mxu0  ;;  %2449 = vst.msk [vmem:[#allocation4 + $0xe] sm:$0xff] %vm1224_vm12, %v2445_v61 }
 0x444   : > { %v2442_v32 = vld [vmem:[#allocation4 + $0x16] sm:$0xff]  ;;  %v3918_v30 = vpop.f32.mrf.mxu1  ;;  %v3934_v34 = vpop.f32.mrf.mxu0 }
 0x445   : > { %v2446_v35 = vadd.f32 %v2442_v32, %v2427_v11  ;;  %v2523_v42 = vld [vmem:[#allocation4 + $0x5] sm:$0xff] }
 0x446   : > { %v2354_v37 = vpop.f32.mrf.mxu1  ;;  %v2437_v36 = vpop.f32.mrf.mxu0 }
 0x447   : > { %2450 = vst.msk [vmem:[#allocation4 + $0x16] sm:$0xff] %vm1224_vm12, %v2446_v35 }
 0x448   : > { %v2443_v38 = vld [vmem:[#allocation4 + $0x1e] sm:$0x3f]  ;;  %v3919_v39 = vpop.f32.mrf.mxu1  ;;  %v3935_v13 = vpop.f32.mrf.mxu0 }
 0x449   : > { %v2447_v40 = vadd.f32 %v2443_v38, %v2430_v22  ;;  %v2524_v47 = vld [vmem:[#allocation4 + $0xd] sm:$0xff] }
 0x44a   : > { %v2502_v28 = vpop.f32.mrf.mxu1  ;;  %v2585_v20 = vpop.f32.mrf.mxu0 }
 0x44b   : > { %2451 = vst.msk [vmem:[#allocation4 + $0x1e] sm:$0x3f] %vm1424_vm15, %v2447_v40  ;;  %v2527_v43 = vadd.f32 %v2523_v42, %v2502_v28 }
 0x44c   : > { %v3942_v44 = vpop.f32.mrf.mxu1  ;;  %v3958_v45 = vpop.f32.mrf.mxu0 }
 0x44d   : > { %2531 = vst.msk [vmem:[#allocation4 + $0x5] sm:$0xff] %vm1224_vm12, %v2527_v43 }
 0x44e   : > { %v2505_v46 = vpop.f32.mrf.mxu1  ;;  %v2588_v48 = vpop.f32.mrf.mxu0  ;;  %v2525_v54 = vld [vmem:[#allocation4 + $0x15] sm:$0xff] }
 0x44f   : > { %v2528_v49 = vadd.f32 %v2524_v47, %v2505_v46 }
 0x450   : > { %v3943_v51 = vpop.f32.mrf.mxu1  ;;  %v3959_v52 = vpop.f32.mrf.mxu0 }
 0x451   : > { %2532 = vst.msk [vmem:[#allocation4 + $0xd] sm:$0xff] %vm1224_vm12, %v2528_v49 }
 0x452   : > { %v2510_v53 = vpop.f32.mrf.mxu1  ;;  %v2593_v55 = vpop.f32.mrf.mxu0  ;;  %v2526_v62 = vld [vmem:[#allocation4 + $0x1d] sm:$0x7f] }
 0x453   : > { %v2529_v56 = vadd.f32 %v2525_v54, %v2510_v53 }
 0x454   : > { %v2607_v57 = vld [vmem:[#allocation4 + $0x1] sm:$0xff]  ;;  %v3946_v58 = vpop.f32.mrf.mxu1  ;;  %v3962_v59 = vpop.f32.mrf.mxu0 }
 0x455   : > { %v2612_v60 = vadd.f32 %v2607_v57, %v2585_v20  ;;  %2533 = vst.msk [vmem:[#allocation4 + $0x15] sm:$0xff] %vm1224_vm12, %v2529_v56 }
 0x456   : > { %v2513_v50 = vpop.f32.mrf.mxu1  ;;  %v2596_v63 = vpop.f32.mrf.mxu0 }
 0x457   : > { %2617 = vst.msk [vmem:[#allocation4 + $0x1] sm:$0xff] %vm1224_vm12, %v2612_v60  ;;  %v2530_v0 = vadd.f32 %v2526_v62, %v2513_v50 }
 0x458   : > { %v2608_v2 = vld [vmem:[#allocation4 + $0x9] sm:$0xff]  ;;  %v3947_v41 = vpop.f32.mrf.mxu1  ;;  %v3963_v3 = vpop.f32.mrf.mxu0 }
 0x459   : > { %v2613_v5 = vadd.f32 %v2608_v2, %v2588_v48  ;;  %2534 = vst.msk [vmem:[#allocation4 + $0x1d] sm:$0x7f] %vm1508_vm4, %v2530_v0 }
 0x45a   : > { %v2518_v6 = vpop.f32.mrf.mxu1  ;;  %v2601_v7 = vpop.f32.mrf.mxu0 }
 0x45b   : > { %2618 = vst.msk [vmem:[#allocation4 + $0x9] sm:$0xff] %vm1224_vm12, %v2613_v5 }
 0x45c   : > { %v2609_v8 = vld [vmem:[#allocation4 + $0x11] sm:$0xff]  ;;  %v3950_v9 = vpop.f32.mrf.mxu1  ;;  %v3966_v11 = vpop.f32.mrf.mxu0 }
 0x45d   : > { %v2614_v12 = vadd.f32 %v2609_v8, %v2593_v55 }
 0x45e   : > { %v2520_v14 = vpop.f32.mrf.mxu1  ;;  %v2604_v15 = vpop.f32.mrf.mxu0  ;;  %v2694_v25 = vld [vmem:[#allocation4] sm:$0xff] }
 0x45f   : > { %2619 = vst.msk [vmem:[#allocation4 + $0x11] sm:$0xff] %vm1224_vm12, %v2614_v12 }
 0x460   : > { %v2610_v16 = vld [vmem:[#allocation4 + $0x19] sm:$0xff]  ;;  %v2611_v18 = vld [vmem:[#allocation4 + $0x21] sm:$0x7]  ;;  %v3951_v19 = vpop.f32.mrf.mxu1  ;;  %v3967_v21 = vpop.f32.mrf.mxu0 }
 0x461   : > { %v2615_v22 = vadd.f32 %v2610_v16, %v2596_v63  ;;  %v2616_v23 = vadd.f32 %v2611_v18, %v2601_v7 }
 0x462   : > { %v2672_v24 = vpop.f32.mrf.mxu1  ;;  %v2759_v27 = vpop.f32.mrf.mxu0  ;;  %v2695_v30 = vld [vmem:[#allocation4 + $0x8] sm:$0xff] }
 0x463   : > { %2620 = vst.msk [vmem:[#allocation4 + $0x19] sm:$0xff] %vm1224_vm12, %v2615_v22  ;;  %v2699_v61 = vadd.f32 %v2694_v25, %v2672_v24  ;;  %v2791_v39 = vrot.slane %v2759_v27, 1 }
 0x464   : > { %2621 = vst.msk [vmem:[#allocation4 + $0x21] sm:$0x7] %vm1596_vm5, %v2616_v23  ;;  %v3974_v29 = vpop.f32.mrf.mxu1  ;;  %v3990_v31 = vpop.f32.mrf.mxu0 }
 0x465   : > { %2704 = vst.msk [vmem:[#allocation4] sm:$0xff] %vm1224_vm12, %v2699_v61 }
 0x466   : > { %v2675_v32 = vpop.f32.mrf.mxu1  ;;  %v2762_v34 = vpop.f32.mrf.mxu0  ;;  %v2696_v40 = vld [vmem:[#allocation4 + $0x10] sm:$0xff] }
 0x467   : > { %v2700_v35 = vadd.f32 %v2695_v30, %v2675_v32  ;;  %v2792_v37 = vrot.slane %v2762_v34, 1 }
 0x468   : > { %v3975_v36 = vpop.f32.mrf.mxu1  ;;  %v3991_v38 = vpop.f32.mrf.mxu0 }
 0x469   : > { %2705 = vst.msk [vmem:[#allocation4 + $0x8] sm:$0xff] %vm1224_vm12, %v2700_v35  ;;  %v2793_v43 = vsel %vm807_vm8, %v2791_v39, %v2792_v37 }
 0x46a   : > { %v2680_v13 = vpop.f32.mrf.mxu1  ;;  %v2767_v28 = vpop.f32.mrf.mxu0  ;;  %v2697_v49 = vld [vmem:[#allocation4 + $0x18] sm:$0xff] }
 0x46b   : > { %v2701_v42 = vadd.f32 %v2696_v40, %v2680_v13  ;;  %v2794_v44 = vrot.slane %v2767_v28, 1  ;;  %v2698_v60 = vld [vmem:[#allocation4 + $0x20] sm:$0xf] }
 0x46c   : > { %v2781_v20 = vld [vmem:[#allocation4] sm:$0xff]  ;;  %v3978_v45 = vpop.f32.mrf.mxu1  ;;  %v3994_v46 = vpop.f32.mrf.mxu0 }
 0x46d   : > { %v2805_v47 = vadd.f32 %v2793_v43, %v2781_v20  ;;  %2706 = vst.msk [vmem:[#allocation4 + $0x10] sm:$0xff] %vm1224_vm12, %v2701_v42  ;;  %v2795_v54 = vsel %vm807_vm8, %v2792_v37, %v2794_v44 }
 0x46e   : > { %v2683_v48 = vpop.f32.mrf.mxu1  ;;  %v2770_v51 = vpop.f32.mrf.mxu0 }
 0x46f   : > { %2810 = vst.msk [vmem:[#allocation4] sm:$0xff] %vm1224_vm12, %v2805_v47  ;;  %v2702_v52 = vadd.f32 %v2697_v49, %v2683_v48  ;;  %v2796_v55 = vrot.slane %v2770_v51, 1 }
 0x470   : > { %v2782_v53 = vld [vmem:[#allocation4 + $0x8] sm:$0xff]  ;;  %v3979_v56 = vpop.f32.mrf.mxu1  ;;  %v3995_v57 = vpop.f32.mrf.mxu0 }
 0x471   : > { %v2806_v58 = vadd.f32 %v2795_v54, %v2782_v53  ;;  %2707 = vst.msk [vmem:[#allocation4 + $0x18] sm:$0xff] %vm1224_vm12, %v2702_v52  ;;  %v2797_v0 = vsel %vm807_vm8, %v2794_v44, %v2796_v55 }
 0x472   : > { %v2688_v59 = vpop.f32.mrf.mxu1  ;;  %v2775_v50 = vpop.f32.mrf.mxu0 }
 0x473   : > { %2811 = vst.msk [vmem:[#allocation4 + $0x8] sm:$0xff] %vm1224_vm12, %v2806_v58  ;;  %v2703_v62 = vadd.f32 %v2698_v60, %v2688_v59  ;;  %v2798_v2 = vrot.slane %v2775_v50, 1 }
 0x474   : > { %v2783_v63 = vld [vmem:[#allocation4 + $0x10] sm:$0xff]  ;;  %v3982_v41 = vpop.f32.mrf.mxu1  ;;  %v3998_v3 = vpop.f32.mrf.mxu0 }
 0x475   : > { %v2807_v5 = vadd.f32 %v2797_v0, %v2783_v63  ;;  %2708 = vst.msk [vmem:[#allocation4 + $0x20] sm:$0xf] %vm1229_vm13, %v2703_v62  ;;  %v2799_v9 = vsel %vm807_vm8, %v2796_v55, %v2798_v2 }
 0x476   : > { %v2691_v6 = vpop.f32.mrf.mxu1  ;;  %v2778_v7 = vpop.f32.mrf.mxu0  ;;  %v2887_v31 = vld [vmem:[#allocation4] sm:$0xff] }
 0x477   : > { %2812 = vst.msk [vmem:[#allocation4 + $0x10] sm:$0xff] %vm1224_vm12, %v2807_v5 }
 0x478   : > { %v2784_v8 = vld [vmem:[#allocation4 + $0x18] sm:$0xff]  ;;  %v3983_v11 = vpop.f32.mrf.mxu1  ;;  %v3999_v12 = vpop.f32.mrf.mxu0 }
 0x479   : > { %v2808_v14 = vadd.f32 %v2799_v9, %v2784_v8 }
 0x47a   : > { %v2865_v15 = vpop.f32.mrf.mxu1  ;;  %v2967_v16 = vpop.f32.mrf.mxu0  ;;  %v2888_v39 = vld [vmem:[#allocation4 + $0x8] sm:$0xff] }
 0x47b   : > { %2813 = vst.msk [vmem:[#allocation4 + $0x18] sm:$0xff] %vm1224_vm12, %v2808_v14  ;;  %v2896_v25 = vrot.slane %v2865_v15, 5  ;;  %v2998_v46 = vrot.slane %v2967_v16, 6 }
 0x47c   : > { %v2785_v18 = vld [vmem:[#allocation4 + $0x20] sm:$0x7]  ;;  %v4006_v19 = vpop.f32.mrf.mxu1  ;;  %v4022_v21 = vpop.f32.mrf.mxu0 }
 0x47d   : > { %v2809_v22 = vadd.f32 %v2798_v2, %v2785_v18 }
 0x47e   : > { %v2868_v23 = vpop.f32.mrf.mxu1  ;;  %v2970_v24 = vpop.f32.mrf.mxu0  ;;  %v2889_v47 = vld [vmem:[#allocation4 + $0x10] sm:$0xff] }
 0x47f   : > { %2814 = vst.msk [vmem:[#allocation4 + $0x20] sm:$0x7] %vm1596_vm5, %v2809_v22  ;;  %v2897_v27 = vrot.slane %v2868_v23, 5  ;;  %v2999_v20 = vrot.slane %v2970_v24, 6 }
 0x480   : > { %v4007_v61 = vpop.f32.mrf.mxu1  ;;  %v4023_v29 = vpop.f32.mrf.mxu0 }
 0x481   : > { %v2898_v32 = vsel %vm913_vm9, %v2896_v25, %v2897_v27  ;;  %v3000_v54 = vsel %vm1016_vm10, %v2998_v46, %v2999_v20 }
 0x482   : > { %v2909_v30 = vadd.f32 %v2898_v32, %v2887_v31  ;;  %v2873_v34 = vpop.f32.mrf.mxu1  ;;  %v2975_v35 = vpop.f32.mrf.mxu0  ;;  %v2890_v60 = vld [vmem:[#allocation4 + $0x18] sm:$0x7f] }
 0x483   : > { %v2899_v37 = vrot.slane %v2873_v34, 5  ;;  %v3001_v55 = vrot.slane %v2975_v35, 6 }
 0x484   : > { %2913 = vst.msk [vmem:[#allocation4] sm:$0xff] %vm1224_vm12, %v2909_v30  ;;  %v4010_v36 = vpop.f32.mrf.mxu1  ;;  %v4026_v38 = vpop.f32.mrf.mxu0 }
 0x485   : > { %v2900_v13 = vsel %vm913_vm9, %v2897_v27, %v2899_v37  ;;  %v3002_v41 = vsel %vm1016_vm10, %v2999_v20, %v3001_v55 }
 0x486   : > { %v2910_v40 = vadd.f32 %v2900_v13, %v2888_v39  ;;  %v2876_v28 = vpop.f32.mrf.mxu1  ;;  %v2978_v42 = vpop.f32.mrf.mxu0 }
 0x487   : > { %v2901_v43 = vrot.slane %v2876_v28, 5  ;;  %v3003_v3 = vrot.slane %v2978_v42, 6 }
 0x488   : > { %2914 = vst.msk [vmem:[#allocation4 + $0x8] sm:$0xff] %vm1224_vm12, %v2910_v40  ;;  %v4011_v44 = vpop.f32.mrf.mxu1  ;;  %v4027_v45 = vpop.f32.mrf.mxu0 }
 0x489   : > { %v2902_v48 = vsel %vm913_vm9, %v2899_v37, %v2901_v43  ;;  %v3004_v11 = vsel %vm1016_vm10, %v3001_v55, %v3003_v3 }
 0x48a   : > { %v2911_v49 = vadd.f32 %v2902_v48, %v2889_v47  ;;  %v2881_v51 = vpop.f32.mrf.mxu1  ;;  %v2983_v52 = vpop.f32.mrf.mxu0 }
 0x48b   : > { %v2989_v53 = vld [vmem:[#allocation4] sm:$0xff]  ;;  %v2903_v56 = vrot.slane %v2881_v51, 5  ;;  %v3005_v12 = vrot.slane %v2983_v52, 6 }
 0x48c   : > { %v3011_v57 = vadd.f32 %v3000_v54, %v2989_v53  ;;  %2915 = vst.msk [vmem:[#allocation4 + $0x10] sm:$0xff] %vm1224_vm12, %v2911_v49  ;;  %v4014_v58 = vpop.f32.mrf.mxu1  ;;  %v4030_v59 = vpop.f32.mrf.mxu0 }
 0x48d   : > { %v2904_v50 = vsel %vm913_vm9, %v2901_v43, %v2903_v56  ;;  %v3006_v19 = vsel %vm1016_vm10, %v3003_v3, %v3005_v12  ;;  %v3125_v59 = vld [vmem:[#allocation4 + $0x20] sm:$0xf] }
 0x48e   : > { %3015 = vst.msk [vmem:[#allocation4] sm:$0xff] %vm1224_vm12, %v3011_v57  ;;  %v2912_v62 = vadd.f32 %v2904_v50, %v2890_v60  ;;  %v2884_v63 = vpop.f32.mrf.mxu1  ;;  %v2986_v0 = vpop.f32.mrf.mxu0  ;;  %v3130_v60 = vmax.f32 %v3125_v59, 0.0 }
 0x48f   : > { %v2990_v2 = vld [vmem:[#allocation4 + $0x8] sm:$0xff] }
 0x490   : > { %v3012_v5 = vadd.f32 %v3002_v41, %v2990_v2  ;;  %2916 = vst.msk [vmem:[#allocation4 + $0x18] sm:$0x7f] %vm1508_vm4, %v2912_v62  ;;  %v4015_v6 = vpop.f32.mrf.mxu1  ;;  %v4031_v7 = vpop.f32.mrf.mxu0  ;;  %v3133_v50 = vpack.c.bf16 %v3130_v60, %v3130_v60 }
 0x492   : > { %3016 = vst.msk [vmem:[#allocation4 + $0x8] sm:$0xff] %vm1224_vm12, %v3012_v5  ;;  %v3069_v8 = vpop.f32.mrf.mxu1 }
 0x493   : > { %v2991_v9 = vld [vmem:[#allocation4 + $0x10] sm:$0xff]  ;;  %v3100_v21 = vrot.slane %v3069_v8, 7 }
 0x494   : > { %v3013_v14 = vadd.f32 %v3004_v11, %v2991_v9  ;;  %v4038_v15 = vpop.f32.mrf.mxu1 }
 0x495   : > { %v3091_v25 = vld [vmem:[#allocation4] sm:$0xff] }
 0x496   : > { %3017 = vst.msk [vmem:[#allocation4 + $0x10] sm:$0xff] %vm1224_vm12, %v3013_v14  ;;  %v3072_v16 = vpop.f32.mrf.mxu1 }
 0x497   : > { %v2992_v18 = vld [vmem:[#allocation4 + $0x18] sm:$0x3f]  ;;  %v3101_v22 = vrot.slane %v3072_v16, 7 }
 0x498   : > { %v3014_v23 = vadd.f32 %v3006_v19, %v2992_v18  ;;  %v4039_v24 = vpop.f32.mrf.mxu1 }
 0x499   : > { %v3102_v27 = vsel %vm1119_vm11, %v3100_v21, %v3101_v22  ;;  %v3092_v30 = vld [vmem:[#allocation4 + $0x8] sm:$0xff] }
 0x49a   : > { %3018 = vst.msk [vmem:[#allocation4 + $0x18] sm:$0x3f] %vm1424_vm15, %v3014_v23  ;;  %v3113_v61 = vadd.f32 %v3102_v27, %v3091_v25  ;;  %v3077_v29 = vpop.f32.mrf.mxu1 }
 0x49b   : > { %v3103_v31 = vrot.slane %v3077_v29, 7 }
 0x49c   : > { %3117 = vst.msk [vmem:[#allocation4] sm:$0xff] %vm1224_vm12, %v3113_v61  ;;  %v4042_v32 = vpop.f32.mrf.mxu1 }
 0x49d   : > { %v3104_v34 = vsel %vm1119_vm11, %v3101_v22, %v3103_v31  ;;  %v3093_v39 = vld [vmem:[#allocation4 + $0x10] sm:$0xff] }
 0x49e   : > { %v3114_v35 = vadd.f32 %v3104_v34, %v3092_v30  ;;  %v3080_v37 = vpop.f32.mrf.mxu1 }
 0x49f   : > { %v3105_v36 = vrot.slane %v3080_v37, 7 }
 0x4a0   : > { %3118 = vst.msk [vmem:[#allocation4 + $0x8] sm:$0xff] %vm1224_vm12, %v3114_v35  ;;  %v4043_v38 = vpop.f32.mrf.mxu1 }
 0x4a1   : > { %v3106_v13 = vsel %vm1119_vm11, %v3103_v31, %v3105_v36  ;;  %v3094_v43 = vld [vmem:[#allocation4 + $0x18] sm:$0x1f] }
 0x4a2   : > { %v3115_v40 = vadd.f32 %v3106_v13, %v3093_v39  ;;  %v3085_v28 = vpop.f32.mrf.mxu1 }
 0x4a3   : > { %v3107_v42 = vrot.slane %v3085_v28, 7  ;;  %v3121_v45 = vld [vmem:[#allocation4] sm:$0xff] }
 0x4a4   : > { %3119 = vst.msk [vmem:[#allocation4 + $0x10] sm:$0xff] %vm1224_vm12, %v3115_v40  ;;  %v4046_v20 = vpop.f32.mrf.mxu1  ;;  %v3126_v51 = vmax.f32 %v3121_v45, 0.0 }
 0x4a5   : > { %v3108_v44 = vsel %vm1119_vm11, %v3105_v36, %v3107_v42 }
 0x4a6   : > { %v3116_v46 = vadd.f32 %v3108_v44, %v3094_v43  ;;  %v3088_v47 = vpop.f32.mrf.mxu1 }
 0x4a7   : > { %v3122_v48 = vld [vmem:[#allocation4 + $0x8] sm:$0xff] }
 0x4a8   : > { %3120 = vst.msk [vmem:[#allocation4 + $0x18] sm:$0x1f] %vm1340_vm14, %v3116_v46  ;;  %v4047_v49 = vpop.f32.mrf.mxu1  ;;  %v3127_v52 = vmax.f32 %v3122_v48, 0.0 }
 0x4aa   : > { %v3131_v53 = vpack.c.bf16 %v3127_v52, %v3126_v51 }
 0x4ab   : > { %v3123_v54 = vld [vmem:[#allocation4 + $0x10] sm:$0xff] }
 0x4ac   : > { %4051 = vmatmul.mubr.msk.bf16.vlgmr.msra.gmra.mxu0 %vm1224_vm12, %v3131_v53  ;;  %v3128_v56 = vmax.f32 %v3123_v54, 0.0 }
 0x4ad   : > { %4054 = vmatprep.mubr.msk.bf16.mxu0 %vm4155_vm2, %v4154_v1 }
 0x4af   : > { %v3124_v55 = vld [vmem:[#allocation4 + $0x18] sm:$0xff] }
 0x4b0   : > { %v3129_v57 = vmax.f32 %v3124_v55, 0.0 }
 0x4b2   : > { %v3132_v58 = vpack.c.bf16 %v3129_v57, %v3128_v56 }
 0x4b4   : > { %4055 = vmatmul.mubr.msk.bf16.gmra.mxu0 %vm1224_vm12, %v3132_v58 }
 0x4b5   : > { %4058 = vmatprep.mubr.msk.bf16.mxu0 %vm4155_vm2, %v4154_v1 }
 0x4bc   : > { %4059 = vmatmul.mubr.msk.bf16.gmra.mxu0 %vm1224_vm12, %v3133_v50 }
 0x56c   : > { %v3185_v62 = vpop.f32.mrf.mxu0 }
 0x56d   : > { %v3207_v63 = vadd.f32 %v3185_v62, %v4842_v4 }
 0x56e   : > { %v4052_v0 = vpop.f32.mrf.mxu0 }
 0x56f   : > { %v3212_v2 = vmax.f32 %v3207_v63, 0.0 }
 0x570   : > { %v3188_v41 = vpop.f32.mrf.mxu0 }
 0x571   : > { %3217 = vst.msk [vmem:[%s251_s24] sm:$0xff] %vm265_vm1, %v3212_v2  ;;  %v3208_v3 = vadd.f32 %v3188_v41, %v4846_v10 }
 0x572   : > { %v4053_v1 = vpop.f32.mrf.mxu0 }
 0x573   : > { %v3213_v5 = vmax.f32 %v3208_v3, 0.0 }
 0x574   : > { %v3193_v6 = vpop.f32.mrf.mxu0 }
 0x575   : > { %3218 = vst.msk [vmem:[%s251_s24 + $0x8] sm:$0xff] %vm265_vm1, %v3213_v5  ;;  %v3209_v7 = vadd.f32 %v3193_v6, %v4851_v17 }
 0x576   : > { %v4056_v8 = vpop.f32.mrf.mxu0 }
 0x577   : > { %v3214_v4 = vmax.f32 %v3209_v7, 0.0 }
 0x578   : > { %v3196_v9 = vpop.f32.mrf.mxu0 }
 0x579   : > { %3219 = vst.msk [vmem:[%s251_s24 + $0x10] sm:$0xff] %vm265_vm1, %v3214_v4  ;;  %v3210_v11 = vadd.f32 %v3196_v9, %v4856_v26 }
 0x57a   : > { %v4057_v12 = vpop.f32.mrf.mxu0 }
 0x57b   : > { %v3215_v14 = vmax.f32 %v3210_v11, 0.0 }
 0x57c   : > { %v3201_v15 = vpop.f32.mrf.mxu0 }
 0x57d   : > { %3220 = vst.msk [vmem:[%s251_s24 + $0x18] sm:$0xff] %vm265_vm1, %v3215_v14  ;;  %v3211_v10 = vadd.f32 %v3201_v15, %v4861_v33 }
 0x57e   : > { %v4060_v16 = vpop.f32.mrf.mxu0 }
 0x57f   : > { %v3216_v18 = vmax.f32 %v3211_v10, 0.0 }
 0x580   : > { %v3204_v19 = vpop.f32.mrf.mxu0 }
 0x581   : > { %3221 = vst.msk [vmem:[%s251_s24 + $0x20] sm:$0xf] %vm258_vm0, %v3216_v18 }
 0x582   : > { %v4061_v17 = vpop.f32.mrf.mxu0 }
 0x583 PF: > { %s16_s21 = sadd.s32 1, %s4152_s21  }
 0x584   : > { %p13_p4 = scmp.ge.s32.totalorder %s16_s21, 4  }
 0x586   :  { %15 = sbr.rel (!%p13_p4) target bundleno = 1 (0x1), region = 74 }

</bundles_post_ra>
